<compile_context>
chip_gen: v5e
topology: v5e:2x2
jax: 0.10.0
libtpu: 0.0.40
codegen_flags: <defaults>
</compile_context>

<pallas_src>
import functools

import jax
import jax.numpy as jnp
from jax.experimental import pallas as pl
from jax.experimental.pallas import tpu as pltpu

LANE = 128


def _round_up(v, m):
    return ((v + m - 1) // m) * m


# -----------------------------------------------------------------------------
# Fused kernel:  per image
#   h    = SiLU(x_pix @ W_stem + b_stem)         (1x1 pointwise conv, VPU MAC)
#   feat = mean_pixels(h)                        (global average pool)
#   out  = feat @ W_head + b_head                (head; Dropout is identity in eval)
# -----------------------------------------------------------------------------
def _fused_kernel(x_ref, ws_ref, bs_ref, wh_ref, bh_ref, out_ref):
    # x_ref : [B, C, HW]   (NCHW with H*W merged; HW on the 128-lane axis)
    # ws_ref: [Fp, C]      (w_stem^T, F zero-padded to Fp=128)
    # bs_ref: [Fp, 1]
    # wh_ref: [Fp, Op]     (w_head,   O zero-padded to Op=128)
    # bh_ref: [1, Op]
    # out   : [B, Op]      (lane-dense logits slab; wrapper slices [:, :O])
    B, C, _ = x_ref.shape
    ws = ws_ref[...]
    bs = bs_ref[...]
    wh = wh_ref[...]
    bh = bh_ref[...]

    rows = []
    for b in range(B):                      # static, unrolled at trace time
        xb = x_ref[b]                       # [C, HW]
        # 1x1 conv as a C-term VPU outer-product MAC (K=C=4 would starve the MXU):
        #   h[f, p] = sum_c ws[f, c] * x[c, p] + bs[f]
        h = ws[:, 0:1] * xb[0:1, :]         # [Fp, 1] * [1, HW] -> [Fp, HW]
        for c in range(1, C):
            h = h + ws[:, c:c + 1] * xb[c:c + 1, :]
        h = h + bs
        h = h * jax.nn.sigmoid(h)           # SiLU (EfficientNet activation), EUP
        # Global average pool over pixels (lane reduction).  Padded f-rows are
        # exactly SiLU(0) = 0, so they contribute nothing downstream.
        feat = jnp.mean(h, axis=1, keepdims=True)               # [Fp, 1]
        # Head: Dropout(0.2) is identity at inference; Linear as a VPU mat-vec
        # (sublane reduction) so the result lands directly as a lane-dense row.
        logits = jnp.sum(wh * feat, axis=0, keepdims=True) + bh  # [1, Op]
        rows.append(logits)

    out_ref[...] = jnp.concatenate(rows, axis=0).astype(out_ref.dtype)


def fused_forward(x_bchw, ws_t, bs_col, wh_p, bh_row):
    B, C, HW = x_bchw.shape
    Fp = ws_t.shape[0]
    Op = wh_p.shape[1]
    return pl.pallas_call(
        _fused_kernel,
        out_shape=jax.ShapeDtypeStruct((B, Op), jnp.float32),
        grid=(1,),  # whole batch in one step; working set is tiny (< 1 MiB VMEM)
        in_specs=[
            pl.BlockSpec((B, C, HW), lambda i: (0, 0, 0)),
            pl.BlockSpec((Fp, C), lambda i: (0, 0)),   # constant index_map ->
            pl.BlockSpec((Fp, 1), lambda i: (0, 0)),   # weights DMA'd once,
            pl.BlockSpec((Fp, Op), lambda i: (0, 0)),  # resident in VMEM
            pl.BlockSpec((1, Op), lambda i: (0, 0)),
        ],
        out_specs=pl.BlockSpec((B, Op), lambda i: (0, 0)),
        compiler_params=pltpu.CompilerParams(
            dimension_semantics=("arbitrary",),
        ),
    )(x_bchw, ws_t, bs_col, wh_p, bh_row)


# -----------------------------------------------------------------------------
# Full forward (eval mode).  No NCHW->NHWC transpose: reshape is metadata-only.
# -----------------------------------------------------------------------------
@functools.partial(jax.jit, static_argnames=("output_dim",))
def image_classifier_forward(x_nchw, padded, *, output_dim):
    B, C, H, W = x_nchw.shape
    x_bchw = x_nchw.reshape(B, C, H * W)          # free reshape (no data movement)
    logits_slab = fused_forward(
        x_bchw, padded["ws_t"], padded["bs_col"], padded["wh"], padded["bh"]
    )
    return logits_slab[:, :output_dim]


def init_params(key, in_channels, in_features, output_dim):
    k1, k2, k3, k4 = jax.random.split(key, 4)
    # torch nn.Linear / conv default init: U(-1/sqrt(fan_in), 1/sqrt(fan_in))
    bound_stem = 1.0 / jnp.sqrt(in_channels)
    bound_head = 1.0 / jnp.sqrt(in_features)
    return {
        "w_stem": jax.random.uniform(k1, (in_channels, in_features),
                                     jnp.float32, -bound_stem, bound_stem),
        "b_stem": jax.random.uniform(k2, (in_features,),
                                     jnp.float32, -bound_stem, bound_stem),
        "w_head": jax.random.uniform(k3, (in_features, output_dim),
                                     jnp.float32, -bound_head, bound_head),
        "b_head": jax.random.uniform(k4, (output_dim,),
                                     jnp.float32, -bound_head, bound_head),
    }


def pad_params(params):
    """One-time weight prep: transpose/zero-pad so every kernel operand is lane-dense."""
    w_stem = params["w_stem"]                     # [C, F]
    w_head = params["w_head"]                     # [F, O]
    C, F = w_stem.shape
    O = w_head.shape[1]
    Fp = _round_up(F, LANE)
    Op = _round_up(O, LANE)
    ws_t = jnp.zeros((Fp, C), jnp.float32).at[:F, :].set(w_stem.T)
    bs_col = jnp.zeros((Fp, 1), jnp.float32).at[:F, 0].set(params["b_stem"])
    wh = jnp.zeros((Fp, Op), jnp.float32).at[:F, :O].set(w_head)
    bh = jnp.zeros((1, Op), jnp.float32).at[0, :O].set(params["b_head"])
    return {"ws_t": ws_t, "bs_col": bs_col, "wh": wh, "bh": bh}


if __name__ == "__main__":
    key = jax.random.PRNGKey(0)
    kx, kp = jax.random.split(key)

    B, C, H, W = 2, 4, 16, 16     # small NCHW input
    in_features = 32              # synthetic backbone feature dim
    output_dim = 8                # classifier output dim

    x = jax.random.normal(kx, (B, C, H, W), dtype=jnp.float32)
    params = init_params(kp, C, in_features, output_dim)
    padded = pad_params(params)   # one-time prep, outside the hot path

    logits = image_classifier_forward(x, padded, output_dim=output_dim)
    logits = jax.block_until_ready(logits)

    # reference check (pure JAX) for sanity
    x_bpc = jnp.transpose(x, (0, 2, 3, 1)).reshape(B, H * W, C)
    h_ref = jnp.einsum("bpc,cf->bpf", x_bpc, params["w_stem"]) + params["b_stem"]
    h_ref = h_ref * jax.nn.sigmoid(h_ref)
    feat_ref = jnp.mean(h_ref, axis=1)
    logits_ref = feat_ref @ params["w_head"] + params["b_head"]

    assert logits.shape == (B, output_dim)
    assert jnp.allclose(logits, logits_ref, atol=1e-5, rtol=1e-5)

    print("KERNEL_OK")
</pallas_src>

<mosaic_0001>
module attributes {stable_mosaic.version = 11 : i64} {
  func.func @_fused_kernel(%arg0: i32, %arg1: memref<2x4x256xf32, #tpu.memory_space<vmem>>, %arg2: memref<128x4xf32, #tpu.memory_space<vmem>>, %arg3: memref<128x1xf32, #tpu.memory_space<vmem>>, %arg4: memref<128x128xf32, #tpu.memory_space<vmem>>, %arg5: memref<1x128xf32, #tpu.memory_space<vmem>>, %arg6: memref<2x128xf32, #tpu.memory_space<vmem>>) attributes {dimension_semantics = [#tpu.dimension_semantics<arbitrary>], iteration_bounds = array<i64: 1>, scalar_prefetch = 0 : i64, scratch_operands = 0 : i64, tpu.core_type = #tpu.core_type<tc>, window_params = [{pipeline_mode = #tpu.pipeline_mode<synchronous>, transform_indices = @transform_0, window_bounds = array<i64: 2, 4, 256>}, {pipeline_mode = #tpu.pipeline_mode<synchronous>, transform_indices = @transform_1, window_bounds = array<i64: 128, 4>}, {pipeline_mode = #tpu.pipeline_mode<synchronous>, transform_indices = @transform_2, window_bounds = array<i64: 128, 1>}, {pipeline_mode = #tpu.pipeline_mode<synchronous>, transform_indices = @transform_3, window_bounds = array<i64: 128, 128>}, {pipeline_mode = #tpu.pipeline_mode<synchronous>, transform_indices = @transform_4, window_bounds = array<i64: 1, 128>}, {pipeline_mode = #tpu.pipeline_mode<synchronous>, transform_indices = @transform_5, window_bounds = array<i64: 2, 128>}]} {
    %c0 = arith.constant 0 : index
    %c0_0 = arith.constant 0 : index
    %0 = vector.load %arg2[%c0, %c0_0] : memref<128x4xf32, #tpu.memory_space<vmem>>, vector<128x4xf32>
    %c0_1 = arith.constant 0 : index
    %c0_2 = arith.constant 0 : index
    %1 = vector.load %arg3[%c0_1, %c0_2] : memref<128x1xf32, #tpu.memory_space<vmem>>, vector<128x1xf32>
    %c0_3 = arith.constant 0 : index
    %c0_4 = arith.constant 0 : index
    %2 = vector.load %arg4[%c0_3, %c0_4] : memref<128x128xf32, #tpu.memory_space<vmem>>, vector<128x128xf32>
    %c0_5 = arith.constant 0 : index
    %c0_6 = arith.constant 0 : index
    %3 = vector.load %arg5[%c0_5, %c0_6] : memref<1x128xf32, #tpu.memory_space<vmem>>, vector<1x128xf32>
    %c0_7 = arith.constant 0 : index
    %c0_8 = arith.constant 0 : index
    %c0_9 = arith.constant 0 : index
    %4 = vector.load %arg1[%c0_7, %c0_8, %c0_9] : memref<2x4x256xf32, #tpu.memory_space<vmem>>, vector<1x4x256xf32>
    %5 = vector.shape_cast %4 : vector<1x4x256xf32> to vector<4x256xf32>
    %6 = vector.extract_strided_slice %0 {offsets = [0, 0], sizes = [128, 1], strides = [1, 1]} : vector<128x4xf32> to vector<128x1xf32>
    %7 = vector.extract_strided_slice %5 {offsets = [0, 0], sizes = [1, 256], strides = [1, 1]} : vector<4x256xf32> to vector<1x256xf32>
    %8 = vector.broadcast %6 : vector<128x1xf32> to vector<128x256xf32>
    %9 = vector.broadcast %7 : vector<1x256xf32> to vector<128x256xf32>
    %10 = arith.mulf %8, %9 : vector<128x256xf32>
    %11 = vector.extract_strided_slice %0 {offsets = [0, 1], sizes = [128, 1], strides = [1, 1]} : vector<128x4xf32> to vector<128x1xf32>
    %12 = vector.extract_strided_slice %5 {offsets = [1, 0], sizes = [1, 256], strides = [1, 1]} : vector<4x256xf32> to vector<1x256xf32>
    %13 = vector.broadcast %11 : vector<128x1xf32> to vector<128x256xf32>
    %14 = vector.broadcast %12 : vector<1x256xf32> to vector<128x256xf32>
    %15 = arith.mulf %13, %14 : vector<128x256xf32>
    %16 = arith.addf %10, %15 : vector<128x256xf32>
    %17 = vector.extract_strided_slice %0 {offsets = [0, 2], sizes = [128, 1], strides = [1, 1]} : vector<128x4xf32> to vector<128x1xf32>
    %18 = vector.extract_strided_slice %5 {offsets = [2, 0], sizes = [1, 256], strides = [1, 1]} : vector<4x256xf32> to vector<1x256xf32>
    %19 = vector.broadcast %17 : vector<128x1xf32> to vector<128x256xf32>
    %20 = vector.broadcast %18 : vector<1x256xf32> to vector<128x256xf32>
    %21 = arith.mulf %19, %20 : vector<128x256xf32>
    %22 = arith.addf %16, %21 : vector<128x256xf32>
    %23 = vector.extract_strided_slice %0 {offsets = [0, 3], sizes = [128, 1], strides = [1, 1]} : vector<128x4xf32> to vector<128x1xf32>
    %24 = vector.extract_strided_slice %5 {offsets = [3, 0], sizes = [1, 256], strides = [1, 1]} : vector<4x256xf32> to vector<1x256xf32>
    %25 = vector.broadcast %23 : vector<128x1xf32> to vector<128x256xf32>
    %26 = vector.broadcast %24 : vector<1x256xf32> to vector<128x256xf32>
    %27 = arith.mulf %25, %26 : vector<128x256xf32>
    %28 = arith.addf %22, %27 : vector<128x256xf32>
    %29 = vector.broadcast %1 : vector<128x1xf32> to vector<128x256xf32>
    %30 = arith.addf %28, %29 : vector<128x256xf32>
    %31 = arith.negf %30 : vector<128x256xf32>
    %32 = math.exp %31 : vector<128x256xf32>
    %cst = arith.constant 1.000000e+00 : f32
    %33 = vector.broadcast %cst : f32 to vector<128x256xf32>
    %34 = arith.addf %33, %32 : vector<128x256xf32>
    %35 = arith.divf %33, %34 : vector<128x256xf32>
    %36 = arith.mulf %30, %35 : vector<128x256xf32>
    %cst_10 = arith.constant dense<0.000000e+00> : vector<128xf32>
    %37 = vector.multi_reduction <add>, %36, %cst_10 [1] : vector<128x256xf32> to vector<128xf32>
    %38 = vector.shape_cast %37 : vector<128xf32> to vector<128x1xf32>
    %cst_11 = arith.constant 2.560000e+02 : f32
    %39 = vector.broadcast %cst_11 : f32 to vector<128x1xf32>
    %40 = arith.divf %38, %39 : vector<128x1xf32>
    %41 = vector.broadcast %40 : vector<128x1xf32> to vector<128x128xf32>
    %42 = arith.mulf %2, %41 : vector<128x128xf32>
    %cst_12 = arith.constant dense<0.000000e+00> : vector<128xf32>
    %43 = vector.multi_reduction <add>, %42, %cst_12 [0] : vector<128x128xf32> to vector<128xf32>
    %44 = vector.shape_cast %43 : vector<128xf32> to vector<1x128xf32>
    %45 = arith.addf %44, %3 : vector<1x128xf32>
    %c1 = arith.constant 1 : index
    %c0_13 = arith.constant 0 : index
    %c0_14 = arith.constant 0 : index
    %46 = vector.load %arg1[%c1, %c0_13, %c0_14] : memref<2x4x256xf32, #tpu.memory_space<vmem>>, vector<1x4x256xf32>
    %47 = vector.shape_cast %46 : vector<1x4x256xf32> to vector<4x256xf32>
    %48 = vector.extract_strided_slice %0 {offsets = [0, 0], sizes = [128, 1], strides = [1, 1]} : vector<128x4xf32> to vector<128x1xf32>
    %49 = vector.extract_strided_slice %47 {offsets = [0, 0], sizes = [1, 256], strides = [1, 1]} : vector<4x256xf32> to vector<1x256xf32>
    %50 = vector.broadcast %48 : vector<128x1xf32> to vector<128x256xf32>
    %51 = vector.broadcast %49 : vector<1x256xf32> to vector<128x256xf32>
    %52 = arith.mulf %50, %51 : vector<128x256xf32>
    %53 = vector.extract_strided_slice %0 {offsets = [0, 1], sizes = [128, 1], strides = [1, 1]} : vector<128x4xf32> to vector<128x1xf32>
    %54 = vector.extract_strided_slice %47 {offsets = [1, 0], sizes = [1, 256], strides = [1, 1]} : vector<4x256xf32> to vector<1x256xf32>
    %55 = vector.broadcast %53 : vector<128x1xf32> to vector<128x256xf32>
    %56 = vector.broadcast %54 : vector<1x256xf32> to vector<128x256xf32>
    %57 = arith.mulf %55, %56 : vector<128x256xf32>
    %58 = arith.addf %52, %57 : vector<128x256xf32>
    %59 = vector.extract_strided_slice %0 {offsets = [0, 2], sizes = [128, 1], strides = [1, 1]} : vector<128x4xf32> to vector<128x1xf32>
    %60 = vector.extract_strided_slice %47 {offsets = [2, 0], sizes = [1, 256], strides = [1, 1]} : vector<4x256xf32> to vector<1x256xf32>
    %61 = vector.broadcast %59 : vector<128x1xf32> to vector<128x256xf32>
    %62 = vector.broadcast %60 : vector<1x256xf32> to vector<128x256xf32>
    %63 = arith.mulf %61, %62 : vector<128x256xf32>
    %64 = arith.addf %58, %63 : vector<128x256xf32>
    %65 = vector.extract_strided_slice %0 {offsets = [0, 3], sizes = [128, 1], strides = [1, 1]} : vector<128x4xf32> to vector<128x1xf32>
    %66 = vector.extract_strided_slice %47 {offsets = [3, 0], sizes = [1, 256], strides = [1, 1]} : vector<4x256xf32> to vector<1x256xf32>
    %67 = vector.broadcast %65 : vector<128x1xf32> to vector<128x256xf32>
    %68 = vector.broadcast %66 : vector<1x256xf32> to vector<128x256xf32>
    %69 = arith.mulf %67, %68 : vector<128x256xf32>
    %70 = arith.addf %64, %69 : vector<128x256xf32>
    %71 = vector.broadcast %1 : vector<128x1xf32> to vector<128x256xf32>
    %72 = arith.addf %70, %71 : vector<128x256xf32>
    %73 = arith.negf %72 : vector<128x256xf32>
    %74 = math.exp %73 : vector<128x256xf32>
    %cst_15 = arith.constant 1.000000e+00 : f32
    %75 = vector.broadcast %cst_15 : f32 to vector<128x256xf32>
    %76 = arith.addf %75, %74 : vector<128x256xf32>
    %77 = arith.divf %75, %76 : vector<128x256xf32>
    %78 = arith.mulf %72, %77 : vector<128x256xf32>
    %cst_16 = arith.constant dense<0.000000e+00> : vector<128xf32>
    %79 = vector.multi_reduction <add>, %78, %cst_16 [1] : vector<128x256xf32> to vector<128xf32>
    %80 = vector.shape_cast %79 : vector<128xf32> to vector<128x1xf32>
    %cst_17 = arith.constant 2.560000e+02 : f32
    %81 = vector.broadcast %cst_17 : f32 to vector<128x1xf32>
    %82 = arith.divf %80, %81 : vector<128x1xf32>
    %83 = vector.broadcast %82 : vector<128x1xf32> to vector<128x128xf32>
    %84 = arith.mulf %2, %83 : vector<128x128xf32>
    %cst_18 = arith.constant dense<0.000000e+00> : vector<128xf32>
    %85 = vector.multi_reduction <add>, %84, %cst_18 [0] : vector<128x128xf32> to vector<128xf32>
    %86 = vector.shape_cast %85 : vector<128xf32> to vector<1x128xf32>
    %87 = arith.addf %86, %3 : vector<1x128xf32>
    %88 = tpu.concatenate %45, %87 in 0 : vector<1x128xf32>, vector<1x128xf32> -> vector<2x128xf32>
    %c0_19 = arith.constant 0 : index
    %c0_20 = arith.constant 0 : index
    %89 = vector.load %arg6[%c0_19, %c0_20] : memref<2x128xf32, #tpu.memory_space<vmem>>, vector<2x128xf32>
    tpu.vector_store %arg6[%c0_19, %c0_20], %88 {strides = array<i32>} : memref<2x128xf32, #tpu.memory_space<vmem>>, vector<2x128xf32>,
    return
  }
  func.func @transform_0(%arg0: i32) -> (i32, i32, i32) {
    %c0_i32 = arith.constant 0 : i32
    %c0_i32_0 = arith.constant 0 : i32
    %c0_i32_1 = arith.constant 0 : i32
    %c0_i32_2 = arith.constant 0 : i32
    return %c0_i32, %c0_i32_0, %c0_i32_1 : i32, i32, i32
  }
  func.func @transform_1(%arg0: i32) -> (i32, i32) {
    %c0_i32 = arith.constant 0 : i32
    %c0_i32_0 = arith.constant 0 : i32
    %c0_i32_1 = arith.constant 0 : i32
    return %c0_i32, %c0_i32_0 : i32, i32
  }
  func.func @transform_2(%arg0: i32) -> (i32, i32) {
    %c0_i32 = arith.constant 0 : i32
    %c0_i32_0 = arith.constant 0 : i32
    %c0_i32_1 = arith.constant 0 : i32
    return %c0_i32, %c0_i32_0 : i32, i32
  }
  func.func @transform_3(%arg0: i32) -> (i32, i32) {
    %c0_i32 = arith.constant 0 : i32
    %c0_i32_0 = arith.constant 0 : i32
    %c0_i32_1 = arith.constant 0 : i32
    return %c0_i32, %c0_i32_0 : i32, i32
  }
  func.func @transform_4(%arg0: i32) -> (i32, i32) {
    %c0_i32 = arith.constant 0 : i32
    %c0_i32_0 = arith.constant 0 : i32
    %c0_i32_1 = arith.constant 0 : i32
    return %c0_i32, %c0_i32_0 : i32, i32
  }
  func.func @transform_5(%arg0: i32) -> (i32, i32) {
    %c0_i32 = arith.constant 0 : i32
    %c0_i32_0 = arith.constant 0 : i32
    %c0_i32_1 = arith.constant 0 : i32
    return %c0_i32, %c0_i32_0 : i32, i32
  }
}

</mosaic_0001>

<bundles_post_ra>
// kernel: image_classifier_forward.1
= control target key start
LH: loop header
LB: loop body
LE: loop exit
PB: predicated region body
PF: predicated region fallthrough
CT: control target
= control target key end

     0   :  { %v2869_v2 = vmov 1   ;;  %v5518_v3 = vmov 0   ;;  %s5512_s0 = inlined_call_operand.vmem [shape: f32[2,4,256], index: 0, kind: input, shape index: {}]   ;;  %s5513_s1 = inlined_call_operand.vmem [shape: f32[128,4], index: 1, kind: input, shape index: {}]   ;;  %s5514_s2 = inlined_call_operand.vmem [shape: f32[128,1], index: 2, kind: input, shape index: {}]   ;;  %s5515_s3 = inlined_call_operand.vmem [shape: f32[128,128], index: 3, kind: input, shape index: {}]   ;;  %s5516_s4 = inlined_call_operand.vmem [shape: f32[1,128], index: 4, kind: input, shape index: {}]   ;;  %s5517_s5 = inlined_call_operand.hbm [shape: f32[2,128], index: 5, kind: output, shape index: {}]  }
   0x1   :  { %v2908_v0 = vld [vmem:[%s5513_s1 + $0x20] sm:$0xff]  ;;  %v2913_v1 = vld [vmem:[%s5513_s1 + $0x10] sm:$0xff]  ;;  %2575 = vset.pattern.permute.xlu0 %v2869_v2  ;;  %2572 = vset.pattern.permute.xlu2 %v5518_v3 }
   0x2   :  { %2571 = vset.pattern.permute.xlu1 %v5518_v3  ;;  %93 = vperm.xlu2 %2572, %v2908_v0  }
   0x3   :  { %199 = vperm.xlu0 %2575, %v2913_v1   ;;  %83 = vperm.xlu1 %2571, %v2913_v1  }
   0x4   :  { %10 = vsyncpa [#allocation3], 0  ;;  %v2923_v4 = vld [vmem:[%s5513_s1 + $0x28] sm:$0xff]  ;;  %v2928_v5 = vld [vmem:[%s5513_s1 + $0x38] sm:$0xff]  ;;  %v2871_v13 = vmov 2   ;;  %v2872_v18 = vmov 3  }
   0x5   :  { %v2933_v6 = vld [vmem:[%s5513_s1 + $0x18] sm:$0xff]  ;;  %v2941_v7 = vld [vmem:[%s5513_s1 + $0x40] sm:$0xff]  ;;  %v2946_v8 = vld [vmem:[%s5513_s1 + $0x50] sm:$0xff]  ;;  %s2874_s11 = smov [#allocation2]   ;;  %s2491_s15 = sshll.u32 %s5517_s5, 4  ;;  %s2492_s15 = int_to_ptr.hbm [resolvable:$true] %s2491_s15 }
   0x6   :  { %v2954_v9 = vld [vmem:[%s5513_s1 + $0x58] sm:$0xff]  ;;  %v2959_v10 = vld [vmem:[%s5513_s1 + $0x68] sm:$0xff]  ;;  %v2967_v11 = vld [vmem:[%s5513_s1 + $0x70] sm:$0xff]  ;;  %s2489_s12 = sshll.u32 %s2874_s11, 4  ;;  %s2490_s12 = int_to_ptr.vmem [resolvable:$true] %s2489_s12 }
   0x7   :  { %v2972_v12 = vld [vmem:[%s5513_s1] sm:$0xff]  ;;  %v2980_v14 = vld [vmem:[%s5513_s1 + $0x8] sm:$0xff]  ;;  %v2991_v15 = vld [vmem:[%s5513_s1 + $0x30] sm:$0xff] }
   0x8   :  { %v2999_v16 = vld [vmem:[%s5513_s1 + $0x48] sm:$0xff]  ;;  %v3007_v17 = vld [vmem:[%s5513_s1 + $0x60] sm:$0xff]  ;;  %v3016_v19 = vld [vmem:[%s5513_s1 + $0x78] sm:$0xff] }
   0x9   :  { %v3034_v22 = vld [vmem:[%s5512_s0] sm:$0xff]  ;;  %v3039_v23 = vld [vmem:[%s5512_s0 + $0x8] sm:$0xff] }
   0xa   :  { %98 = vperm.xlu2 %2572, %v2923_v4   ;;  %5553 = vst [vmem:[#allocation5_spill] sm:$0xff] %v3039_v23  ;;  %v254_v25 = vperm.slane %v3034_v22, 1  ;;  %v255_v26 = vperm.slane %v3034_v22, 5  ;;  %v1494_v27 = vperm.slane %v3039_v23, 1  ;;  %v1495_v28 = vperm.slane %v3039_v23, 5 }
   0xb   :  { %219 = vperm.xlu0 %2575, %v2928_v5   ;;  %88 = vperm.xlu1 %2571, %v2933_v6   ;;  %v152_v29 = vperm.slane %v3034_v22, 0  ;;  %v153_v30 = vperm.slane %v3034_v22, 4  ;;  %v1456_v31 = vperm.slane %v3039_v23, 0  ;;  %v1457_v32 = vperm.slane %v3039_v23, 4 }
   0xc   :  { %v3054_v33 = vperm.slane %v254_v25, 1  ;;  %v3056_v34 = vperm.slane %v255_v26, 1  ;;  %v3058_v35 = vperm.slane %v1494_v27, 1  ;;  %v3060_v36 = vperm.slane %v1495_v28, 1 }
   0xd   :  { %v3062_v37 = vperm.slane %v152_v29, 0  ;;  %v3064_v38 = vperm.slane %v153_v30, 0  ;;  %v3066_v39 = vperm.slane %v1456_v31, 0  ;;  %v3068_v40 = vperm.slane %v1457_v32, 0 }
  0x12   :  { %113 = vperm.xlu2 %2572, %v2941_v7  }
  0x13   :  { %231 = vperm.xlu0 %2575, %v2946_v8   ;;  %108 = vperm.xlu1 %2571, %v2928_v5  }
  0x1a   :  { %128 = vperm.xlu2 %2572, %v2954_v9  }
  0x1b   :  { %243 = vperm.xlu0 %2575, %v2959_v10   ;;  %123 = vperm.xlu1 %2571, %v2946_v8  }
  0x22   :  { %143 = vperm.xlu2 %2572, %v2967_v11  }
  0x23   :  { %2576 = vset.pattern.permute.xlu0 %v2871_v13  ;;  %138 = vperm.xlu1 %2571, %v2959_v10  }
  0x24   :  { %325 = vperm.xlu0 %2576, %v2972_v12  }
  0x2a   :  { %2574 = vset.pattern.permute.xlu2 %v2869_v2 }
  0x2b   :  { %2573 = vset.pattern.permute.xlu1 %v2869_v2  ;;  %195 = vperm.xlu2 %2574, %v2980_v14  }
  0x2c   :  { %345 = vperm.xlu0 %2576, %v2923_v4   ;;  %191 = vperm.xlu1 %2573, %v2972_v12  }
  0x33   :  { %207 = vperm.xlu2 %2574, %v2908_v0  }
  0x34   :  { %357 = vperm.xlu0 %2576, %v2941_v7   ;;  %203 = vperm.xlu1 %2573, %v2933_v6  }
  0x3b   :  { %215 = vperm.xlu2 %2574, %v2991_v15  }
  0x3c   :  { %369 = vperm.xlu0 %2576, %v2954_v9   ;;  %211 = vperm.xlu1 %2573, %v2923_v4  }
  0x43   :  { %227 = vperm.xlu2 %2574, %v2999_v16  }
  0x44   :  { %381 = vperm.xlu0 %2576, %v2967_v11   ;;  %223 = vperm.xlu1 %2573, %v2941_v7  }
  0x4b   :  { %239 = vperm.xlu2 %2574, %v3007_v17  }
  0x4c   :  { %2580 = vset.pattern.permute.xlu0 %v2872_v18  ;;  %235 = vperm.xlu1 %2573, %v2954_v9  }
  0x4d   :  { %463 = vperm.xlu0 %2580, %v2980_v14  }
  0x53   :  { %251 = vperm.xlu2 %2574, %v3016_v19  }
  0x54   :  { %247 = vperm.xlu1 %2573, %v2967_v11  }
  0x55   :  { %483 = vperm.xlu0 %2580, %v2991_v15  }
  0x5b   :  { %2578 = vset.pattern.permute.xlu2 %v2871_v13 }
  0x5c   :  { %2577 = vset.pattern.permute.xlu1 %v2871_v13  ;;  %v3021_v20 = vpop.permute.xlu2 %93  ;;  %333 = vperm.xlu2 %2578, %v2913_v1  }
  0x5d   :  { %495 = vperm.xlu0 %2580, %v2999_v16   ;;  %329 = vperm.xlu1 %2577, %v2980_v14  }
  0x64   :  { %v3026_v21 = vpop.permute.xlu2 %98  ;;  %341 = vperm.xlu2 %2578, %v2908_v0  }
  0x65   :  { %507 = vperm.xlu0 %2580, %v3007_v17   ;;  %337 = vperm.xlu1 %2577, %v2933_v6  }
  0x6c   :  { %v3041_v24 = vpop.permute.xlu2 %113  ;;  %353 = vperm.xlu2 %2578, %v2928_v5  }
  0x6d   :  { %519 = vperm.xlu0 %2580, %v3016_v19   ;;  %349 = vperm.xlu1 %2577, %v2991_v15  }
  0x74   :  { %v3070_v41 = vpop.permute.xlu2 %128  ;;  %365 = vperm.xlu2 %2578, %v2946_v8  }
  0x75   :  { %v200_v42 = vpop.permute.xlu0 %199  ;;  %v84_v43 = vpop.permute.xlu1 %83  ;;  %2582 = vset.pattern.permute.xlu0 %v5518_v3  ;;  %361 = vperm.xlu1 %2577, %v2999_v16  }
  0x76   :  { %v264_v44 = vmul.f32 %v3054_v33, %v200_v42  ;;  %v265_v45 = vmul.f32 %v3056_v34, %v200_v42  ;;  %v1504_v46 = vmul.f32 %v3058_v35, %v200_v42  ;;  %v1505_v47 = vmul.f32 %v3060_v36, %v200_v42  ;;  %73 = vperm.xlu0 %2582, %v2972_v12  }
  0x77   :  { %v162_v48 = vmul.f32 %v3062_v37, %v84_v43  ;;  %v163_v49 = vmul.f32 %v3064_v38, %v84_v43  ;;  %v1466_v50 = vmul.f32 %v3066_v39, %v84_v43  ;;  %v1467_v51 = vmul.f32 %v3068_v40, %v84_v43 }
  0x79   :  { %v3084_v52 = vadd.f32 %v264_v44, %v162_v48  ;;  %v3086_v53 = vadd.f32 %v265_v45, %v163_v49  ;;  %v3088_v54 = vadd.f32 %v1504_v46, %v1466_v50  ;;  %v3090_v55 = vadd.f32 %v1505_v47, %v1467_v51 }
  0x7a   :  { %v166_v50 = vmul.f32 %v3062_v37, %v3021_v20  ;;  %v167_v51 = vmul.f32 %v3064_v38, %v3021_v20 }
  0x7c   :  { %v3092_v56 = vpop.permute.xlu2 %143  ;;  %377 = vperm.xlu2 %2578, %v2959_v10  }
  0x7d   :  { %v3095_v57 = vpop.permute.xlu1 %88  ;;  %v220_v58 = vpop.permute.xlu0 %219  ;;  %373 = vperm.xlu1 %2577, %v3007_v17  }
  0x7e   :  { %78 = vperm.xlu0 %2582, %v2980_v14   ;;  %v274_v59 = vmul.f32 %v3054_v33, %v220_v58  ;;  %v275_v60 = vmul.f32 %v3056_v34, %v220_v58  ;;  %v1514_v61 = vmul.f32 %v3058_v35, %v220_v58  ;;  %v1515_v62 = vmul.f32 %v3060_v36, %v220_v58 }
  0x7f   :  { %v1471_v58 = vmul.f32 %v3068_v40, %v3021_v20 }
  0x84   :  { %2579 = vset.pattern.permute.xlu2 %v2872_v18 }
  0x85   :  { %v109_v63 = vpop.permute.xlu1 %108  ;;  %v232_v2 = vpop.permute.xlu0 %231  ;;  %459 = vperm.xlu2 %2579, %v2972_v12   ;;  %385 = vperm.xlu1 %2577, %v3016_v19  }
  0x86   :  { %v172_v13 = vmul.f32 %v3062_v37, %v109_v63  ;;  %v173_v25 = vmul.f32 %v3064_v38, %v109_v63  ;;  %v1476_v14 = vmul.f32 %v3066_v39, %v109_v63  ;;  %v1477_v26 = vmul.f32 %v3068_v40, %v109_v63  ;;  %v3110_v27 = vpop.permute.xlu2 %195  ;;  %103 = vperm.xlu0 %2582, %v2991_v15  }
  0x87   :  { %5554 = vst [vmem:[#allocation6_spill] sm:$0xff] %v3110_v27  ;;  %v280_v31 = vmul.f32 %v3054_v33, %v232_v2  ;;  %v281_v32 = vmul.f32 %v3056_v34, %v232_v2  ;;  %v1520_v42 = vmul.f32 %v3058_v35, %v232_v2  ;;  %v1521_v43 = vmul.f32 %v3060_v36, %v232_v2 }
  0x88   :  { %v3113_v28 = vadd.f32 %v274_v59, %v172_v13  ;;  %v3115_v29 = vadd.f32 %v275_v60, %v173_v25  ;;  %v3117_v30 = vadd.f32 %v1514_v61, %v1476_v14  ;;  %v3119_v12 = vadd.f32 %v1515_v62, %v1477_v26 }
  0x8d   :  { %v124_v44 = vpop.permute.xlu1 %123  ;;  %v244_v45 = vpop.permute.xlu0 %243  ;;  %471 = vperm.xlu2 %2579, %v2933_v6   ;;  %2581 = vset.pattern.permute.xlu1 %v2872_v18  ;;  %v1470_v6 = vmul.f32 %v3066_v39, %v3021_v20 }
  0x8e   :  { %v178_v15 = vmul.f32 %v3062_v37, %v124_v44  ;;  %v179_v46 = vmul.f32 %v3064_v38, %v124_v44  ;;  %v1482_v47 = vmul.f32 %v3066_v39, %v124_v44  ;;  %v1483_v48 = vmul.f32 %v3068_v40, %v124_v44  ;;  %v208_v49 = vpop.permute.xlu2 %207  ;;  %118 = vperm.xlu0 %2582, %v2999_v16  }
  0x8f   :  { %467 = vperm.xlu1 %2581, %v2913_v1   ;;  %v268_v62 = vmul.f32 %v3054_v33, %v208_v49  ;;  %v269_v63 = vmul.f32 %v3056_v34, %v208_v49  ;;  %v1508_v2 = vmul.f32 %v3058_v35, %v208_v49  ;;  %v1509_v20 = vmul.f32 %v3060_v36, %v208_v49 }
  0x90   :  { %v3140_v59 = vadd.f32 %v280_v31, %v178_v15  ;;  %v3142_v60 = vadd.f32 %v281_v32, %v179_v46  ;;  %v3144_v18 = vadd.f32 %v1520_v42, %v1482_v47  ;;  %v3146_v61 = vadd.f32 %v1521_v43, %v1483_v48 }
  0x91   :  { %v3153_v13 = vadd.f32 %v268_v62, %v166_v50  ;;  %v3155_v16 = vadd.f32 %v269_v63, %v167_v51  ;;  %v3157_v25 = vadd.f32 %v1508_v2, %v1470_v6  ;;  %v3159_v14 = vadd.f32 %v1509_v20, %v1471_v58 }
  0x92   :  { %v286_v26 = vmul.f32 %v3054_v33, %v244_v45  ;;  %v287_v1 = vmul.f32 %v3056_v34, %v244_v45  ;;  %v1526_v31 = vmul.f32 %v3058_v35, %v244_v45  ;;  %v1527_v32 = vmul.f32 %v3060_v36, %v244_v45 }
  0x93   :  { %v164_v63 = vmul.f32 %v3062_v37, %v3095_v57  ;;  %v1469_v2 = vmul.f32 %v3068_v40, %v3095_v57 }
  0x95   :  { %v139_v42 = vpop.permute.xlu1 %138  ;;  %479 = vperm.xlu2 %2579, %v2923_v4  }
  0x96   :  { %v184_v43 = vmul.f32 %v3062_v37, %v139_v42  ;;  %v185_v44 = vmul.f32 %v3064_v38, %v139_v42  ;;  %v1488_v15 = vmul.f32 %v3066_v39, %v139_v42  ;;  %v1489_v46 = vmul.f32 %v3068_v40, %v139_v42  ;;  %v3170_v47 = vpop.permute.xlu2 %215  ;;  %v3172_v48 = vpop.permute.xlu0 %325  ;;  %133 = vperm.xlu0 %2582, %v3007_v17   ;;  %v39_v17 = vld [vmem:[%s5514_s2 + $0x10] sm:$0xff] }
  0x97   :  { %5555 = vst [vmem:[#allocation7_spill] sm:$0xff] %v3170_v47  ;;  %475 = vperm.xlu1 %2581, %v2908_v0  }
  0x98   :  { %v3175_v49 = vadd.f32 %v286_v26, %v184_v43  ;;  %v3177_v45 = vadd.f32 %v287_v1, %v185_v44  ;;  %v3179_v50 = vadd.f32 %v1526_v31, %v1488_v15  ;;  %v3181_v4 = vadd.f32 %v1527_v32, %v1489_v46 }
  0x99   :  { %v168_v46 = vmul.f32 %v3062_v37, %v3026_v21 }
  0x9d   :  { %491 = vperm.xlu2 %2579, %v2941_v7  }
  0x9e   :  { %v3185_v51 = vpop.permute.xlu2 %227  ;;  %v3187_v6 = vpop.permute.xlu0 %345  ;;  %148 = vperm.xlu0 %2582, %v3016_v19   ;;  %v165_v19 = vmul.f32 %v3064_v38, %v3095_v57 }
  0x9f   :  { %5556 = vst [vmem:[#allocation8_spill] sm:$0xff] %v3185_v51  ;;  %v3190_v58 = vpop.permute.xlu1 %191  ;;  %487 = vperm.xlu1 %2581, %v2928_v5   ;;  %v1468_v5 = vmul.f32 %v3066_v39, %v3095_v57 }
  0xa0   :  { %5557 = vst [vmem:[#allocation9_spill] sm:$0xff] %v3190_v58 }
  0xa5   :  { %503 = vperm.xlu2 %2579, %v2954_v9  }
  0xa6   :  { %v3197_v62 = vpop.permute.xlu2 %239  ;;  %v3199_v0 = vpop.permute.xlu0 %357  ;;  %604 = vperm.xlu0 %2582, %v39_v17   ;;  %v169_v17 = vmul.f32 %v3064_v38, %v3026_v21 }
  0xa7   :  { %5558 = vst [vmem:[#allocation10_spill] sm:$0xff] %v3197_v62  ;;  %v204_v7 = vpop.permute.xlu1 %203  ;;  %499 = vperm.xlu1 %2581, %v2946_v8   ;;  %v44_v8 = vld [vmem:[%s5514_s2 + $0x38] sm:$0xff] }
  0xa8   :  { %5559 = vst [vmem:[#allocation11_spill] sm:$0xff] %v3199_v0  ;;  %v266_v9 = vmul.f32 %v3054_v33, %v204_v7  ;;  %v267_v20 = vmul.f32 %v3056_v34, %v204_v7  ;;  %v1506_v26 = vmul.f32 %v3058_v35, %v204_v7  ;;  %v1507_v1 = vmul.f32 %v3060_v36, %v204_v7 }
  0xa9   :  { %v1472_v7 = vmul.f32 %v3066_v39, %v3026_v21 }
  0xaa   :  { %v3214_v31 = vadd.f32 %v266_v9, %v164_v63  ;;  %v3216_v32 = vadd.f32 %v267_v20, %v165_v19  ;;  %v3218_v42 = vadd.f32 %v1506_v26, %v1468_v5  ;;  %v3220_v43 = vadd.f32 %v1507_v1, %v1469_v2 }
  0xab   :  { %v1473_v63 = vmul.f32 %v3068_v40, %v3026_v21  ;;  %v388_v9 = vperm.slane %v3034_v22, 2  ;;  %v389_v20 = vperm.slane %v3034_v22, 6  ;;  %v1564_v26 = vperm.slane %v3039_v23, 2 }
  0xac   :  { %v1565_v1 = vperm.slane %v3039_v23, 6 }
  0xad   :  { %515 = vperm.xlu2 %2579, %v2967_v11   ;;  %v3277_v0 = vperm.slane %v389_v20, 2  ;;  %v3279_v62 = vperm.slane %v1564_v26, 2 }
  0xae   :  { %v3226_v57 = vpop.permute.xlu2 %251  ;;  %v3228_v44 = vpop.permute.xlu0 %369  ;;  %629 = vperm.xlu0 %2582, %v44_v8   ;;  %v3281_v51 = vperm.slane %v1565_v1, 2 }
  0xaf   :  { %5560 = vst [vmem:[#allocation12_spill] sm:$0xff] %v3226_v57  ;;  %v212_v15 = vpop.permute.xlu1 %211  ;;  %511 = vperm.xlu1 %2581, %v2959_v10   ;;  %v5564_v57 = vmov 0  }
  0xb0   :  { %5561 = vst [vmem:[#allocation13_spill] sm:$0xff] %v3228_v44  ;;  %v270_v11 = vmul.f32 %v3054_v33, %v212_v15  ;;  %v271_v19 = vmul.f32 %v3056_v34, %v212_v15  ;;  %v1510_v5 = vmul.f32 %v3058_v35, %v212_v15  ;;  %v1511_v2 = vmul.f32 %v3060_v36, %v212_v15  ;;  %v38_v15 = vld [vmem:[%s5514_s2 + $0x8] sm:$0xff]  ;;  %v47_v44 = vld [vmem:[%s5514_s2 + $0x50] sm:$0xff] }
  0xb1   :  { %5567 = vst [vmem:[#allocation18_spill] sm:$0xff] %v3277_v0 }
  0xb2   :  { %v3247_v8 = vadd.f32 %v270_v11, %v168_v46  ;;  %v3249_v21 = vadd.f32 %v271_v19, %v169_v17  ;;  %v3251_v10 = vadd.f32 %v1510_v5, %v1472_v7  ;;  %v3253_v3 = vadd.f32 %v1511_v2, %v1473_v63  ;;  %v37_v5 = vld [vmem:[%s5514_s2] sm:$0xff]  ;;  %5568 = vst [vmem:[#allocation19_spill] sm:$0xff] %v3279_v62 }
  0xb3   :  { %v174_v46 = vmul.f32 %v3062_v37, %v3041_v24  ;;  %v175_v17 = vmul.f32 %v3064_v38, %v3041_v24  ;;  %v1478_v7 = vmul.f32 %v3066_v39, %v3041_v24  ;;  %v1479_v63 = vmul.f32 %v3068_v40, %v3041_v24  ;;  %5569 = vst [vmem:[#allocation20_spill] sm:$0xff] %v3281_v51 }
  0xb4   :  { %5562 = vst [vmem:[#allocation14_spill] sm:$0xff] %v3251_v10  ;;  %v3275_v2 = vperm.slane %v388_v9, 2 }
  0xb5   :  { %5563 = vst [vmem:[#allocation15_spill] sm:$0xff] %v3253_v3  ;;  %2584 = vset.pattern.permute.xlu2 %v5564_v57 }
  0xb6   :  { %v3270_v11 = vpop.permute.xlu0 %381  ;;  %v334_v19 = vpop.permute.xlu2 %333  ;;  %599 = vperm.xlu2 %2584, %v38_v15   ;;  %5566 = vst [vmem:[#allocation17_spill] sm:$0xff] %v3275_v2  ;;  %644 = vperm.xlu0 %2582, %v47_v44  }
  0xb7   :  { %5565 = vst [vmem:[#allocation16_spill] sm:$0xff] %v3270_v11  ;;  %v224_v47 = vpop.permute.xlu1 %223  ;;  %2583 = vset.pattern.permute.xlu1 %v5564_v57  ;;  %v398_v9 = vmul.f32 %v3275_v2, %v334_v19  ;;  %v399_v20 = vmul.f32 %v3277_v0, %v334_v19  ;;  %v1574_v26 = vmul.f32 %v3279_v62, %v334_v19 }
  0xb8   :  { %v276_v24 = vmul.f32 %v3054_v33, %v224_v47  ;;  %v277_v15 = vmul.f32 %v3056_v34, %v224_v47  ;;  %v1516_v11 = vmul.f32 %v3058_v35, %v224_v47  ;;  %v1517_v27 = vmul.f32 %v3060_v36, %v224_v47  ;;  %594 = vperm.xlu1 %2583, %v37_v5  }
  0xb9   :  { %v1575_v1 = vmul.f32 %v3281_v51, %v334_v19  ;;  %v3301_v23 = vadd.f32 %v398_v9, %v3084_v52  ;;  %v3304_v47 = vadd.f32 %v399_v20, %v3086_v53  ;;  %v3307_v58 = vadd.f32 %v1574_v26, %v3088_v54 }
  0xba   :  { %v3292_v44 = vadd.f32 %v276_v24, %v174_v46  ;;  %v3294_v57 = vadd.f32 %v277_v15, %v175_v17  ;;  %v3296_v3 = vadd.f32 %v1516_v11, %v1478_v7  ;;  %v3298_v10 = vadd.f32 %v1517_v27, %v1479_v63  ;;  %v41_v46 = vld [vmem:[%s5514_s2 + $0x20] sm:$0xff]  ;;  %v50_v27 = vld [vmem:[%s5514_s2 + $0x68] sm:$0xff]  ;;  %v40_v7 = vld [vmem:[%s5514_s2 + $0x18] sm:$0xff] }
  0xbb   :  { %5574 = vst [vmem:[#allocation25_spill] sm:$0xff] %v3307_v58  ;;  %v3310_v19 = vadd.f32 %v1575_v1, %v3090_v55  ;;  %v180_v52 = vmul.f32 %v3062_v37, %v3070_v41  ;;  %v181_v53 = vmul.f32 %v3064_v38, %v3070_v41  ;;  %v1484_v54 = vmul.f32 %v3066_v39, %v3070_v41 }
  0xbc   :  { %5570 = vst [vmem:[#allocation21_spill] sm:$0xff] %v3292_v44  ;;  %v1485_v55 = vmul.f32 %v3068_v40, %v3070_v41 }
  0xbd   :  { %5571 = vst [vmem:[#allocation22_spill] sm:$0xff] %v3294_v57 }
  0xbe   :  { %5572 = vst [vmem:[#allocation23_spill] sm:$0xff] %v3296_v3  ;;  %v342_v17 = vpop.permute.xlu2 %341  ;;  %614 = vperm.xlu2 %2584, %v41_v46   ;;  %659 = vperm.xlu0 %2582, %v50_v27  }
  0xbf   :  { %5573 = vst [vmem:[#allocation24_spill] sm:$0xff] %v3298_v10  ;;  %v236_v63 = vpop.permute.xlu1 %235  ;;  %v402_v11 = vmul.f32 %v3275_v2, %v342_v17  ;;  %v403_v5 = vmul.f32 %v3277_v0, %v342_v17  ;;  %v1578_v24 = vmul.f32 %v3279_v62, %v342_v17  ;;  %v1579_v15 = vmul.f32 %v3281_v51, %v342_v17  ;;  %v3333_v9 = vpop.permute.xlu0 %463 }
  0xc0   :  { %5575 = vst [vmem:[#allocation26_spill] sm:$0xff] %v3310_v19  ;;  %v282_v41 = vmul.f32 %v3054_v33, %v236_v63  ;;  %v283_v20 = vmul.f32 %v3056_v34, %v236_v63  ;;  %v1522_v26 = vmul.f32 %v3058_v35, %v236_v63  ;;  %v1523_v1 = vmul.f32 %v3060_v36, %v236_v63 }
  0xc1   :  { %v3340_v46 = vadd.f32 %v402_v11, %v3153_v13  ;;  %v3343_v27 = vadd.f32 %v403_v5, %v3155_v16  ;;  %v3346_v10 = vadd.f32 %v1578_v24, %v3157_v25  ;;  %v3349_v17 = vadd.f32 %v1579_v15, %v3159_v14  ;;  %609 = vperm.xlu1 %2583, %v40_v7   ;;  %v43_v13 = vld [vmem:[%s5514_s2 + $0x30] sm:$0xff]  ;;  %v42_v7 = vld [vmem:[%s5514_s2 + $0x28] sm:$0xff] }
  0xc2   :  { %v3351_v3 = vadd.f32 %v282_v41, %v180_v52  ;;  %v3353_v57 = vadd.f32 %v283_v20, %v181_v53  ;;  %v3355_v44 = vadd.f32 %v1522_v26, %v1484_v54  ;;  %v3357_v63 = vadd.f32 %v1523_v1, %v1485_v55 }
  0xc3   :  { %5576 = vst [vmem:[#allocation27_spill] sm:$0xff] %v3340_v46  ;;  %v186_v16 = vmul.f32 %v3062_v37, %v3092_v56  ;;  %v187_v25 = vmul.f32 %v3064_v38, %v3092_v56  ;;  %v1490_v14 = vmul.f32 %v3066_v39, %v3092_v56  ;;  %v1491_v52 = vmul.f32 %v3068_v40, %v3092_v56 }
  0xc4   :  { %5577 = vst [vmem:[#allocation28_spill] sm:$0xff] %v3343_v27  ;;  %v404_v53 = vmul.f32 %v3275_v2, %v3187_v6  ;;  %v405_v54 = vmul.f32 %v3277_v0, %v3187_v6 }
  0xc5   :  { %5578 = vst [vmem:[#allocation29_spill] sm:$0xff] %v3351_v3 }
  0xc6   :  { %5579 = vst [vmem:[#allocation30_spill] sm:$0xff] %v3353_v57  ;;  %v354_v55 = vpop.permute.xlu2 %353  ;;  %624 = vperm.xlu2 %2584, %v43_v13  }
  0xc7   :  { %5580 = vst [vmem:[#allocation31_spill] sm:$0xff] %v3355_v44  ;;  %v248_v11 = vpop.permute.xlu1 %247  ;;  %v408_v5 = vmul.f32 %v3275_v2, %v354_v55  ;;  %v409_v24 = vmul.f32 %v3277_v0, %v354_v55  ;;  %v1584_v15 = vmul.f32 %v3279_v62, %v354_v55  ;;  %v1585_v56 = vmul.f32 %v3281_v51, %v354_v55  ;;  %v3381_v41 = vpop.permute.xlu0 %483 }
  0xc8   :  { %5581 = vst [vmem:[#allocation32_spill] sm:$0xff] %v3357_v63  ;;  %v288_v20 = vmul.f32 %v3054_v33, %v248_v11  ;;  %v289_v26 = vmul.f32 %v3056_v34, %v248_v11  ;;  %v1528_v1 = vmul.f32 %v3058_v35, %v248_v11  ;;  %v1529_v13 = vmul.f32 %v3060_v36, %v248_v11 }
  0xc9   :  { %v3388_v63 = vadd.f32 %v408_v5, %v3113_v28  ;;  %v3391_v44 = vadd.f32 %v409_v24, %v3115_v29  ;;  %v3394_v57 = vadd.f32 %v1584_v15, %v3117_v30  ;;  %v3397_v55 = vadd.f32 %v1585_v56, %v3119_v12  ;;  %619 = vperm.xlu1 %2583, %v42_v7   ;;  %v46_v28 = vld [vmem:[%s5514_s2 + $0x48] sm:$0xff]  ;;  %v49_v15 = vld [vmem:[%s5514_s2 + $0x60] sm:$0xff] }
  0xca   :  { %v3399_v3 = vadd.f32 %v288_v20, %v186_v16  ;;  %v3401_v27 = vadd.f32 %v289_v26, %v187_v25  ;;  %v3403_v46 = vadd.f32 %v1528_v1, %v1490_v14  ;;  %v3405_v11 = vadd.f32 %v1529_v13, %v1491_v52  ;;  %v45_v16 = vld [vmem:[%s5514_s2 + $0x40] sm:$0xff] }
  0xcb   :  { %5582 = vst [vmem:[#allocation33_spill] sm:$0xff] %v3388_v63  ;;  %v3411_v29 = vadd.f32 %v404_v53, %v3247_v8  ;;  %v3414_v30 = vadd.f32 %v405_v54, %v3249_v21 }
  0xcc   :  { %5583 = vst [vmem:[#allocation34_spill] sm:$0xff] %v3391_v44 }
  0xcd   :  { %5584 = vst [vmem:[#allocation35_spill] sm:$0xff] %v3394_v57  ;;  %v5606_v57 = vld [vmem:[#allocation15_spill] sm:$0xff] }
  0xce   :  { %5585 = vst [vmem:[#allocation36_spill] sm:$0xff] %v3397_v55  ;;  %v366_v12 = vpop.permute.xlu2 %365  ;;  %639 = vperm.xlu2 %2584, %v46_v28   ;;  %v5604_v55 = vld [vmem:[#allocation14_spill] sm:$0xff] }
  0xcf   :  { %5586 = vst [vmem:[#allocation37_spill] sm:$0xff] %v3399_v3  ;;  %v414_v25 = vmul.f32 %v3275_v2, %v366_v12  ;;  %v415_v14 = vmul.f32 %v3277_v0, %v366_v12  ;;  %v1590_v52 = vmul.f32 %v3279_v62, %v366_v12  ;;  %v1591_v7 = vmul.f32 %v3281_v51, %v366_v12  ;;  %v3423_v5 = vpop.permute.xlu0 %495  ;;  %v3425_v8 = vpop.permute.xlu1 %329 }
  0xd0   :  { %5587 = vst [vmem:[#allocation38_spill] sm:$0xff] %v3401_v27 }
  0xd1   :  { %5588 = vst [vmem:[#allocation39_spill] sm:$0xff] %v3403_v46  ;;  %v3428_v21 = vadd.f32 %v414_v25, %v3140_v59  ;;  %v3431_v53 = vadd.f32 %v415_v14, %v3142_v60  ;;  %v3434_v54 = vadd.f32 %v1590_v52, %v3144_v18  ;;  %v3437_v24 = vadd.f32 %v1591_v7, %v3146_v61  ;;  %v48_v59 = vld [vmem:[%s5514_s2 + $0x58] sm:$0xff] }
  0xd2   :  { %5589 = vst [vmem:[#allocation40_spill] sm:$0xff] %v3405_v11  ;;  %634 = vperm.xlu1 %2583, %v45_v16   ;;  %v1570_v11 = vmul.f32 %v3279_v62, %v3172_v48  ;;  %v1571_v46 = vmul.f32 %v3281_v51, %v3172_v48 }
  0xd3   :  { %5590 = vst [vmem:[#allocation41_spill] sm:$0xff] %v3428_v21 }
  0xd4   :  { %5591 = vst [vmem:[#allocation42_spill] sm:$0xff] %v3431_v53 }
  0xd5   :  { %5592 = vst [vmem:[#allocation43_spill] sm:$0xff] %v3434_v54 }
  0xd6   :  { %5593 = vst [vmem:[#allocation44_spill] sm:$0xff] %v3437_v24  ;;  %v378_v56 = vpop.permute.xlu2 %377  ;;  %654 = vperm.xlu2 %2584, %v49_v15  }
  0xd7   :  { %v420_v60 = vmul.f32 %v3275_v2, %v378_v56  ;;  %v421_v20 = vmul.f32 %v3277_v0, %v378_v56  ;;  %v1596_v18 = vmul.f32 %v3279_v62, %v378_v56  ;;  %v1597_v61 = vmul.f32 %v3281_v51, %v378_v56  ;;  %v3449_v26 = vpop.permute.xlu0 %507  ;;  %v338_v1 = vpop.permute.xlu1 %337  ;;  %v51_v56 = vld [vmem:[%s5514_s2 + $0x70] sm:$0xff] }
  0xd8   :  { %v400_v25 = vmul.f32 %v3275_v2, %v338_v1  ;;  %v401_v14 = vmul.f32 %v3277_v0, %v338_v1  ;;  %v1576_v52 = vmul.f32 %v3279_v62, %v338_v1  ;;  %v1577_v7 = vmul.f32 %v3281_v51, %v338_v1 }
  0xd9   :  { %v3452_v13 = vadd.f32 %v420_v60, %v3175_v49  ;;  %v3455_v28 = vadd.f32 %v421_v20, %v3177_v45  ;;  %v3458_v12 = vadd.f32 %v1596_v18, %v3179_v50  ;;  %v3461_v16 = vadd.f32 %v1597_v61, %v3181_v4  ;;  %v52_v49 = vld [vmem:[%s5514_s2 + $0x78] sm:$0xff] }
  0xda   :  { %649 = vperm.xlu1 %2583, %v48_v59   ;;  %v3471_v45 = vadd.f32 %v400_v25, %v3214_v31  ;;  %v3474_v50 = vadd.f32 %v401_v14, %v3216_v32  ;;  %v3477_v4 = vadd.f32 %v1576_v52, %v3218_v42  ;;  %v3480_v15 = vadd.f32 %v1577_v7, %v3220_v43  ;;  %v5599_v25 = vld [vmem:[#allocation9_spill] sm:$0xff] }
  0xdb   :  { %5594 = vst [vmem:[#allocation45_spill] sm:$0xff] %v3452_v13  ;;  %v394_v31 = vmul.f32 %v3275_v2, %v3172_v48  ;;  %v395_v32 = vmul.f32 %v3277_v0, %v3172_v48  ;;  %v522_v42 = vperm.slane %v3034_v22, 3  ;;  %v523_v43 = vperm.slane %v3034_v22, 7 }
  0xdc   :  { %5595 = vst [vmem:[#allocation46_spill] sm:$0xff] %v3455_v28  ;;  %v1580_v61 = vmul.f32 %v3279_v62, %v3187_v6  ;;  %v1581_v1 = vmul.f32 %v3281_v51, %v3187_v6  ;;  %v260_v14 = vmul.f32 %v3054_v33, %v5599_v25  ;;  %v261_v52 = vmul.f32 %v3056_v34, %v5599_v25 }
  0xdd   :  { %5596 = vst [vmem:[#allocation47_spill] sm:$0xff] %v3458_v12  ;;  %v1501_v22 = vmul.f32 %v3060_v36, %v5599_v25  ;;  %v3523_v27 = vperm.slane %v523_v43, 3 }
  0xde   :  { %5597 = vst [vmem:[#allocation48_spill] sm:$0xff] %v3461_v16  ;;  %669 = vperm.xlu2 %2584, %v52_v49   ;;  %v1500_v49 = vmul.f32 %v3058_v35, %v5599_v25  ;;  %v3521_v25 = vperm.slane %v522_v42, 3 }
  0xdf   :  { %v3485_v59 = vpop.permute.xlu0 %519  ;;  %v460_v60 = vpop.permute.xlu2 %459  ;;  %5603 = vst [vmem:[#allocation50_spill] sm:$0xff] %v3523_v27 }
  0xe0   :  { %5598 = vst [vmem:[#allocation49_spill] sm:$0xff] %v3485_v59  ;;  %v3487_v20 = vpop.permute.xlu1 %349  ;;  %v528_v43 = vmul.f32 %v3521_v25, %v460_v60 }
  0xe2   :  { %664 = vperm.xlu1 %2583, %v51_v56   ;;  %v5601_v56 = vld [vmem:[#allocation5_spill] sm:$0xff] }
  0xe3   :  { %v1634_v28 = vperm.slane %v5601_v56, 3  ;;  %v1635_v13 = vperm.slane %v5601_v56, 7  ;;  %5602 = vst [vmem:[#allocation5_spill] sm:$0xff] %v3521_v25 }
  0xe5   :  { %v3525_v44 = vperm.slane %v1634_v28, 3  ;;  %v3527_v63 = vperm.slane %v1635_v13, 3 }
  0xe7   :  { %v3495_v18 = vpop.permute.xlu2 %471 }
  0xe8   :  { %v3505_v7 = vpop.permute.xlu1 %361  ;;  %v74_v16 = vpop.permute.xlu0 %73 }
  0xe9   :  { %5600 = vst [vmem:[#allocation9_spill] sm:$0xff] %v3505_v7  ;;  %v158_v6 = vmul.f32 %v3062_v37, %v74_v16  ;;  %v159_v12 = vmul.f32 %v3064_v38, %v74_v16  ;;  %v1462_v53 = vmul.f32 %v3066_v39, %v74_v16  ;;  %v1463_v21 = vmul.f32 %v3068_v40, %v74_v16 }
  0xea   :  { %v3530_v16 = vadd.f32 %v1580_v61, %v5604_v55  ;;  %v3533_v7 = vadd.f32 %v1581_v1, %v5606_v57  ;;  %v5609_v55 = vld [vmem:[#allocation6_spill] sm:$0xff] }
  0xeb   :  { %v292_v56 = vadd.f32 %v260_v14, %v158_v6  ;;  %v293_v3 = vadd.f32 %v261_v52, %v159_v12  ;;  %v1532_v24 = vadd.f32 %v1500_v49, %v1462_v53  ;;  %v1533_v54 = vadd.f32 %v1501_v22, %v1463_v21 }
  0xec   :  { %5605 = vst [vmem:[#allocation14_spill] sm:$0xff] %v3530_v16  ;;  %v529_v12 = vmul.f32 %v3523_v27, %v460_v60  ;;  %v1640_v21 = vmul.f32 %v3525_v44, %v460_v60  ;;  %v1641_v53 = vmul.f32 %v3527_v63, %v460_v60  ;;  %v262_v57 = vmul.f32 %v3054_v33, %v5609_v55 }
  0xed   :  { %5607 = vst [vmem:[#allocation15_spill] sm:$0xff] %v3533_v7  ;;  %v426_v19 = vadd.f32 %v394_v31, %v292_v56  ;;  %v427_v48 = vadd.f32 %v395_v32, %v293_v3  ;;  %v1602_v42 = vadd.f32 %v1570_v11, %v1532_v24  ;;  %v1603_v58 = vadd.f32 %v1571_v46, %v1533_v54 }
  0xee   :  { %v263_v3 = vmul.f32 %v3056_v34, %v5609_v55  ;;  %v1502_v46 = vmul.f32 %v3058_v35, %v5609_v55  ;;  %v1503_v11 = vmul.f32 %v3060_v36, %v5609_v55  ;;  %v396_v55 = vmul.f32 %v3275_v2, %v3425_v8 }
  0xef   :  { %v3539_v13 = vpop.permute.xlu2 %479  ;;  %v3555_v61 = vadd.f32 %v528_v43, %v426_v19  ;;  %v3557_v1 = vadd.f32 %v529_v12, %v427_v48  ;;  %v3559_v14 = vadd.f32 %v1640_v21, %v1602_v42  ;;  %v3561_v52 = vadd.f32 %v1641_v53, %v1603_v58  ;;  %v5611_v53 = vld [vmem:[#allocation7_spill] sm:$0xff] }
  0xf0   :  { %v3541_v28 = vpop.permute.xlu1 %373  ;;  %v79_v54 = vpop.permute.xlu0 %78  ;;  %v397_v7 = vmul.f32 %v3277_v0, %v3425_v8  ;;  %v1572_v19 = vmul.f32 %v3279_v62, %v3425_v8  ;;  %v1573_v48 = vmul.f32 %v3281_v51, %v3425_v8  ;;  %v530_v8 = vmul.f32 %v3521_v25, %v3333_v9 }
  0xf1   :  { %5608 = vst [vmem:[#allocation51_spill] sm:$0xff] %v3541_v28  ;;  %v160_v24 = vmul.f32 %v3062_v37, %v79_v54  ;;  %v161_v60 = vmul.f32 %v3064_v38, %v79_v54  ;;  %v1464_v31 = vmul.f32 %v3066_v39, %v79_v54  ;;  %v1465_v32 = vmul.f32 %v3068_v40, %v79_v54  ;;  %v5618_v28 = vld [vmem:[#allocation8_spill] sm:$0xff] }
  0xf3   :  { %v294_v49 = vadd.f32 %v262_v57, %v160_v24  ;;  %v295_v22 = vadd.f32 %v263_v3, %v161_v60  ;;  %v1534_v6 = vadd.f32 %v1502_v46, %v1464_v31  ;;  %v1535_v56 = vadd.f32 %v1503_v11, %v1465_v32 }
  0xf4   :  { %v272_v57 = vmul.f32 %v3054_v33, %v5611_v53  ;;  %v273_v3 = vmul.f32 %v3056_v34, %v5611_v53  ;;  %v1512_v46 = vmul.f32 %v3058_v35, %v5611_v53  ;;  %v1513_v11 = vmul.f32 %v3060_v36, %v5611_v53 }
  0xf5   :  { %v428_v58 = vadd.f32 %v396_v55, %v294_v49  ;;  %v429_v43 = vadd.f32 %v397_v7, %v295_v22  ;;  %v1604_v12 = vadd.f32 %v1572_v19, %v1534_v6  ;;  %v1605_v21 = vadd.f32 %v1573_v48, %v1535_v56 }
  0xf6   :  { %v531_v7 = vmul.f32 %v3523_v27, %v3333_v9  ;;  %v1642_v24 = vmul.f32 %v3525_v44, %v3333_v9  ;;  %v1643_v60 = vmul.f32 %v3527_v63, %v3333_v9 }
  0xf7   :  { %v3571_v42 = vpop.permute.xlu2 %491  ;;  %v3595_v56 = vadd.f32 %v530_v8, %v428_v58  ;;  %v278_v58 = vmul.f32 %v3054_v33, %v5618_v28 }
  0xf8   :  { %5610 = vst [vmem:[#allocation6_spill] sm:$0xff] %v3571_v42  ;;  %v3581_v54 = vpop.permute.xlu1 %385  ;;  %v104_v31 = vpop.permute.xlu0 %103  ;;  %v3597_v55 = vadd.f32 %v531_v7, %v429_v43  ;;  %v3599_v19 = vadd.f32 %v1642_v24, %v1604_v12  ;;  %v3601_v48 = vadd.f32 %v1643_v60, %v1605_v21  ;;  %v279_v43 = vmul.f32 %v3056_v34, %v5618_v28 }
  0xf9   :  { %5612 = vst [vmem:[#allocation7_spill] sm:$0xff] %v3581_v54  ;;  %v170_v32 = vmul.f32 %v3062_v37, %v104_v31  ;;  %v171_v49 = vmul.f32 %v3064_v38, %v104_v31  ;;  %v1474_v22 = vmul.f32 %v3066_v39, %v104_v31  ;;  %v1475_v6 = vmul.f32 %v3068_v40, %v104_v31 }
  0xfa   :  { %v1518_v12 = vmul.f32 %v3058_v35, %v5618_v28  ;;  %v1519_v21 = vmul.f32 %v3060_v36, %v5618_v28 }
  0xfb   :  { %v3603_v53 = vadd.f32 %v272_v57, %v170_v32  ;;  %v3605_v9 = vadd.f32 %v273_v3, %v171_v49  ;;  %v3607_v54 = vadd.f32 %v1512_v46, %v1474_v22  ;;  %v3609_v16 = vadd.f32 %v1513_v11, %v1475_v6 }
  0xfc   :  { %v534_v57 = vmul.f32 %v3521_v25, %v3495_v18  ;;  %v535_v3 = vmul.f32 %v3523_v27, %v3495_v18  ;;  %v1646_v46 = vmul.f32 %v3525_v44, %v3495_v18  ;;  %v1647_v11 = vmul.f32 %v3527_v63, %v3495_v18 }
  0xfd   :  { %5613 = vst [vmem:[#allocation52_spill] sm:$0xff] %v3603_v53 }
  0xfe   :  { %5614 = vst [vmem:[#allocation53_spill] sm:$0xff] %v3605_v9  ;;  %v3644_v18 = vadd.f32 %v534_v57, %v3471_v45  ;;  %v3650_v9 = vadd.f32 %v1646_v46, %v3477_v4  ;;  %v538_v4 = vmul.f32 %v3521_v25, %v3539_v13 }
  0xff   :  { %5615 = vst [vmem:[#allocation54_spill] sm:$0xff] %v3607_v54  ;;  %v3611_v42 = vpop.permute.xlu2 %503 }
 0x100   :  { %5616 = vst [vmem:[#allocation55_spill] sm:$0xff] %v3609_v16  ;;  %v119_v8 = vpop.permute.xlu0 %118 }
 0x101   :  { %5617 = vst [vmem:[#allocation56_spill] sm:$0xff] %v3611_v42  ;;  %v176_v7 = vmul.f32 %v3062_v37, %v119_v8  ;;  %v177_v24 = vmul.f32 %v3064_v38, %v119_v8  ;;  %v1480_v60 = vmul.f32 %v3066_v39, %v119_v8  ;;  %v1481_v28 = vmul.f32 %v3068_v40, %v119_v8  ;;  %v3633_v31 = vpop.permute.xlu1 %467 }
 0x102   :  { %v3647_v42 = vadd.f32 %v535_v3, %v3474_v50  ;;  %v3653_v8 = vadd.f32 %v1647_v11, %v3480_v15  ;;  %v539_v15 = vmul.f32 %v3523_v27, %v3539_v13 }
 0x103   :  { %v3635_v32 = vadd.f32 %v278_v58, %v176_v7  ;;  %v3637_v49 = vadd.f32 %v279_v43, %v177_v24  ;;  %v3639_v22 = vadd.f32 %v1518_v12, %v1480_v60  ;;  %v3641_v6 = vadd.f32 %v1519_v21, %v1481_v28  ;;  %v5624_v43 = vld [vmem:[#allocation10_spill] sm:$0xff] }
 0x104   :  { %v284_v12 = vmul.f32 %v3054_v33, %v5624_v43  ;;  %v285_v21 = vmul.f32 %v3056_v34, %v5624_v43  ;;  %v1524_v45 = vmul.f32 %v3058_v35, %v5624_v43  ;;  %v1525_v50 = vmul.f32 %v3060_v36, %v5624_v43 }
 0x105   :  { %5619 = vst [vmem:[#allocation8_spill] sm:$0xff] %v3635_v32  ;;  %v3687_v32 = vadd.f32 %v539_v15, %v3414_v30 }
 0x106   :  { %5620 = vst [vmem:[#allocation57_spill] sm:$0xff] %v3637_v49  ;;  %v3684_v49 = vadd.f32 %v538_v4, %v3411_v29  ;;  %v5632_v29 = vld [vmem:[#allocation12_spill] sm:$0xff] }
 0x107   :  { %5621 = vst [vmem:[#allocation58_spill] sm:$0xff] %v3639_v22  ;;  %v3655_v58 = vpop.permute.xlu2 %515  ;;  %v290_v30 = vmul.f32 %v3054_v33, %v5632_v29  ;;  %v1530_v4 = vmul.f32 %v3058_v35, %v5632_v29  ;;  %v1531_v15 = vmul.f32 %v3060_v36, %v5632_v29 }
 0x108   :  { %5622 = vst [vmem:[#allocation59_spill] sm:$0xff] %v3641_v6  ;;  %v134_v57 = vpop.permute.xlu0 %133  ;;  %v5629_v6 = vld [vmem:[#allocation11_spill] sm:$0xff] }
 0x109   :  { %5623 = vst [vmem:[#allocation60_spill] sm:$0xff] %v3655_v58  ;;  %v182_v3 = vmul.f32 %v3062_v37, %v134_v57  ;;  %v183_v46 = vmul.f32 %v3064_v38, %v134_v57  ;;  %v1486_v11 = vmul.f32 %v3066_v39, %v134_v57  ;;  %v1487_v7 = vmul.f32 %v3068_v40, %v134_v57  ;;  %v3673_v24 = vpop.permute.xlu1 %475  ;;  %v5633_v57 = vld [vmem:[#allocation13_spill] sm:$0xff] }
 0x10a   :  { %v3691_v22 = vmul.f32 %v3275_v2, %v5629_v6  ;;  %v3723_v33 = vmul.f32 %v3279_v62, %v5633_v57 }
 0x10b   :  { %v3675_v60 = vadd.f32 %v284_v12, %v182_v3  ;;  %v3677_v28 = vadd.f32 %v285_v21, %v183_v46  ;;  %v3679_v43 = vadd.f32 %v1524_v45, %v1486_v11  ;;  %v3681_v58 = vadd.f32 %v1525_v50, %v1487_v7  ;;  %v5638_v46 = vld [vmem:[#allocation16_spill] sm:$0xff] }
 0x10c   :  { %v3695_v12 = vmul.f32 %v3277_v0, %v5629_v6  ;;  %v3699_v21 = vmul.f32 %v3279_v62, %v5629_v6  ;;  %v3703_v45 = vmul.f32 %v3281_v51, %v5629_v6  ;;  %v291_v50 = vmul.f32 %v3056_v34, %v5632_v29  ;;  %5636 = vst [vmem:[#allocation65_spill] sm:$0xff] %v3723_v33 }
 0x10d   :  { %5625 = vst [vmem:[#allocation10_spill] sm:$0xff] %v3675_v60  ;;  %v3715_v3 = vmul.f32 %v3275_v2, %v5633_v57  ;;  %v3719_v6 = vmul.f32 %v3277_v0, %v5633_v57  ;;  %v3727_v34 = vmul.f32 %v3281_v51, %v5633_v57  ;;  %v3731_v36 = vmul.f32 %v3275_v2, %v5638_v46 }
 0x10e   :  { %5626 = vst [vmem:[#allocation61_spill] sm:$0xff] %v3677_v28  ;;  %v3735_v11 = vmul.f32 %v3277_v0, %v5638_v46 }
 0x10f   :  { %5627 = vst [vmem:[#allocation62_spill] sm:$0xff] %v3679_v43 }
 0x110   :  { %5628 = vst [vmem:[#allocation63_spill] sm:$0xff] %v3681_v58  ;;  %v600_v35 = vpop.permute.xlu2 %599  ;;  %v149_v7 = vpop.permute.xlu0 %148 }
 0x111   :  { %5630 = vst [vmem:[#allocation11_spill] sm:$0xff] %v3699_v21  ;;  %v3738_v29 = vadd.f32 %v600_v35, %v3595_v56  ;;  %v3741_v28 = vadd.f32 %v600_v35, %v3597_v55  ;;  %v188_v60 = vmul.f32 %v3062_v37, %v149_v7  ;;  %v189_v57 = vmul.f32 %v3064_v38, %v149_v7 }
 0x112   :  { %5631 = vst [vmem:[#allocation64_spill] sm:$0xff] %v3703_v45  ;;  %v1492_v58 = vmul.f32 %v3066_v39, %v149_v7  ;;  %v1493_v43 = vmul.f32 %v3068_v40, %v149_v7  ;;  %v532_v56 = vmul.f32 %v3521_v25, %v3633_v31  ;;  %v533_v55 = vmul.f32 %v3523_v27, %v3633_v31 }
 0x113   :  { %5634 = vst [vmem:[#allocation12_spill] sm:$0xff] %v3715_v3  ;;  %v1648_v37 = vmul.f32 %v3525_v44, %v3673_v24  ;;  %v3759_v38 = vadd.f32 %v290_v30, %v188_v60  ;;  %v3761_v39 = vadd.f32 %v291_v50, %v189_v57  ;;  %v2503_v33 = vmul.f32 -1.442695, %v3741_v28 }
 0x114   :  { %5635 = vst [vmem:[#allocation13_spill] sm:$0xff] %v3719_v6  ;;  %v3763_v40 = vadd.f32 %v1530_v4, %v1492_v58  ;;  %v3765_v7 = vadd.f32 %v1531_v15, %v1493_v43  ;;  %v3774_v6 = vadd.f32 %v3599_v19, %v600_v35  ;;  %v3778_v60 = vmul.f32 %v3521_v25, %v3381_v41 }
 0x115   :  { %5637 = vst [vmem:[#allocation66_spill] sm:$0xff] %v3727_v34  ;;  %v2502_v34 = vmul.f32 -1.442695, %v3738_v29  ;;  %v3782_v58 = vmul.f32 %v3523_v27, %v3381_v41  ;;  %v3786_v43 = vmul.f32 %v3525_v44, %v3381_v41  ;;  %v1649_v30 = vmul.f32 %v3527_v63, %v3673_v24 }
 0x116   :  { %5639 = vst [vmem:[#allocation16_spill] sm:$0xff] %v3731_v36  ;;  %v3747_v36 = vpop.permute.xlu1 %487  ;;  %v3792_v50 = vmul.f32 %v3527_v63, %v3381_v41  ;;  %v3796_v19 = vmul.f32 %v3521_v25, %v3423_v5  ;;  %v3800_v4 = vmul.f32 %v3523_v27, %v3423_v5  ;;  %v565_v57 = vadd.f32 %v533_v55, %v3304_v47 }
 0x117   :  { %5640 = vst [vmem:[#allocation67_spill] sm:$0xff] %v3735_v11  ;;  %v3751_v11 = vmul.f32 %v3279_v62, %v5638_v46  ;;  %2585 = vpow2.f32 %v2502_v34  ;;  %v3809_v41 = vmul.f32 %v3525_v44, %v3423_v5  ;;  %v3817_v34 = vmul.f32 %v3521_v25, %v3449_v26 }
 0x118   :  { %5642 = vst [vmem:[#allocation69_spill] sm:$0xff] %v3759_v38  ;;  %v3802_v15 = vpop.permute.xlu2 %614  ;;  %2587 = vpow2.f32 %v2503_v33  ;;  %v3813_v38 = vmul.f32 %v3527_v63, %v3423_v5  ;;  %v2535_v33 = vmul.f32 -1.442695, %v3774_v6  ;;  %v3832_v5 = vmul.f32 %v3523_v27, %v3449_v26 }
 0x119   :  { %5641 = vst [vmem:[#allocation68_spill] sm:$0xff] %v3751_v11  ;;  %v3769_v11 = vmul.f32 %v3281_v51, %v5638_v46  ;;  %v564_v46 = vadd.f32 %v532_v56, %v3301_v23  ;;  %v1681_v56 = vadd.f32 %v1649_v30, %v3349_v17  ;;  %v1644_v17 = vmul.f32 %v3525_v44, %v3633_v31 }
 0x11a   :  { %5643 = vst [vmem:[#allocation70_spill] sm:$0xff] %v3761_v39  ;;  %v1680_v39 = vadd.f32 %v1648_v37, %v3346_v10  ;;  %v3836_v37 = vmul.f32 %v3525_v44, %v3449_v26  ;;  %2589 = vpow2.f32 %v2535_v33  ;;  %v3878_v33 = vmul.f32 %v3277_v0, %v3487_v20 }
 0x11b   :  { %5644 = vst [vmem:[#allocation71_spill] sm:$0xff] %v3763_v40  ;;  %v3840_v40 = vmul.f32 %v3527_v63, %v3449_v26  ;;  %v3858_v26 = vmul.f32 %v3525_v44, %v3485_v59 }
 0x11c   :  { %5645 = vst [vmem:[#allocation72_spill] sm:$0xff] %v3765_v7  ;;  %v605_v7 = vpop.permute.xlu0 %604  ;;  %v3828_v55 = vadd.f32 %v1680_v39, %v3802_v15 }
 0x11d   :  { %5646 = vst [vmem:[#allocation73_spill] sm:$0xff] %v3769_v11  ;;  %v3822_v47 = vadd.f32 %v605_v7, %v564_v46  ;;  %v3824_v10 = vadd.f32 %v605_v7, %v565_v57  ;;  %v3843_v46 = vadd.f32 %v3601_v48, %v600_v35  ;;  %v3850_v57 = vadd.f32 %v1681_v56, %v3802_v15 }
 0x11e   :  { %5647 = vst [vmem:[#allocation74_spill] sm:$0xff] %v3774_v6  ;;  %v3820_v23 = vpop.permute.xlu1 %499  ;;  %v1645_v48 = vmul.f32 %v3527_v63, %v3633_v31  ;;  %v3895_v11 = vmul.f32 %v3281_v51, %v3487_v20 }
 0x11f   :  { %5648 = vst [vmem:[#allocation75_spill] sm:$0xff] %v3778_v60  ;;  %v2504_v39 = vmul.f32 -1.442695, %v3822_v47  ;;  %v2505_v30 = vmul.f32 -1.442695, %v3824_v10 }
 0x120   :  { %5649 = vst [vmem:[#allocation76_spill] sm:$0xff] %v3782_v58  ;;  %v2536_v31 = vmul.f32 -1.442695, %v3843_v46  ;;  %v5677_v58 = vld [vmem:[#allocation21_spill] sm:$0xff] }
 0x121   :  { %5650 = vst [vmem:[#allocation77_spill] sm:$0xff] %v3786_v43  ;;  %2591 = vpow2.f32 %v2504_v39  ;;  %v5667_v39 = vld [vmem:[#allocation25_spill] sm:$0xff]  ;;  %v3930_v60 = vadd.f32 %v3691_v22, %v5677_v58 }
 0x122   :  { %5651 = vst [vmem:[#allocation78_spill] sm:$0xff] %v3792_v50  ;;  %2593 = vpow2.f32 %v2505_v30  ;;  %v5668_v30 = vld [vmem:[#allocation26_spill] sm:$0xff] }
 0x123   :  { %5652 = vst [vmem:[#allocation79_spill] sm:$0xff] %v3796_v19  ;;  %v3891_v19 = vmul.f32 %v3279_v62, %v3487_v20 }
 0x124   :  { %5653 = vst [vmem:[#allocation80_spill] sm:$0xff] %v3800_v4 }
 0x125   :  { %5654 = vst [vmem:[#allocation81_spill] sm:$0xff] %v3809_v41 }
 0x126   :  { %5655 = vst [vmem:[#allocation82_spill] sm:$0xff] %v3813_v38  ;;  %v3897_v38 = vpop.permute.xlu1 %511 }
 0x127   :  { %5656 = vst [vmem:[#allocation83_spill] sm:$0xff] %v3817_v34  ;;  %v3854_v34 = vmul.f32 %v3521_v25, %v3485_v59 }
 0x128   :  { %5657 = vst [vmem:[#allocation84_spill] sm:$0xff] %v3820_v23 }
 0x129   :  { %5658 = vst [vmem:[#allocation85_spill] sm:$0xff] %v3832_v5  ;;  %v2586_v5 = vpop.eup %2585 }
 0x12a   :  { %5659 = vst [vmem:[#allocation86_spill] sm:$0xff] %v3836_v37  ;;  %v2588_v35 = vpop.eup %2587  ;;  %v3866_v56 = vadd.f32 1.0, %v2586_v5  ;;  %v2541_v37 = vmul.f32 -1.442695, %v3828_v55  ;;  %v2542_v5 = vmul.f32 -1.442695, %v3850_v57 }
 0x12b   :  { %5660 = vst [vmem:[#allocation87_spill] sm:$0xff] %v3840_v40  ;;  %v3864_v40 = vmul.f32 %v3527_v63, %v3485_v59  ;;  %v3873_v4 = vadd.f32 1.0, %v2588_v35  ;;  %v1676_v59 = vadd.f32 %v1644_v17, %v5667_v39  ;;  %v537_v35 = vmul.f32 %v3523_v27, %v3673_v24  ;;  %v3901_v39 = vpop.eup %2589 }
 0x12c   :  { %5661 = vst [vmem:[#allocation88_spill] sm:$0xff] %v3843_v46  ;;  %2595 = vrcp.f32 %v3866_v56  ;;  %v871_v3 = vand.u32 2147483647, %v3866_v56  ;;  %vm867_vm0 = vweird.f32 %v3866_v56 }
 0x12d   :  { %5662 = vst [vmem:[#allocation89_spill] sm:$0xff] %v3854_v34  ;;  %v3871_v34 = vmul.f32 %v3275_v2, %v3487_v20  ;;  %2597 = vrcp.f32 %v3873_v4  ;;  %v3899_v17 = vadd.f32 %v1676_v59, %v605_v7  ;;  %v2592_v20 = vpop.eup %2591  ;;  %v886_v59 = vand.u32 2147483647, %v3873_v4 }
 0x12e   :  { %5663 = vst [vmem:[#allocation90_spill] sm:$0xff] %v3858_v26  ;;  %v1677_v26 = vadd.f32 %v1645_v48, %v5668_v30  ;;  %2599 = vpow2.f32 %v2541_v37  ;;  %v873_v37 = vand.u32 2147483648, %v3866_v56  ;;  %v888_v45 = vand.u32 2147483648, %v3873_v4  ;;  %v3955_v53 = vpop.permute.xlu1 %594 }
 0x12f   :  { %5664 = vst [vmem:[#allocation91_spill] sm:$0xff] %v3864_v40  ;;  %v536_v40 = vmul.f32 %v3521_v25, %v3673_v24  ;;  %v5672_v24 = vld [vmem:[#allocation9_spill] sm:$0xff]  ;;  %2601 = vpow2.f32 %v2536_v31  ;;  %v3917_v21 = vadd.f32 1.0, %v2592_v20  ;;  %vm3940_vm1 = vcmp.eq.f32.partialorder %v871_v3, 8.507059e+37 }
 0x130   :  { %5665 = vst [vmem:[#allocation92_spill] sm:$0xff] %v3871_v34  ;;  %v3905_v41 = vmul.f32 %v3275_v2, %v5672_v24  ;;  %v3909_v48 = vmul.f32 %v3277_v0, %v5672_v24  ;;  %v3911_v30 = vadd.f32 %v1677_v26, %v605_v7  ;;  %2603 = vpow2.f32 %v2542_v5  ;;  %v5679_v5 = vld [vmem:[#allocation22_spill] sm:$0xff] }
 0x131   :  { %5666 = vst [vmem:[#allocation93_spill] sm:$0xff] %v3878_v33  ;;  %v2537_v0 = vmul.f32 -1.442695, %v3899_v17  ;;  %v3934_v33 = vadd.f32 %v3695_v12, %v5679_v5  ;;  %2605 = vrcp.f32 %v3917_v21  ;;  %v874_v22 = vor.u32 1.1754944e-38, %v873_v37 }
 0x132   :  { %5669 = vst [vmem:[#allocation25_spill] sm:$0xff] %v3891_v19  ;;  %vm882_vm2 = vweird.f32 %v3873_v4  ;;  %vm3948_vm3 = vcmp.eq.f32.partialorder %v886_v59, 8.507059e+37  ;;  %v901_v34 = vand.u32 2147483647, %v3917_v21  ;;  %v903_v37 = vand.u32 2147483648, %v3917_v21 }
 0x133   :  { %5670 = vst [vmem:[#allocation26_spill] sm:$0xff] %v3895_v11  ;;  %vm897_vm6 = vweird.f32 %v3917_v21 }
 0x134   :  { %5671 = vst [vmem:[#allocation94_spill] sm:$0xff] %v3897_v38  ;;  %v2594_v38 = vpop.eup %2593  ;;  %vm3968_vm8 = vcmp.eq.f32.partialorder %v901_v34, 8.507059e+37  ;;  %v3984_v34 = vadd.f32 %v3955_v53, %v3557_v1 }
 0x135   :  { %5673 = vst [vmem:[#allocation9_spill] sm:$0xff] %v3905_v41  ;;  %v5675_v41 = vld [vmem:[#allocation27_spill] sm:$0xff]  ;;  %v2596_v26 = vpop.eup %2595  ;;  %v3925_v31 = vadd.f32 1.0, %v2594_v38  ;;  %v2538_v38 = vmul.f32 -1.442695, %v3911_v30 }
 0x136   :  { %5674 = vst [vmem:[#allocation95_spill] sm:$0xff] %v3909_v48  ;;  %v3920_v23 = vadd.f32 %v536_v40, %v5675_v41  ;;  %v5676_v48 = vld [vmem:[#allocation28_spill] sm:$0xff]  ;;  %v2598_v20 = vpop.eup %2597  ;;  %v863_v40 = vmul.f32 %v2596_v26, %v3866_v56  ;;  %vm868_vm4 = vweird.f32 %v2596_v26 }
 0x137   :  { %v3923_v7 = vadd.f32 %v537_v35, %v5676_v48  ;;  %5678 = vst [vmem:[#allocation27_spill] sm:$0xff] %v3930_v60  ;;  %v2600_v41 = vpop.eup %2599  ;;  %v878_v58 = vmul.f32 %v2598_v20, %v3873_v4  ;;  %2607 = vrcp.f32 %v3925_v31  ;;  %vm883_vm5 = vweird.f32 %v2598_v20  ;;  %vm869_vm7 = vmor %vm867_vm0, %vm868_vm4 }
 0x138   :  { %5680 = vst [vmem:[#allocation28_spill] sm:$0xff] %v3934_v33  ;;  %v3946_v12 = vpop.eup %2601  ;;  %v864_v48 = vsub.f32 1.0, %v863_v40  ;;  %v889_v33 = vor.u32 1.1754944e-38, %v888_v45  ;;  %2609 = vpow2.f32 %v2537_v0  ;;  %v3957_v46 = vadd.f32 1.0, %v2600_v41  ;;  %vm884_vm10 = vmor %vm882_vm2, %vm883_vm5 }
 0x139   :  { %v2604_v60 = vpop.eup %2603  ;;  %v879_v3 = vsub.f32 1.0, %v878_v58  ;;  %2611 = vpow2.f32 %v2538_v38  ;;  %v916_v27 = vand.u32 2147483647, %v3925_v31  ;;  %v918_v43 = vand.u32 2147483648, %v3925_v31 }
 0x13a   :  { %v865_v50 = vmul.f32 %v2596_v26, %v864_v48  ;;  %v3959_v59 = vadd.f32 1.0, %v2604_v60  ;;  %v2606_v45 = vpop.eup %2605  ;;  %2613 = vrcp.f32 %v3957_v46  ;;  %v904_v48 = vor.u32 1.1754944e-38, %v903_v37 }
 0x13b   :  { %v880_v40 = vmul.f32 %v2598_v20, %v879_v3  ;;  %v893_v60 = vmul.f32 %v2606_v45, %v3917_v21  ;;  %vm912_vm9 = vweird.f32 %v3925_v31  ;;  %v1993_v56 = vand.u32 2147483647, %v3957_v46 }
 0x13c   :  { %v866_v58 = vadd.f32 %v2596_v26, %v865_v50  ;;  %v3975_v50 = vadd.f32 %v3955_v53, %v3555_v61  ;;  %2615 = vrcp.f32 %v3959_v59  ;;  %vm3992_vm11 = vcmp.eq.f32.partialorder %v916_v27, 8.507059e+37 }
 0x13d   :  { %v881_v0 = vadd.f32 %v2598_v20, %v880_v40  ;;  %v2608_v38 = vpop.eup %2607  ;;  %v894_v11 = vsub.f32 1.0, %v893_v60  ;;  %v919_v6 = vor.u32 1.1754944e-38, %v918_v43  ;;  %vm898_vm12 = vweird.f32 %v2606_v45 }
 0x13e   :  { %v870_v3 = vsel %vm869_vm7, %v2596_v26, %v866_v58  ;;  %v2610_v37 = vpop.eup %2609  ;;  %v908_v26 = vmul.f32 %v2608_v38, %v3925_v31  ;;  %vm1989_vm13 = vweird.f32 %v3957_v46  ;;  %vm913_vm14 = vweird.f32 %v2608_v38  ;;  %vm899_vm0 = vmor %vm897_vm6, %vm898_vm12 }
 0x13f   :  { %v875_v40 = vsel %vm3940_vm1, %v874_v22, %v870_v3  ;;  %v885_v61 = vsel %vm884_vm10, %v2598_v20, %v881_v0  ;;  %v2612_v1 = vpop.eup %2611  ;;  %v895_v54 = vmul.f32 %v2606_v45, %v894_v11  ;;  %v1995_v22 = vand.u32 2147483648, %v3957_v46  ;;  %vm914_vm2 = vmor %vm912_vm9, %vm913_vm14 }
 0x140   :  { %v890_v4 = vsel %vm3948_vm3, %v889_v33, %v885_v61  ;;  %v1314_v58 = vmul.f32 %v875_v40, %v3738_v29  ;;  %v909_v35 = vsub.f32 1.0, %v908_v26  ;;  %v2614_v20 = vpop.eup %2613  ;;  %v2500_v33 = vmul.f32 -1.442695, %v3975_v50 }
 0x141   :  { %v1315_v19 = vmul.f32 %v890_v4, %v3741_v28  ;;  %v2501_v27 = vmul.f32 -1.442695, %v3984_v34  ;;  %v896_v5 = vadd.f32 %v2606_v45, %v895_v54  ;;  %v1985_v43 = vmul.f32 %v2614_v20, %v3957_v46 }
 0x142   :  { %v910_v0 = vmul.f32 %v2608_v38, %v909_v35  ;;  %vm4002_vm15 = vcmp.eq.f32.partialorder %v1993_v56, 8.507059e+37  ;;  %v2616_v11 = vpop.eup %2615  ;;  %vm2004_vm1 = vweird.f32 %v3959_v59  ;;  %v2008_v60 = vand.u32 2147483647, %v3959_v59 }
 0x143   :  { %v1347_v29 = vadd.f32 %v1315_v19, %v1314_v58  ;;  %2617 = vpow2.f32 %v2500_v33  ;;  %v4012_v19 = vadd.f32 %v3559_v14, %v3955_v53  ;;  %v900_v54 = vsel %vm899_vm0, %v2606_v45, %v896_v5 }
 0x144   :  { %v911_v3 = vadd.f32 %v2608_v38, %v910_v0  ;;  %v1986_v56 = vsub.f32 1.0, %v1985_v43  ;;  %v2000_v40 = vmul.f32 %v2616_v11, %v3959_v59  ;;  %v905_v61 = vsel %vm3968_vm8, %v904_v48, %v900_v54 }
 0x145   :  { %1348 = vadd.xlane.f32.xlu1 %v1347_v29  ;;  %vm1990_vm3 = vweird.f32 %v2614_v20  ;;  %2619 = vpow2.f32 %v2501_v27  ;;  %v4022_v21 = vadd.f32 %v3561_v52, %v3955_v53  ;;  %v1316_v45 = vmul.f32 %v905_v61, %v3822_v47 }
 0x146   :  { %v915_v14 = vsel %vm914_vm2, %v2608_v38, %v911_v3  ;;  %v1987_v26 = vmul.f32 %v2614_v20, %v1986_v56  ;;  %v2001_v4 = vsub.f32 1.0, %v2000_v40  ;;  %v2010_v41 = vand.u32 2147483648, %v3959_v59  ;;  %vm1991_vm5 = vmor %vm1989_vm13, %vm1990_vm3  ;;  %v5696_v40 = vld [vmem:[#allocation6_spill] sm:$0xff] }
 0x147   :  { %v920_v58 = vsel %vm3992_vm11, %v919_v6, %v915_v14  ;;  %v2533_v48 = vmul.f32 -1.442695, %v4012_v19  ;;  %v2534_v31 = vmul.f32 -1.442695, %v4022_v21  ;;  %vm2005_vm4 = vweird.f32 %v2616_v11 }
 0x148   :  { %v1317_v35 = vmul.f32 %v920_v58, %v3824_v10  ;;  %v1988_v33 = vadd.f32 %v2614_v20, %v1987_v26  ;;  %v2002_v27 = vmul.f32 %v2616_v11, %v2001_v4  ;;  %v1996_v53 = vor.u32 1.1754944e-38, %v1995_v22  ;;  %vm2006_vm7 = vmor %vm2004_vm1, %vm2005_vm4 }
 0x149   :  { %v2618_v52 = vpop.eup %2617  ;;  %vm4034_vm6 = vcmp.eq.f32.partialorder %v2008_v60, 8.507059e+37  ;;  %2621 = vpow2.f32 %v2533_v48  ;;  %v4038_v6 = vadd.f32 1.0, %v2610_v37  ;;  %v2011_v46 = vor.u32 1.1754944e-38, %v2010_v41 }
 0x14a   :  { %v1350_v47 = vadd.f32 %v1317_v35, %v1316_v45  ;;  %v1992_v38 = vsel %vm1991_vm5, %v2614_v20, %v1988_v33  ;;  %v2003_v29 = vadd.f32 %v2616_v11, %v2002_v27  ;;  %v4040_v10 = vadd.f32 1.0, %v2618_v52 }
 0x14b   :  { %v2620_v5 = vpop.eup %2619  ;;  %v1997_v0 = vsel %vm4002_vm15, %v1996_v53, %v1992_v38  ;;  %2623 = vpow2.f32 %v2534_v31  ;;  %v4046_v22 = vadd.f32 1.0, %v2612_v1  ;;  %v4054_v20 = vmul.f32 %v3279_v62, %v5672_v24 }
 0x14c   :  { %v2007_v43 = vsel %vm2006_vm7, %v2616_v11, %v2003_v29  ;;  %v2352_v37 = vmul.f32 %v1997_v0, %v3828_v55  ;;  %v4049_v60 = vadd.f32 1.0, %v2620_v5  ;;  %2625 = vrcp.f32 %v4040_v10 }
 0x14d   :  { %1351 = vadd.xlane.f32.xlu1 %v1350_v47  ;;  %v4058_v59 = vmul.f32 %v3281_v51, %v5672_v24  ;;  %v4062_v1 = vmul.f32 %v3525_v44, %v3539_v13  ;;  %v2012_v28 = vsel %vm4034_vm6, %v2011_v46, %v2007_v43  ;;  %v4068_v55 = vmul.f32 %v3527_v63, %v3539_v13  ;;  %v5694_v24 = vld [vmem:[#allocation51_spill] sm:$0xff] }
 0x14e   :  { %v2353_v11 = vmul.f32 %v2012_v28, %v3850_v57  ;;  %2627 = vrcp.f32 %v4049_v60  ;;  %v1935_v54 = vand.u32 2147483648, %v4038_v6  ;;  %v4075_v56 = vmul.f32 %v3275_v2, %v5694_v24  ;;  %v610_v24 = vpop.permute.xlu1 %609 }
 0x14f   :  { %5693 = vst [vmem:[#allocation21_spill] sm:$0xff] %v4058_v59  ;;  %v2622_v3 = vpop.eup %2621  ;;  %v4079_v61 = vmul.f32 %v3521_v25, %v5696_v40  ;;  %v841_v14 = vand.u32 2147483647, %v4040_v10  ;;  %2629 = vrcp.f32 %v4038_v6  ;;  %v843_v57 = vand.u32 2147483648, %v4040_v10 }
 0x150   :  { %5695 = vst [vmem:[#allocation22_spill] sm:$0xff] %v4075_v56  ;;  %v2388_v13 = vadd.f32 %v2353_v11, %v2352_v37  ;;  %v4084_v45 = vadd.f32 1.0, %v2622_v3  ;;  %2631 = vrcp.f32 %v4046_v22  ;;  %v856_v4 = vand.u32 2147483647, %v4049_v60 }
 0x151   :  { %v2624_v26 = vpop.eup %2623  ;;  %v858_v58 = vand.u32 2147483648, %v4049_v60  ;;  %v4090_v41 = vadd.f32 1.0, %v3901_v39  ;;  %v4093_v48 = vadd.f32 1.0, %v3946_v12  ;;  %v1933_v33 = vand.u32 2147483647, %v4038_v6 }
 0x152   :  { %v2626_v31 = vpop.eup %2625  ;;  %v4095_v35 = vadd.f32 1.0, %v2624_v26  ;;  %2633 = vrcp.f32 %v4084_v45  ;;  %v4099_v27 = vor.u32 1.1754944e-38, %v1935_v54  ;;  %vm837_vm8 = vweird.f32 %v4040_v10 }
 0x153   :  { %v833_v52 = vmul.f32 %v2626_v31, %v4040_v10  ;;  %vm4103_vm9 = vcmp.eq.f32.partialorder %v841_v14, 8.507059e+37  ;;  %vm852_vm10 = vweird.f32 %v4049_v60  ;;  %v844_v12 = vor.u32 1.1754944e-38, %v843_v57 }
 0x154   :  { %v2628_v39 = vpop.eup %2627  ;;  %v1875_v16 = vand.u32 2147483648, %v4084_v45  ;;  %2635 = vrcp.f32 %v4095_v35  ;;  %vm1929_vm11 = vweird.f32 %v4038_v6  ;;  %v1948_v47 = vand.u32 2147483647, %v4046_v22 }
 0x155   :  { %2389 = vadd.xlane.f32.xlu1 %v2388_v13  ;;  %v2630_v38 = vpop.eup %2629  ;;  %v834_v29 = vsub.f32 1.0, %v833_v52  ;;  %v848_v5 = vmul.f32 %v2628_v39, %v4049_v60  ;;  %vm4113_vm12 = vcmp.eq.f32.partialorder %v856_v4, 8.507059e+37  ;;  %v859_v46 = vor.u32 1.1754944e-38, %v858_v58 }
 0x156   :  { %v1873_v43 = vand.u32 2147483647, %v4084_v45  ;;  %v4118_v37 = vpop.eup %2631  ;;  %vm838_vm13 = vweird.f32 %v2626_v31  ;;  %v1888_v28 = vand.u32 2147483647, %v4095_v35  ;;  %v1925_v11 = vmul.f32 %v2630_v38, %v4038_v6 }
 0x157   :  { %vm4122_vm14 = vcmp.eq.f32.partialorder %v1933_v33, 8.507059e+37  ;;  %vm1944_vm15 = vweird.f32 %v4046_v22  ;;  %v1950_v3 = vand.u32 2147483648, %v4046_v22  ;;  %v835_v14 = vmul.f32 %v2626_v31, %v834_v29  ;;  %vm839_vm6 = vmor %vm837_vm8, %vm838_vm13 }
 0x158   :  { %v849_v13 = vsub.f32 1.0, %v848_v5  ;;  %vm853_vm0 = vweird.f32 %v2628_v39  ;;  %v1940_v57 = vmul.f32 %v4118_v37, %v4046_v22  ;;  %v2634_v26 = vpop.eup %2633  ;;  %v1876_v4 = vor.u32 1.1754944e-38, %v1875_v16 }
 0x159   :  { %v1890_v58 = vand.u32 2147483648, %v4095_v35  ;;  %v1926_v33 = vsub.f32 1.0, %v1925_v11  ;;  %vm4132_vm2 = vcmp.eq.f32.partialorder %v1948_v47, 8.507059e+37  ;;  %2637 = vrcp.f32 %v4090_v41  ;;  %vm854_vm4 = vmor %vm852_vm10, %vm853_vm0 }
 0x15a   :  { %v836_v56 = vadd.f32 %v2626_v31, %v835_v14  ;;  %v850_v29 = vmul.f32 %v2628_v39, %v849_v13  ;;  %v1865_v5 = vmul.f32 %v2634_v26, %v4084_v45  ;;  %vm4138_vm3 = vcmp.eq.f32.partialorder %v1873_v43, 8.507059e+37  ;;  %v2636_v16 = vpop.eup %2635 }
 0x15b   :  { %vm1930_vm5 = vweird.f32 %v2630_v38  ;;  %v1927_v47 = vmul.f32 %v2630_v38, %v1926_v33  ;;  %v1941_v11 = vsub.f32 1.0, %v1940_v57  ;;  %vm1945_vm7 = vweird.f32 %v4118_v37 }
 0x15c   :  { %v1951_v14 = vor.u32 1.1754944e-38, %v1950_v3  ;;  %v840_v13 = vsel %vm839_vm6, %v2626_v31, %v836_v56  ;;  %v851_v51 = vadd.f32 %v2628_v39, %v850_v29  ;;  %v1866_v62 = vsub.f32 1.0, %v1865_v5  ;;  %vm1931_vm8 = vmor %vm1929_vm11, %vm1930_vm5 }
 0x15d   :  { %v1880_v43 = vmul.f32 %v2636_v16, %v4095_v35  ;;  %v845_v59 = vsel %vm4103_vm9, %v844_v12, %v840_v13  ;;  %vm1870_vm1 = vweird.f32 %v2634_v26  ;;  %v1928_v10 = vadd.f32 %v2630_v38, %v1927_v47  ;;  %vm1946_vm10 = vmor %vm1944_vm15, %vm1945_vm7 }
 0x15e   :  { %v1942_v57 = vmul.f32 %v4118_v37, %v1941_v11  ;;  %v855_v33 = vsel %vm854_vm4, %v2628_v39, %v851_v51  ;;  %v1312_v3 = vmul.f32 %v845_v59, %v3975_v50  ;;  %v1867_v56 = vmul.f32 %v2634_v26, %v1866_v62 }
 0x15f   :  { %v1881_v31 = vsub.f32 1.0, %v1880_v43  ;;  %v4158_v29 = vpop.eup %2637  ;;  %v860_v53 = vsel %vm4113_vm12, %v859_v46, %v855_v33  ;;  %vm1885_vm9 = vweird.f32 %v2636_v16  ;;  %v1932_v60 = vsel %vm1931_vm8, %v2630_v38, %v1928_v10 }
 0x160   :  { %v1943_v12 = vadd.f32 %v4118_v37, %v1942_v57  ;;  %v1313_v5 = vmul.f32 %v860_v53, %v3984_v34  ;;  %v1868_v51 = vadd.f32 %v2634_v26, %v1867_v56  ;;  %v1937_v62 = vsel %vm4122_vm14, %v4099_v27, %v1932_v60 }
 0x161   :  { %v1882_v39 = vmul.f32 %v2636_v16, %v1881_v31  ;;  %vm5707_vm11 = vweird.f32 %v4084_v45  ;;  %vm4174_vm13 = vcmp.eq.f32.partialorder %v1888_v28, 8.507059e+37  ;;  %v2348_v6 = vmul.f32 %v1937_v62, %v3899_v17  ;;  %v5716_v62 = vld [vmem:[#allocation36_spill] sm:$0xff] }
 0x162   :  { %vm1871_vm12 = vmor %vm5707_vm11, %vm1870_vm1  ;;  %v1947_v34 = vsel %vm1946_vm10, %v4118_v37, %v1943_v12  ;;  %v1895_v59 = vmul.f32 %v4158_v29, %v4090_v41  ;;  %v1344_v27 = vadd.f32 %v1313_v5, %v1312_v3  ;;  %vm5710_vm14 = vweird.f32 %v4095_v35  ;;  %v5715_v5 = vld [vmem:[#allocation35_spill] sm:$0xff] }
 0x163   :  { %v1872_v38 = vsel %vm1871_vm12, %v2634_v26, %v1868_v51  ;;  %v1883_v0 = vadd.f32 %v2636_v16, %v1882_v39  ;;  %v1952_v22 = vsel %vm4132_vm2, %v1951_v14, %v1947_v34  ;;  %vm1886_vm15 = vmor %vm5710_vm14, %vm1885_vm9  ;;  %v1891_v46 = vor.u32 1.1754944e-38, %v1890_v58  ;;  %v5717_v34 = vld [vmem:[#allocation14_spill] sm:$0xff] }
 0x164   :  { %v1877_v45 = vsel %vm4138_vm3, %v1876_v4, %v1872_v38  ;;  %v2349_v37 = vmul.f32 %v1952_v22, %v3911_v30  ;;  %v1896_v17 = vsub.f32 1.0, %v1895_v59  ;;  %1345 = vadd.xlane.f32.xlu0 %v1344_v27  ;;  %v1903_v26 = vand.u32 2147483647, %v4090_v41 }
 0x165   :  { %v1887_v28 = vsel %vm1886_vm15, %v2636_v16, %v1883_v0  ;;  %v2344_v54 = vmul.f32 %v1877_v45, %v4012_v19  ;;  %2639 = vrcp.f32 %v4093_v48  ;;  %v1654_v2 = vmul.f32 %v3525_v44, %v3747_v36  ;;  %v4204_v16 = vpop.permute.xlu1 %619  ;;  %v4266_v0 = vpop.permute.xlu0 %629 }
 0x166   :  { %v1892_v4 = vsel %vm4174_vm13, %v1891_v46, %v1887_v28  ;;  %v2382_v35 = vadd.f32 %v2349_v37, %v2348_v6  ;;  %v1897_v58 = vmul.f32 %v4158_v29, %v1896_v17  ;;  %vm1900_vm0 = vweird.f32 %v4158_v29  ;;  %v5722_v46 = vld [vmem:[#allocation25_spill] sm:$0xff] }
 0x167   :  { %v2345_v30 = vmul.f32 %v1892_v4, %v4022_v21  ;;  %v1905_v52 = vand.u32 2147483648, %v4090_v41  ;;  %v4202_v19 = vadd.f32 %v610_v24, %v3644_v18  ;;  %v4208_v11 = vadd.f32 %v610_v24, %v3647_v42 }
 0x168   :  { %v1898_v47 = vadd.f32 %v4158_v29, %v1897_v58  ;;  %v4211_v14 = vadd.f32 %v3650_v9, %v610_v24  ;;  %v4214_v13 = vadd.f32 %v3653_v8, %v610_v24  ;;  %v1655_v21 = vmul.f32 %v3527_v63, %v3747_v36  ;;  %v5725_v58 = vld [vmem:[#allocation26_spill] sm:$0xff] }
 0x169   :  { %v2376_v43 = vadd.f32 %v2345_v30, %v2344_v54  ;;  %vm4218_vm1 = vcmp.eq.f32.partialorder %v1903_v26, 8.507059e+37  ;;  %v2506_v10 = vmul.f32 -1.442695, %v4202_v19  ;;  %vm1899_vm2 = vweird.f32 %v4090_v41 }
 0x16a   :  { %v2507_v42 = vmul.f32 -1.442695, %v4208_v11  ;;  %v2539_v9 = vmul.f32 -1.442695, %v4211_v14  ;;  %v2540_v57 = vmul.f32 -1.442695, %v4214_v13  ;;  %vm4229_vm3 = vmor %vm1899_vm2, %vm1900_vm0  ;;  %vm1914_vm4 = vweird.f32 %v4093_v48 }
 0x16b   :  { %v2640_v8 = vpop.eup %2639  ;;  %2377 = vadd.xlane.f32.xlu2 %v2376_v43  ;;  %2641 = vpow2.f32 %v2506_v10  ;;  %v4236_v41 = vadd.f32 %v4204_v16, %v3684_v49  ;;  %v4240_v33 = vadd.f32 %v4204_v16, %v3687_v32  ;;  %v1902_v3 = vsel %vm4229_vm3, %v4158_v29, %v1898_v47  ;;  %v5727_v10 = vld [vmem:[#allocation50_spill] sm:$0xff] }
 0x16c   :  { %v1906_v56 = vor.u32 1.1754944e-38, %v1905_v52  ;;  %v1910_v31 = vmul.f32 %v2640_v8, %v4093_v48  ;;  %2643 = vpow2.f32 %v2507_v42  ;;  %2383 = vadd.xlane.f32.xlu0 %v2382_v35  ;;  %v1918_v53 = vand.u32 2147483647, %v4093_v48  ;;  %v5724_v35 = vld [vmem:[#allocation55_spill] sm:$0xff]  ;;  %v5726_v52 = vld [vmem:[#allocation77_spill] sm:$0xff] }
 0x16d   :  { %2645 = vpow2.f32 %v2539_v9  ;;  %v2510_v60 = vmul.f32 -1.442695, %v4236_v41  ;;  %v2511_v49 = vmul.f32 -1.442695, %v4240_v33  ;;  %v1920_v32 = vand.u32 2147483648, %v4093_v48 }
 0x16e   :  { %v1911_v12 = vsub.f32 1.0, %v1910_v31  ;;  %2647 = vpow2.f32 %v2540_v57  ;;  %v1686_v51 = vadd.f32 %v1654_v2, %v5715_v5  ;;  %v1907_v29 = vsel %vm4218_vm1, %v1906_v56, %v1902_v3  ;;  %v5728_v31 = vld [vmem:[#allocation88_spill] sm:$0xff] }
 0x16f   :  { %v4255_v39 = vadd.f32 %v3802_v15, %v3920_v23  ;;  %v1687_v50 = vadd.f32 %v1655_v21, %v5716_v62  ;;  %v4260_v6 = vadd.f32 %v4062_v1, %v5717_v34  ;;  %vm1915_vm5 = vweird.f32 %v2640_v8  ;;  %v5720_v23 = vld [vmem:[#allocation15_spill] sm:$0xff]  ;;  %v5721_v1 = vld [vmem:[#allocation54_spill] sm:$0xff] }
 0x170   :  { %v1912_v59 = vmul.f32 %v2640_v8, %v1911_v12  ;;  %2649 = vpow2.f32 %v2510_v60  ;;  %v4264_v27 = vadd.f32 %v3802_v15, %v3923_v7  ;;  %vm4268_vm6 = vcmp.eq.f32.partialorder %v1918_v53, 8.507059e+37  ;;  %v5723_v15 = vld [vmem:[#allocation74_spill] sm:$0xff]  ;;  %vm1916_vm7 = vmor %vm1914_vm4, %vm1915_vm5 }
 0x171   :  { %v2642_v38 = vpop.eup %2641  ;;  %2651 = vpow2.f32 %v2511_v49  ;;  %v4274_v45 = vadd.f32 %v4068_v55, %v5720_v23  ;;  %v1614_v37 = vadd.f32 %v5722_v46, %v5721_v1  ;;  %v1921_v54 = vor.u32 1.1754944e-38, %v1920_v32 }
 0x172   :  { %v2644_v17 = vpop.eup %2643  ;;  %v1913_v28 = vadd.f32 %v2640_v8, %v1912_v59  ;;  %v2346_v7 = vmul.f32 %v1907_v29, %v5723_v15  ;;  %v4279_v26 = vadd.f32 1.0, %v2642_v38  ;;  %v2508_v55 = vmul.f32 -1.442695, %v4255_v39 }
 0x173   :  { %v2646_v2 = vpop.eup %2645  ;;  %v4284_v4 = vadd.f32 1.0, %v2644_v17  ;;  %v4289_v30 = vadd.f32 %v5725_v58, %v5724_v35  ;;  %v4292_v47 = vadd.f32 %v5726_v52, %v1614_v37  ;;  %v2509_v18 = vmul.f32 -1.442695, %v4264_v27 }
 0x174   :  { %v2648_v21 = vpop.eup %2647  ;;  %v1917_v43 = vsel %vm1916_vm7, %v2640_v8, %v1913_v28  ;;  %2653 = vrcp.f32 %v4279_v26  ;;  %v4297_v48 = vadd.f32 %v1686_v51, %v4266_v0  ;;  %v4301_v42 = vmul.f32 %v5727_v10, %v5696_v40 }
 0x175   :  { %v1922_v9 = vsel %vm4268_vm6, %v1921_v54, %v1917_v43  ;;  %2655 = vrcp.f32 %v4284_v4  ;;  %v4307_v57 = vadd.f32 %v1687_v50, %v4266_v0  ;;  %v4311_v24 = vmul.f32 %v3525_v44, %v5696_v40 }
 0x176   :  { %v2650_v8 = vpop.eup %2649  ;;  %v4315_v3 = vmul.f32 %v3527_v63, %v5696_v40  ;;  %v4319_v56 = vmul.f32 %v3521_v25, %v3747_v36  ;;  %v2347_v53 = vmul.f32 %v1922_v9, %v5728_v31  ;;  %v931_v49 = vand.u32 2147483647, %v4279_v26 }
 0x177   :  { %v2652_v60 = vpop.eup %2651  ;;  %v4323_v12 = vadd.f32 1.0, %v2646_v2  ;;  %v4325_v32 = vadd.f32 1.0, %v2648_v21  ;;  %2657 = vpow2.f32 %v2508_v55  ;;  %v933_v51 = vand.u32 2147483648, %v4279_v26 }
 0x178   :  { %v2379_v5 = vadd.f32 %v2347_v53, %v2346_v7  ;;  %2659 = vpow2.f32 %v2509_v18  ;;  %v4329_v40 = vmul.f32 -1.442695, %v4297_v48  ;;  %v946_v29 = vand.u32 2147483647, %v4284_v4 }
 0x179   :  { %2661 = vrcp.f32 %v4323_v12  ;;  %v4333_v62 = vadd.f32 1.0, %v2650_v8  ;;  %v4336_v50 = vmul.f32 -1.442695, %v4307_v57  ;;  %vm927_vm8 = vweird.f32 %v4279_v26 }
 0x17a   :  { %v2654_v34 = vpop.eup %2653  ;;  %2380 = vadd.xlane.f32.xlu2 %v2379_v5  ;;  %v948_v59 = vand.u32 2147483648, %v4284_v4  ;;  %2663 = vrcp.f32 %v4325_v32  ;;  %v4341_v38 = vadd.f32 1.0, %v2652_v60  ;;  %vm4344_vm9 = vcmp.eq.f32.partialorder %v931_v49, 8.507059e+37 }
 0x17b   :  { %v2656_v22 = vpop.eup %2655  ;;  %v923_v23 = vmul.f32 %v2654_v34, %v4279_v26  ;;  %vm942_vm10 = vweird.f32 %v4284_v4  ;;  %v1965_v46 = vand.u32 2147483648, %v4323_v12  ;;  %v934_v37 = vor.u32 1.1754944e-38, %v933_v51 }
 0x17c   :  { %v938_v17 = vmul.f32 %v2656_v22, %v4284_v4  ;;  %v1963_v28 = vand.u32 2147483647, %v4323_v12  ;;  %v1980_v54 = vand.u32 2147483648, %v4325_v32  ;;  %vm4353_vm11 = vcmp.eq.f32.partialorder %v946_v29, 8.507059e+37 }
 0x17d   :  { %v2658_v15 = vpop.eup %2657  ;;  %v924_v7 = vsub.f32 1.0, %v923_v23  ;;  %v1978_v55 = vand.u32 2147483647, %v4325_v32  ;;  %2665 = vrcp.f32 %v4333_v62  ;;  %v949_v52 = vor.u32 1.1754944e-38, %v948_v59 }
 0x17e   :  { %v2660_v35 = vpop.eup %2659  ;;  %v939_v58 = vsub.f32 1.0, %v938_v17  ;;  %vm1959_vm12 = vweird.f32 %v4323_v12  ;;  %2667 = vrcp.f32 %v4341_v38  ;;  %vm928_vm13 = vweird.f32 %v2654_v34 }
 0x17f   :  { %v2662_v21 = vpop.eup %2661  ;;  %v925_v43 = vmul.f32 %v2654_v34, %v924_v7  ;;  %v1966_v18 = vor.u32 1.1754944e-38, %v1965_v46  ;;  %vm1974_vm14 = vweird.f32 %v4325_v32  ;;  %vm943_vm15 = vweird.f32 %v2656_v22  ;;  %vm929_vm2 = vmor %vm927_vm8, %vm928_vm13 }
 0x180   :  { %v2664_v9 = vpop.eup %2663  ;;  %v940_v8 = vmul.f32 %v2656_v22, %v939_v58  ;;  %v1955_v31 = vmul.f32 %v2662_v21, %v4323_v12  ;;  %vm4363_vm0 = vcmp.eq.f32.partialorder %v1963_v28, 8.507059e+37  ;;  %v1981_v60 = vor.u32 1.1754944e-38, %v1980_v54  ;;  %vm944_vm5 = vmor %vm942_vm10, %vm943_vm15 }
 0x181   :  { %v926_v49 = vadd.f32 %v2654_v34, %v925_v43  ;;  %v1970_v5 = vmul.f32 %v2664_v9, %v4325_v32  ;;  %vm4368_vm1 = vcmp.eq.f32.partialorder %v1978_v55, 8.507059e+37  ;;  %v991_v29 = vand.u32 2147483647, %v4333_v62 }
 0x182   :  { %v993_v59 = vand.u32 2147483648, %v4333_v62  ;;  %v941_v23 = vadd.f32 %v2656_v22, %v940_v8  ;;  %v1956_v46 = vsub.f32 1.0, %v1955_v31  ;;  %vm1960_vm3 = vweird.f32 %v2662_v21 }
 0x183   :  { %vm987_vm4 = vweird.f32 %v4333_v62  ;;  %v1008_v17 = vand.u32 2147483648, %v4341_v38  ;;  %v2666_v28 = vpop.eup %2665  ;;  %v930_v54 = vsel %vm929_vm2, %v2654_v34, %v926_v49  ;;  %v1971_v7 = vsub.f32 1.0, %v1970_v5  ;;  %vm1961_vm8 = vmor %vm1959_vm12, %vm1960_vm3 }
 0x184   :  { %vm1975_vm6 = vweird.f32 %v2664_v9  ;;  %v4381_v55 = vadd.f32 1.0, %v2658_v15  ;;  %v2668_v58 = vpop.eup %2667  ;;  %v935_v26 = vsel %vm4344_vm9, %v934_v37, %v930_v54  ;;  %v945_v43 = vsel %vm944_vm5, %v2656_v22, %v941_v23 }
 0x185   :  { %v1957_v8 = vmul.f32 %v2662_v21, %v1956_v46  ;;  %v983_v31 = vmul.f32 %v2666_v28, %v4333_v62  ;;  %vm1002_vm7 = vweird.f32 %v4341_v38  ;;  %v950_v34 = vsel %vm4353_vm11, %v949_v52, %v945_v43  ;;  %vm1976_vm10 = vmor %vm1974_vm14, %vm1975_vm6 }
 0x186   :  { %v1318_v4 = vmul.f32 %v935_v26, %v4202_v19  ;;  %v1972_v49 = vmul.f32 %v2664_v9, %v1971_v7  ;;  %2669 = vpow2.f32 %v4329_v40  ;;  %v1319_v15 = vmul.f32 %v950_v34, %v4208_v11 }
 0x187   :  { %v1958_v5 = vadd.f32 %v2662_v21, %v1957_v8  ;;  %v984_v25 = vsub.f32 1.0, %v983_v31  ;;  %v998_v1 = vmul.f32 %v2668_v58, %v4341_v38  ;;  %vm988_vm9 = vweird.f32 %v2666_v28 }
 0x188   :  { %v1973_v22 = vadd.f32 %v2664_v9, %v1972_v49  ;;  %v4396_v37 = vadd.f32 1.0, %v2660_v35  ;;  %2671 = vrcp.f32 %v4381_v55  ;;  %v1353_v19 = vadd.f32 %v1319_v15, %v1318_v4  ;;  %vm989_vm12 = vmor %vm987_vm4, %vm988_vm9 }
 0x189   :  { %v1962_v2 = vsel %vm1961_vm8, %v2662_v21, %v1958_v5  ;;  %v985_v11 = vmul.f32 %v2666_v28, %v984_v25  ;;  %v999_v40 = vsub.f32 1.0, %v998_v1  ;;  %vm1003_vm11 = vweird.f32 %v2668_v58 }
 0x18a   :  { %v1967_v52 = vsel %vm4363_vm0, %v1966_v18, %v1962_v2  ;;  %v1977_v23 = vsel %vm1976_vm10, %v2664_v9, %v1973_v22  ;;  %v1006_v12 = vand.u32 2147483647, %v4341_v38  ;;  %1354 = vadd.xlane.f32.xlu0 %v1353_v19  ;;  %vm992_vm13 = vcmp.eq.f32.partialorder %v991_v29, 8.507059e+37  ;;  %vm1004_vm14 = vmor %vm1002_vm7, %vm1003_vm11  ;;  %v5739_v2 = vld [vmem:[#allocation78_spill] sm:$0xff] }
 0x18b   :  { %v1982_v35 = vsel %vm4368_vm1, %v1981_v60, %v1977_v23  ;;  %v2350_v46 = vmul.f32 %v1967_v52, %v4211_v14  ;;  %v986_v21 = vadd.f32 %v2666_v28, %v985_v11  ;;  %v1000_v54 = vmul.f32 %v2668_v58, %v999_v40  ;;  %v5740_v52 = vld [vmem:[#allocation52_spill] sm:$0xff] }
 0x18c   :  { %v2670_v7 = vpop.eup %2669  ;;  %v2351_v32 = vmul.f32 %v1982_v35, %v4214_v13  ;;  %v994_v25 = vor.u32 1.1754944e-38, %v993_v59  ;;  %2673 = vrcp.f32 %v4396_v37  ;;  %v1009_v53 = vor.u32 1.1754944e-38, %v1008_v17  ;;  %v5741_v23 = vld [vmem:[#allocation92_spill] sm:$0xff]  ;;  %v5742_v35 = vld [vmem:[#allocation53_spill] sm:$0xff] }
 0x18d   :  { %v990_v18 = vsel %vm989_vm12, %v2666_v28, %v986_v21  ;;  %v1001_v9 = vadd.f32 %v2668_v58, %v1000_v54  ;;  %v961_v60 = vand.u32 2147483647, %v4381_v55  ;;  %v963_v13 = vand.u32 2147483648, %v4381_v55 }
 0x18e   :  { %v2672_v51 = vpop.eup %2671  ;;  %v2385_v14 = vadd.f32 %v2351_v32, %v2350_v46  ;;  %v995_v26 = vsel %vm992_vm13, %v994_v25, %v990_v18  ;;  %2675 = vpow2.f32 %v4336_v50  ;;  %vm1007_vm15 = vcmp.eq.f32.partialorder %v1006_v12, 8.507059e+37  ;;  %v5743_v46 = vld [vmem:[#allocation93_spill] sm:$0xff] }
 0x18f   :  { %v1005_v62 = vsel %vm1004_vm14, %v2668_v58, %v1001_v9  ;;  %v1322_v29 = vmul.f32 %v995_v26, %v4236_v41  ;;  %v953_v59 = vmul.f32 %v2672_v51, %v4381_v55  ;;  %v4423_v17 = vmul.f32 %v5727_v10, %v3747_v36  ;;  %v5748_v36 = vld [vmem:[#allocation27_spill] sm:$0xff] }
 0x190   :  { %2386 = vadd.xlane.f32.xlu2 %v2385_v14  ;;  %v1010_v28 = vsel %vm1007_vm15, %v1009_v53, %v1005_v62  ;;  %vm957_vm0 = vweird.f32 %v4381_v55  ;;  %v4426_v38 = vadd.f32 1.0, %v2670_v7  ;;  %v4431_v50 = vadd.f32 %v4260_v6, %v4204_v16 }
 0x191   :  { %v1323_v43 = vmul.f32 %v1010_v28, %v4240_v33  ;;  %v954_v8 = vsub.f32 1.0, %v953_v59  ;;  %v4435_v41 = vadd.f32 %v4274_v45, %v4204_v16  ;;  %vm4437_vm1 = vcmp.eq.f32.partialorder %v961_v60, 8.507059e+37  ;;  %v4443_v33 = vpop.permute.xlu2 %624  ;;  %v5747_v28 = vld [vmem:[#allocation76_spill] sm:$0xff] }
 0x192   :  { %v2674_v58 = vpop.eup %2673  ;;  %v964_v31 = vor.u32 1.1754944e-38, %v963_v13  ;;  %v976_v34 = vand.u32 2147483647, %v4396_v37  ;;  %2677 = vrcp.f32 %v4426_v38  ;;  %vm958_vm2 = vweird.f32 %v2672_v51 }
 0x193   :  { %v1359_v4 = vadd.f32 %v1323_v43, %v1322_v29  ;;  %v955_v49 = vmul.f32 %v2672_v51, %v954_v8  ;;  %v968_v6 = vmul.f32 %v2674_v58, %v4396_v37  ;;  %vm972_vm3 = vweird.f32 %v4396_v37  ;;  %vm959_vm4 = vmor %vm957_vm0, %vm958_vm2  ;;  %v5746_v29 = vld [vmem:[#allocation75_spill] sm:$0xff] }
 0x194   :  { %v2676_v15 = vpop.eup %2675  ;;  %v978_v16 = vand.u32 2147483648, %v4396_v37  ;;  %v2543_v45 = vmul.f32 -1.442695, %v4431_v50  ;;  %v2544_v5 = vmul.f32 -1.442695, %v4435_v41  ;;  %v1685_v11 = vadd.f32 %v5739_v2, %v4289_v30 }
 0x195   :  { %1360 = vadd.xlane.f32.xlu1 %v1359_v4  ;;  %v956_v1 = vadd.f32 %v2672_v51, %v955_v49  ;;  %v969_v22 = vsub.f32 1.0, %v968_v6  ;;  %v4450_v19 = vadd.f32 1.0, %v2676_v15  ;;  %v4458_v40 = vadd.f32 %v4292_v47, %v4443_v33  ;;  %v5749_v15 = vld [vmem:[#allocation84_spill] sm:$0xff] }
 0x196   :  { %2679 = vpow2.f32 %v2543_v45  ;;  %v438_v12 = vadd.f32 %v5741_v23, %v5740_v52  ;;  %v439_v21 = vadd.f32 %v5743_v46, %v5742_v35  ;;  %vm973_vm5 = vweird.f32 %v2674_v58 }
 0x197   :  { %v960_v54 = vsel %vm959_vm4, %v2672_v51, %v956_v1  ;;  %v970_v7 = vmul.f32 %v2674_v58, %v969_v22  ;;  %2681 = vrcp.f32 %v4450_v19  ;;  %vm4467_vm6 = vcmp.eq.f32.partialorder %v976_v34, 8.507059e+37  ;;  %vm974_vm7 = vmor %vm972_vm3, %vm973_vm5 }
 0x198   :  { %v2678_v30 = vpop.eup %2677  ;;  %v965_v55 = vsel %vm4437_vm1, %v964_v31, %v960_v54  ;;  %v979_v47 = vor.u32 1.1754944e-38, %v978_v16  ;;  %2683 = vpow2.f32 %v2544_v5  ;;  %v2083_v9 = vand.u32 2147483647, %v4426_v38 }
 0x199   :  { %v971_v25 = vadd.f32 %v2674_v58, %v970_v7  ;;  %v2075_v18 = vmul.f32 %v2678_v30, %v4426_v38  ;;  %v2085_v53 = vand.u32 2147483648, %v4426_v38  ;;  %v1320_v60 = vmul.f32 %v965_v55, %v4255_v39 }
 0x19a   :  { %v2098_v51 = vand.u32 2147483647, %v4450_v19  ;;  %v4479_v14 = vadd.f32 %v1685_v11, %v4443_v33  ;;  %v2545_v26 = vmul.f32 -1.442695, %v4458_v40  ;;  %v572_v59 = vadd.f32 %v5746_v29, %v438_v12 }
 0x19b   :  { %v975_v13 = vsel %vm974_vm7, %v2674_v58, %v971_v25  ;;  %v2076_v62 = vsub.f32 1.0, %v2075_v18  ;;  %v573_v43 = vadd.f32 %v5747_v28, %v439_v21  ;;  %v4489_v31 = vadd.f32 %v4079_v61, %v5748_v36  ;;  %v5754_v18 = vld [vmem:[#allocation28_spill] sm:$0xff] }
 0x19c   :  { %v2680_v8 = vpop.eup %2679  ;;  %v980_v37 = vsel %vm4467_vm6, %v979_v47, %v975_v13  ;;  %2685 = vpow2.f32 %v2545_v26  ;;  %v2546_v39 = vmul.f32 -1.442695, %v4479_v14  ;;  %vm2080_vm8 = vweird.f32 %v2678_v30 }
 0x19d   :  { %v2682_v34 = vpop.eup %2681  ;;  %v1321_v4 = vmul.f32 %v980_v37, %v4264_v27  ;;  %v2077_v58 = vmul.f32 %v2678_v30, %v2076_v62  ;;  %v4492_v49 = vadd.f32 1.0, %v2680_v8  ;;  %v4496_v16 = vmul.f32 %v3525_v44, %v5749_v15 }
 0x19e   :  { %v2684_v6 = vpop.eup %2683  ;;  %vm2079_vm9 = vweird.f32 %v4426_v38  ;;  %v2090_v45 = vmul.f32 %v2682_v34, %v4450_v19  ;;  %2687 = vpow2.f32 %v2546_v39  ;;  %vm2084_vm11 = vcmp.eq.f32.partialorder %v2083_v9, 8.507059e+37 }
 0x19f   :  { %v1356_v5 = vadd.f32 %v1321_v4, %v1320_v60  ;;  %v2078_v61 = vadd.f32 %v2678_v30, %v2077_v58  ;;  %v4500_v1 = vadd.f32 1.0, %v2684_v6  ;;  %2689 = vrcp.f32 %v4492_v49  ;;  %vm4503_vm10 = vmor %vm2079_vm9, %vm2080_vm8 }
 0x1a0   :  { %v2086_v22 = vor.u32 1.1754944e-38, %v2085_v53  ;;  %v2091_v2 = vsub.f32 1.0, %v2090_v45  ;;  %v2100_v11 = vand.u32 2147483648, %v4450_v19  ;;  %vm2094_vm12 = vweird.f32 %v4450_v19 }
 0x1a1   :  { %1357 = vadd.xlane.f32.xlu2 %v1356_v5  ;;  %v2082_v38 = vsel %vm4503_vm10, %v2678_v30, %v2078_v61  ;;  %vm4511_vm13 = vcmp.eq.f32.partialorder %v2098_v51, 8.507059e+37  ;;  %2691 = vrcp.f32 %v4500_v1  ;;  %vm2095_vm14 = vweird.f32 %v2682_v34 }
 0x1a2   :  { %v2686_v23 = vpop.eup %2685  ;;  %v2092_v12 = vmul.f32 %v2682_v34, %v2091_v2  ;;  %v2023_v35 = vand.u32 2147483647, %v4492_v49  ;;  %v4518_v46 = vadd.f32 %v4443_v33, %v572_v59  ;;  %v2087_v21 = vsel %vm2084_vm11, %v2086_v22, %v2082_v38  ;;  %vm2096_vm15 = vmor %vm2094_vm12, %vm2095_vm14 }
 0x1a3   :  { %v2025_v54 = vand.u32 2147483648, %v4492_v49  ;;  %v4521_v7 = vadd.f32 1.0, %v2686_v23  ;;  %v4524_v30 = vadd.f32 %v4443_v33, %v573_v43  ;;  %v2101_v47 = vor.u32 1.1754944e-38, %v2100_v11 }
 0x1a4   :  { %v2688_v55 = vpop.eup %2687  ;;  %v2093_v32 = vadd.f32 %v2682_v34, %v2092_v12  ;;  %v2038_v25 = vand.u32 2147483647, %v4500_v1  ;;  %v577_v9 = vadd.f32 %v4301_v42, %v5754_v18  ;;  %vm2019_vm0 = vweird.f32 %v4492_v49  ;;  %v5759_v12 = vld [vmem:[#allocation33_spill] sm:$0xff] }
 0x1a5   :  { %v2690_v53 = vpop.eup %2689  ;;  %v2040_v60 = vand.u32 2147483648, %v4500_v1  ;;  %v4533_v51 = vadd.f32 1.0, %v2688_v55  ;;  %2693 = vrcp.f32 %v4521_v7  ;;  %v2358_v26 = vmul.f32 %v2087_v21, %v4297_v48  ;;  %v4548_v48 = vpop.permute.xlu1 %634 }
 0x1a6   :  { %v2097_v33 = vsel %vm2096_vm15, %v2682_v34, %v2093_v32  ;;  %v2015_v13 = vmul.f32 %v2690_v53, %v4492_v49  ;;  %vm4538_vm1 = vcmp.eq.f32.partialorder %v2023_v35, 8.507059e+37  ;;  %vm2034_vm2 = vweird.f32 %v4500_v1  ;;  %v5760_v35 = vld [vmem:[#allocation34_spill] sm:$0xff] }
 0x1a7   :  { %v2512_v42 = vmul.f32 -1.442695, %v4518_v46  ;;  %v2692_v19 = vpop.eup %2691  ;;  %v2102_v29 = vsel %vm4511_vm13, %v2101_v47, %v2097_v33  ;;  %v2026_v59 = vor.u32 1.1754944e-38, %v2025_v54  ;;  %2695 = vrcp.f32 %v4533_v51 }
 0x1a8   :  { %v2513_v28 = vmul.f32 -1.442695, %v4524_v30  ;;  %v2359_v43 = vmul.f32 %v2102_v29, %v4307_v57  ;;  %v2016_v8 = vsub.f32 1.0, %v2015_v13  ;;  %v2030_v37 = vmul.f32 %v2692_v19, %v4500_v1 }
 0x1a9   :  { %vm4552_vm3 = vcmp.eq.f32.partialorder %v2038_v25, 8.507059e+37  ;;  %vm2020_vm4 = vweird.f32 %v2690_v53  ;;  %v2041_v36 = vor.u32 1.1754944e-38, %v2040_v60  ;;  %v2053_v34 = vand.u32 2147483647, %v4521_v7 }
 0x1aa   :  { %v2055_v4 = vand.u32 2147483648, %v4521_v7  ;;  %v2397_v58 = vadd.f32 %v2359_v43, %v2358_v26  ;;  %v2017_v6 = vmul.f32 %v2690_v53, %v2016_v8  ;;  %v2031_v45 = vsub.f32 1.0, %v2030_v37  ;;  %vm2021_vm7 = vmor %vm2019_vm0, %vm2020_vm4 }
 0x1ab   :  { %vm2049_vm5 = vweird.f32 %v4521_v7  ;;  %2697 = vpow2.f32 %v2512_v42  ;;  %v2694_v57 = vpop.eup %2693  ;;  %vm2035_vm6 = vweird.f32 %v2692_v19  ;;  %v2068_v5 = vand.u32 2147483647, %v4533_v51 }
 0x1ac   :  { %2699 = vpow2.f32 %v2513_v28  ;;  %v4562_v61 = vadd.f32 %v4548_v48, %v4489_v31  ;;  %2398 = vadd.xlane.f32.xlu1 %v2397_v58  ;;  %v2018_v27 = vadd.f32 %v2690_v53, %v2017_v6  ;;  %v2032_v22 = vmul.f32 %v2692_v19, %v2031_v45  ;;  %vm2036_vm8 = vmor %vm2034_vm2, %vm2035_vm6 }
 0x1ad   :  { %v2045_v2 = vmul.f32 %v2694_v57, %v4521_v7  ;;  %v2070_v11 = vand.u32 2147483648, %v4533_v51  ;;  %v2696_v38 = vpop.eup %2695  ;;  %v4570_v52 = vadd.f32 %v4548_v48, %v577_v9  ;;  %v574_v31 = vadd.f32 %v4319_v56, %v5759_v12 }
 0x1ae   :  { %v2516_v23 = vmul.f32 -1.442695, %v4562_v61  ;;  %v575_v21 = vadd.f32 %v4423_v17, %v5760_v35  ;;  %v2022_v54 = vsel %vm2021_vm7, %v2690_v53, %v2018_v27  ;;  %v2033_v55 = vadd.f32 %v2692_v19, %v2032_v22 }
 0x1af   :  { %v2046_v32 = vsub.f32 1.0, %v2045_v2  ;;  %v2060_v47 = vmul.f32 %v2696_v38, %v4533_v51  ;;  %v2027_v49 = vsel %vm4538_vm1, %v2026_v59, %v2022_v54  ;;  %vm2050_vm9 = vweird.f32 %v2694_v57 }
 0x1b0   :  { %2701 = vpow2.f32 %v2516_v23  ;;  %v2517_v25 = vmul.f32 -1.442695, %v4570_v52  ;;  %v2037_v18 = vsel %vm2036_vm8, %v2692_v19, %v2033_v55  ;;  %v2354_v17 = vmul.f32 %v2027_v49, %v4431_v50  ;;  %vm2051_vm11 = vmor %vm2049_vm5, %vm2050_vm9  ;;  %v5765_v49 = vld [vmem:[#allocation43_spill] sm:$0xff] }
 0x1b1   :  { %v2698_v56 = vpop.eup %2697  ;;  %v2047_v9 = vmul.f32 %v2694_v57, %v2046_v32  ;;  %v2061_v53 = vsub.f32 1.0, %v2060_v47  ;;  %v2042_v33 = vsel %vm4552_vm3, %v2041_v36, %v2037_v18  ;;  %vm2065_vm10 = vweird.f32 %v2696_v38 }
 0x1b2   :  { %v2700_v60 = vpop.eup %2699  ;;  %v4587_v26 = vadd.f32 1.0, %v2698_v56  ;;  %2703 = vpow2.f32 %v2517_v25  ;;  %v2355_v1 = vmul.f32 %v2042_v33, %v4435_v41  ;;  %vm2054_vm12 = vcmp.eq.f32.partialorder %v2053_v34, 8.507059e+37 }
 0x1b3   :  { %v2048_v13 = vadd.f32 %v2694_v57, %v2047_v9  ;;  %v2062_v62 = vmul.f32 %v2696_v38, %v2061_v53  ;;  %v4590_v42 = vadd.f32 1.0, %v2700_v60  ;;  %v2056_v50 = vor.u32 1.1754944e-38, %v2055_v4  ;;  %v5766_v9 = vld [vmem:[#allocation44_spill] sm:$0xff] }
 0x1b4   :  { %vm2064_vm13 = vweird.f32 %v4533_v51  ;;  %2705 = vrcp.f32 %v4587_v26  ;;  %v2391_v19 = vadd.f32 %v2355_v1, %v2354_v17  ;;  %v2071_v43 = vor.u32 1.1754944e-38, %v2070_v11 }
 0x1b5   :  { %v2052_v29 = vsel %vm2051_vm11, %v2694_v57, %v2048_v13  ;;  %v2063_v59 = vadd.f32 %v2696_v38, %v2062_v62  ;;  %2707 = vrcp.f32 %v4590_v42  ;;  %vm2066_vm14 = vmor %vm2064_vm13, %vm2065_vm10  ;;  %v1023_v8 = vand.u32 2147483648, %v4587_v26  ;;  %v5767_v13 = vld [vmem:[#allocation23_spill] sm:$0xff] }
 0x1b6   :  { %v2702_v41 = vpop.eup %2701  ;;  %v2057_v28 = vsel %vm2054_vm12, %v2056_v50, %v2052_v29  ;;  %v4601_v7 = vadd.f32 %v4266_v0, %v574_v31  ;;  %2392 = vadd.xlane.f32.xlu0 %v2391_v19  ;;  %vm2069_vm15 = vcmp.eq.f32.partialorder %v2068_v5, 8.507059e+37  ;;  %v1021_v39 = vand.u32 2147483647, %v4587_v26  ;;  %v5768_v62 = vld [vmem:[#allocation11_spill] sm:$0xff] }
 0x1b7   :  { %v2067_v37 = vsel %vm2066_vm14, %v2696_v38, %v2063_v59  ;;  %v2356_v51 = vmul.f32 %v2057_v28, %v4458_v40  ;;  %v1036_v4 = vand.u32 2147483647, %v4590_v42  ;;  %v1038_v58 = vand.u32 2147483648, %v4590_v42 }
 0x1b8   :  { %v2704_v36 = vpop.eup %2703  ;;  %v2072_v34 = vsel %vm2069_vm15, %v2071_v43, %v2067_v37  ;;  %v4607_v6 = vadd.f32 1.0, %v2702_v41  ;;  %v1661_v45 = vmul.f32 %v3527_v63, %v5749_v15  ;;  %vm1017_vm0 = vweird.f32 %v4587_v26 }
 0x1b9   :  { %v2357_v57 = vmul.f32 %v2072_v34, %v4479_v14  ;;  %v4613_v5 = vadd.f32 1.0, %v2704_v36  ;;  %v1024_v27 = vor.u32 1.1754944e-38, %v1023_v8  ;;  %v4617_v22 = vadd.f32 %v4266_v0, %v575_v21  ;;  %v4633_v21 = vpop.permute.xlu0 %644  ;;  %v5770_v36 = vld [vmem:[#allocation64_spill] sm:$0xff] }
 0x1ba   :  { %v2706_v40 = vpop.eup %2705  ;;  %2709 = vrcp.f32 %v4607_v6  ;;  %v2514_v2 = vmul.f32 -1.442695, %v4601_v7  ;;  %vm4621_vm1 = vcmp.eq.f32.partialorder %v1021_v39, 8.507059e+37  ;;  %vm1032_vm2 = vweird.f32 %v4590_v42  ;;  %v5769_v39 = vld [vmem:[#allocation24_spill] sm:$0xff] }
 0x1bb   :  { %v2708_v11 = vpop.eup %2707  ;;  %v2394_v38 = vadd.f32 %v2357_v57, %v2356_v51  ;;  %v1013_v23 = vmul.f32 %v2706_v40, %v4587_v26  ;;  %2711 = vrcp.f32 %v4613_v5  ;;  %vm4628_vm3 = vcmp.eq.f32.partialorder %v1036_v4, 8.507059e+37 }
 0x1bc   :  { %v1028_v14 = vmul.f32 %v2708_v11, %v4590_v42  ;;  %v1039_v0 = vor.u32 1.1754944e-38, %v1038_v58  ;;  %v1081_v35 = vand.u32 2147483647, %v4607_v6  ;;  %vm1018_vm4 = vweird.f32 %v2706_v40 }
 0x1bd   :  { %2395 = vadd.xlane.f32.xlu2 %v2394_v38  ;;  %v1014_v54 = vsub.f32 1.0, %v1013_v23  ;;  %vm1033_vm5 = vweird.f32 %v2708_v11  ;;  %v1083_v55 = vand.u32 2147483648, %v4607_v6  ;;  %2713 = vpow2.f32 %v2514_v2  ;;  %vm1019_vm7 = vmor %vm1017_vm0, %vm1018_vm4 }
 0x1be   :  { %v1029_v32 = vsub.f32 1.0, %v1028_v14  ;;  %v2515_v47 = vmul.f32 -1.442695, %v4617_v22  ;;  %v1692_v25 = vadd.f32 %v4496_v16, %v5765_v49  ;;  %v1096_v18 = vand.u32 2147483647, %v4613_v5  ;;  %vm1034_vm9 = vmor %vm1032_vm2, %vm1033_vm5 }
 0x1bf   :  { %v1015_v56 = vmul.f32 %v2706_v40, %v1014_v54  ;;  %v1098_v17 = vand.u32 2147483648, %v4613_v5  ;;  %v1693_v53 = vadd.f32 %v1661_v45, %v5766_v9  ;;  %v1618_v50 = vadd.f32 %v5768_v62, %v5767_v13  ;;  %v5773_v62 = vld [vmem:[#allocation30_spill] sm:$0xff] }
 0x1c0   :  { %v2710_v60 = vpop.eup %2709  ;;  %v1030_v33 = vmul.f32 %v2708_v11, %v1029_v32  ;;  %2715 = vpow2.f32 %v2515_v47  ;;  %v4643_v1 = vadd.f32 %v1692_v25, %v4633_v21  ;;  %v1619_v34 = vadd.f32 %v5770_v36, %v5769_v39 }
 0x1c1   :  { %v2712_v19 = vpop.eup %2711  ;;  %v1016_v29 = vadd.f32 %v2706_v40, %v1015_v56  ;;  %v1073_v16 = vmul.f32 %v2710_v60, %v4607_v6  ;;  %vm1078_vm6 = vweird.f32 %v2710_v60  ;;  %v4649_v59 = vadd.f32 %v1693_v53, %v4633_v21 }
 0x1c2   :  { %v1031_v41 = vadd.f32 %v2708_v11, %v1030_v33  ;;  %v1088_v28 = vmul.f32 %v2712_v19, %v4613_v5  ;;  %vm1093_vm8 = vweird.f32 %v2712_v19  ;;  %v2553_v43 = vmul.f32 -1.442695, %v4643_v1  ;;  %v5771_v33 = vld [vmem:[#allocation29_spill] sm:$0xff] }
 0x1c3   :  { %v1020_v8 = vsel %vm1019_vm7, %v2706_v40, %v1016_v29  ;;  %v1074_v37 = vsub.f32 1.0, %v1073_v16  ;;  %v2554_v51 = vmul.f32 -1.442695, %v4649_v59  ;;  %v2714_v4 = vpop.eup %2713  ;;  %v1688_v54 = vadd.f32 %v4311_v24, %v1618_v50  ;;  %v5774_v50 = vld [vmem:[#allocation13_spill] sm:$0xff] }
 0x1c4   :  { %v1025_v26 = vsel %vm4621_vm1, %v1024_v27, %v1020_v8  ;;  %v1035_v58 = vsel %vm1034_vm9, %v2708_v11, %v1031_v41  ;;  %v1089_v45 = vsub.f32 1.0, %v1088_v28  ;;  %2717 = vpow2.f32 %v2553_v43  ;;  %v5790_v41 = vld [vmem:[#allocation37_spill] sm:$0xff] }
 0x1c5   :  { %v1040_v57 = vsel %vm4628_vm3, %v1039_v0, %v1035_v58  ;;  %v1324_v40 = vmul.f32 %v1025_v26, %v4518_v46  ;;  %v1075_v42 = vmul.f32 %v2710_v60, %v1074_v37  ;;  %v4667_v2 = vadd.f32 1.0, %v2714_v4 }
 0x1c6   :  { %v2716_v38 = vpop.eup %2715  ;;  %v1325_v23 = vmul.f32 %v1040_v57, %v4524_v30  ;;  %v1090_v14 = vmul.f32 %v2712_v19, %v1089_v45  ;;  %2719 = vpow2.f32 %v2554_v51  ;;  %vm1077_vm10 = vweird.f32 %v4607_v6 }
 0x1c7   :  { %v1076_v12 = vadd.f32 %v2710_v60, %v1075_v42  ;;  %v4672_v27 = vadd.f32 1.0, %v2716_v38  ;;  %2721 = vrcp.f32 %v4667_v2  ;;  %vm1079_vm11 = vmor %vm1077_vm10, %vm1078_vm6  ;;  %v1084_v46 = vor.u32 1.1754944e-38, %v1083_v55  ;;  %v5780_v42 = vld [vmem:[#allocation65_spill] sm:$0xff] }
 0x1c8   :  { %v1362_v11 = vadd.f32 %v1325_v23, %v1324_v40  ;;  %v1091_v31 = vadd.f32 %v2712_v19, %v1090_v14  ;;  %vm1092_vm12 = vweird.f32 %v4613_v5  ;;  %vm1082_vm13 = vcmp.eq.f32.partialorder %v1081_v35, 8.507059e+37  ;;  %v5779_v40 = vld [vmem:[#allocation31_spill] sm:$0xff]  ;;  %v5781_v23 = vld [vmem:[#allocation32_spill] sm:$0xff]  ;;  %v5782_v14 = vld [vmem:[#allocation66_spill] sm:$0xff] }
 0x1c9   :  { %v1080_v0 = vsel %vm1079_vm11, %v2710_v60, %v1076_v12  ;;  %vm1094_vm14 = vmor %vm1092_vm12, %vm1093_vm8  ;;  %v1099_v30 = vor.u32 1.1754944e-38, %v1098_v17  ;;  %2723 = vrcp.f32 %v4672_v27  ;;  %vm1097_vm15 = vcmp.eq.f32.partialorder %v1096_v18, 8.507059e+37 }
 0x1ca   :  { %v2718_v24 = vpop.eup %2717  ;;  %1363 = vadd.xlane.f32.xlu0 %v1362_v11  ;;  %v1085_v6 = vsel %vm1082_vm13, %v1084_v46, %v1080_v0  ;;  %v1095_v32 = vsel %vm1094_vm14, %v2712_v19, %v1091_v31  ;;  %v1051_v47 = vand.u32 2147483647, %v4667_v2  ;;  %v1053_v25 = vand.u32 2147483648, %v4667_v2 }
 0x1cb   :  { %v1100_v49 = vsel %vm1097_vm15, %v1099_v30, %v1095_v32  ;;  %v1328_v55 = vmul.f32 %v1085_v6, %v4562_v61  ;;  %v1066_v5 = vand.u32 2147483647, %v4672_v27  ;;  %v1068_v17 = vand.u32 2147483648, %v4672_v27  ;;  %v5772_v61 = vld [vmem:[#allocation12_spill] sm:$0xff]  ;;  %v5786_v32 = vld [vmem:[#allocation59_spill] sm:$0xff] }
 0x1cc   :  { %v2720_v35 = vpop.eup %2719  ;;  %v1329_v56 = vmul.f32 %v1100_v49, %v4570_v52  ;;  %v4685_v9 = vadd.f32 1.0, %v2718_v24  ;;  %v1689_v53 = vadd.f32 %v4315_v3, %v1619_v34  ;;  %vm1047_vm0 = vweird.f32 %v4667_v2  ;;  %v5785_v24 = vld [vmem:[#allocation58_spill] sm:$0xff] }
 0x1cd   :  { %v2722_v60 = vpop.eup %2721  ;;  %v4689_v18 = vadd.f32 1.0, %v2720_v35  ;;  %v4693_v13 = vadd.f32 %v5772_v61, %v5771_v33  ;;  %v4697_v19 = vadd.f32 %v5774_v50, %v5773_v62  ;;  %v4702_v3 = vadd.f32 %v1688_v54, %v4548_v48 }
 0x1ce   :  { %v1368_v52 = vadd.f32 %v1329_v56, %v1328_v55  ;;  %v1043_v29 = vmul.f32 %v2722_v60, %v4667_v2  ;;  %2725 = vrcp.f32 %v4685_v9  ;;  %vm4704_vm1 = vcmp.eq.f32.partialorder %v1051_v47, 8.507059e+37  ;;  %v5787_v47 = vld [vmem:[#allocation21_spill] sm:$0xff]  ;;  %v4746_v55 = vpop.permute.xlu2 %639 }
 0x1cf   :  { %v2724_v16 = vpop.eup %2723  ;;  %v1054_v28 = vor.u32 1.1754944e-38, %v1053_v25  ;;  %vm1062_vm2 = vweird.f32 %v4672_v27  ;;  %2727 = vrcp.f32 %v4689_v18  ;;  %vm4711_vm3 = vcmp.eq.f32.partialorder %v1066_v5, 8.507059e+37 }
 0x1d0   :  { %1369 = vadd.xlane.f32.xlu1 %v1368_v52  ;;  %v1044_v43 = vsub.f32 1.0, %v1043_v29  ;;  %v1058_v8 = vmul.f32 %v2724_v16, %v4672_v27  ;;  %v1069_v51 = vor.u32 1.1754944e-38, %v1068_v17  ;;  %vm1048_vm4 = vweird.f32 %v2722_v60  ;;  %v5791_v27 = vld [vmem:[#allocation16_spill] sm:$0xff] }
 0x1d1   :  { %vm1063_vm5 = vweird.f32 %v2724_v16  ;;  %v2173_v39 = vand.u32 2147483647, %v4685_v9  ;;  %v2175_v36 = vand.u32 2147483648, %v4685_v9  ;;  %v4718_v26 = vadd.f32 %v1689_v53, %v4548_v48  ;;  %vm1049_vm8 = vmor %vm1047_vm0, %vm1048_vm4 }
 0x1d2   :  { %v1045_v34 = vmul.f32 %v2722_v60, %v1044_v43  ;;  %v1059_v4 = vsub.f32 1.0, %v1058_v8  ;;  %v2549_v58 = vmul.f32 -1.442695, %v4702_v3  ;;  %vm2169_vm6 = vweird.f32 %v4685_v9  ;;  %vm1064_vm12 = vmor %vm1062_vm2, %vm1063_vm5 }
 0x1d3   :  { %v2188_v45 = vand.u32 2147483647, %v4689_v18  ;;  %v2190_v57 = vand.u32 2147483648, %v4689_v18  ;;  %v4726_v38 = vadd.f32 %v5780_v42, %v5779_v40  ;;  %v4730_v54 = vadd.f32 %v5782_v14, %v5781_v23  ;;  %v5794_v40 = vld [vmem:[#allocation39_spill] sm:$0xff]  ;;  %v5795_v42 = vld [vmem:[#allocation68_spill] sm:$0xff] }
 0x1d4   :  { %v2726_v12 = vpop.eup %2725  ;;  %v1046_v11 = vadd.f32 %v2722_v60, %v1045_v34  ;;  %v1060_v48 = vmul.f32 %v2724_v16, %v1059_v4  ;;  %vm2184_vm7 = vweird.f32 %v4689_v18  ;;  %2729 = vpow2.f32 %v2549_v58  ;;  %v5793_v34 = vld [vmem:[#allocation67_spill] sm:$0xff] }
 0x1d5   :  { %v2550_v46 = vmul.f32 -1.442695, %v4718_v26  ;;  %v2728_v31 = vpop.eup %2727  ;;  %v2165_v0 = vmul.f32 %v2726_v12, %v4685_v9  ;;  %vm2170_vm9 = vweird.f32 %v2726_v12  ;;  %vm4738_vm10 = vcmp.eq.f32.partialorder %v2173_v39, 8.507059e+37  ;;  %v5792_v39 = vld [vmem:[#allocation38_spill] sm:$0xff] }
 0x1d6   :  { %v1620_v6 = vadd.f32 %v4054_v20, %v5785_v24  ;;  %v1621_v49 = vadd.f32 %v5787_v47, %v5786_v32  ;;  %v1050_v25 = vsel %vm1049_vm8, %v2722_v60, %v1046_v11  ;;  %v1061_v5 = vadd.f32 %v2724_v16, %v1060_v48  ;;  %v5788_v20 = vld [vmem:[#allocation81_spill] sm:$0xff]  ;;  %v5789_v60 = vld [vmem:[#allocation82_spill] sm:$0xff]  ;;  %vm2171_vm13 = vmor %vm2169_vm6, %vm2170_vm9 }
 0x1d7   :  { %v2180_v2 = vmul.f32 %v2728_v31, %v4689_v18  ;;  %vm2185_vm11 = vweird.f32 %v2728_v31  ;;  %v1055_v35 = vsel %vm4704_vm1, %v1054_v28, %v1050_v25  ;;  %v2166_v56 = vsub.f32 1.0, %v2165_v0  ;;  %v5796_v48 = vld [vmem:[#allocation40_spill] sm:$0xff]  ;;  %v5798_v25 = vld [vmem:[#allocation51_spill] sm:$0xff] }
 0x1d8   :  { %2731 = vpow2.f32 %v2550_v46  ;;  %v1690_v17 = vadd.f32 %v5788_v20, %v1620_v6  ;;  %v1065_v53 = vsel %vm1064_vm12, %v2724_v16, %v1061_v5  ;;  %v1326_v33 = vmul.f32 %v1055_v35, %v4601_v7  ;;  %v5797_v46 = vld [vmem:[#allocation73_spill] sm:$0xff]  ;;  %vm2186_vm14 = vmor %vm2184_vm7, %vm2185_vm11  ;;  %v5799_v5 = vld [vmem:[#allocation18_spill] sm:$0xff] }
 0x1d9   :  { %v2181_v61 = vsub.f32 1.0, %v2180_v2  ;;  %v1691_v62 = vadd.f32 %v5789_v60, %v1621_v49  ;;  %v1070_v50 = vsel %vm4711_vm3, %v1069_v51, %v1065_v53  ;;  %v2167_v52 = vmul.f32 %v2726_v12, %v2166_v56  ;;  %v5801_v56 = vld [vmem:[#allocation20_spill] sm:$0xff]  ;;  %v5803_v20 = vld [vmem:[#allocation17_spill] sm:$0xff] }
 0x1da   :  { %v4760_v29 = vadd.f32 %v1690_v17, %v4746_v55  ;;  %v4764_v28 = vadd.f32 %v5791_v27, %v5790_v41  ;;  %v2730_v43 = vpop.eup %2729  ;;  %v1327_v8 = vmul.f32 %v1070_v50, %v4617_v22  ;;  %v4772_v4 = vadd.f32 %v5793_v34, %v5792_v39  ;;  %v5804_v53 = vld [vmem:[#allocation56_spill] sm:$0xff]  ;;  %v5807_v60 = vld [vmem:[#allocation9_spill] sm:$0xff]  ;;  %v5809_v27 = vld [vmem:[#allocation95_spill] sm:$0xff] }
 0x1db   :  { %v2182_v16 = vmul.f32 %v2728_v31, %v2181_v61  ;;  %v4768_v7 = vadd.f32 %v1691_v62, %v4746_v55  ;;  %v2168_v37 = vadd.f32 %v2726_v12, %v2167_v52  ;;  %v4774_v51 = vadd.f32 1.0, %v2730_v43  ;;  %v5806_v61 = vld [vmem:[#allocation8_spill] sm:$0xff]  ;;  %v5808_v41 = vld [vmem:[#allocation57_spill] sm:$0xff] }
 0x1dc   :  { %v2551_v58 = vmul.f32 -1.442695, %v4760_v29  ;;  %v4779_v23 = vadd.f32 %v5795_v42, %v5794_v40  ;;  %v1365_v14 = vadd.f32 %v1327_v8, %v1326_v33  ;;  %v2176_v22 = vor.u32 1.1754944e-38, %v2175_v36  ;;  %v5805_v33 = vld [vmem:[#allocation5_spill] sm:$0xff]  ;;  %v5810_v39 = vld [vmem:[#allocation60_spill] sm:$0xff] }
 0x1dd   :  { %v2183_v11 = vadd.f32 %v2728_v31, %v2182_v16  ;;  %v4786_v0 = vadd.f32 %v5797_v46, %v5796_v48  ;;  %v2172_v6 = vsel %vm2171_vm13, %v2726_v12, %v2168_v37  ;;  %v2191_v32 = vor.u32 1.1754944e-38, %v2190_v57  ;;  %v5800_v57 = vld [vmem:[#allocation19_spill] sm:$0xff] }
 0x1de   :  { %v2732_v24 = vpop.eup %2731  ;;  %2733 = vrcp.f32 %v4774_v51  ;;  %v2552_v47 = vmul.f32 -1.442695, %v4768_v7  ;;  %1366 = vadd.xlane.f32.xlu2 %v1365_v14  ;;  %v2177_v9 = vsel %vm4738_vm10, %v2176_v22, %v2172_v6  ;;  %vm2189_vm15 = vcmp.eq.f32.partialorder %v2188_v45, 8.507059e+37  ;;  %v5813_v6 = vld [vmem:[#allocation94_spill] sm:$0xff] }
 0x1df   :  { %v2187_v36 = vsel %vm2186_vm14, %v2728_v31, %v2183_v11  ;;  %v4795_v49 = vadd.f32 1.0, %v2732_v24  ;;  %v4799_v12 = vmul.f32 %v5799_v5, %v5798_v25  ;;  %v2364_v18 = vmul.f32 %v2177_v9, %v4643_v1  ;;  %v5802_v31 = vld [vmem:[#allocation7_spill] sm:$0xff]  ;;  %v5812_v11 = vld [vmem:[#allocation80_spill] sm:$0xff] }
 0x1e0   :  { %v2192_v2 = vsel %vm2189_vm15, %v2191_v32, %v2187_v36  ;;  %2735 = vpow2.f32 %v2551_v58  ;;  %v4804_v35 = vmul.f32 %v5800_v57, %v5798_v25  ;;  %v4808_v30 = vmul.f32 %v5801_v56, %v5798_v25  ;;  %v5811_v58 = vld [vmem:[#allocation79_spill] sm:$0xff] }
 0x1e1   :  { %v2365_v45 = vmul.f32 %v2192_v2, %v4649_v59  ;;  %2737 = vrcp.f32 %v4795_v49  ;;  %v4814_v17 = vmul.f32 %v5803_v20, %v5802_v31  ;;  %v550_v1 = vmul.f32 %v5805_v33, %v5804_v53 }
 0x1e2   :  { %2739 = vpow2.f32 %v2552_v47  ;;  %v444_v62 = vadd.f32 %v5807_v60, %v5806_v61  ;;  %v551_v50 = vmul.f32 %v5727_v10, %v5804_v53  ;;  %v4824_v52 = vmul.f32 %v3525_v44, %v5804_v53 }
 0x1e3   :  { %v2406_v59 = vadd.f32 %v2365_v45, %v2364_v18  ;;  %v445_v43 = vadd.f32 %v5809_v27, %v5808_v41  ;;  %v4830_v16 = vmul.f32 %v3527_v63, %v5804_v53  ;;  %v4834_v34 = vmul.f32 %v5805_v33, %v5810_v39 }
 0x1e4   :  { %v2734_v8 = vpop.eup %2733  ;;  %v4838_v37 = vmul.f32 %v5727_v10, %v5810_v39  ;;  %v578_v40 = vadd.f32 %v5811_v58, %v444_v62  ;;  %v4843_v42 = vmul.f32 %v3525_v44, %v5810_v39  ;;  %v4847_v14 = vmul.f32 %v5805_v33, %v5749_v15 }
 0x1e5   :  { %2407 = vadd.xlane.f32.xlu1 %v2406_v59  ;;  %v2105_v22 = vmul.f32 %v2734_v8, %v4774_v51  ;;  %v579_v48 = vadd.f32 %v5812_v11, %v445_v43  ;;  %v4853_v24 = vmul.f32 %v5727_v10, %v5749_v15  ;;  %v4857_v32 = vmul.f32 %v5805_v33, %v5813_v6  ;;  %v4886_v43 = vpop.permute.xlu1 %649 }
 0x1e6   :  { %v2736_v46 = vpop.eup %2735  ;;  %v4861_v47 = vmul.f32 %v3525_v44, %v5813_v6  ;;  %v4864_v9 = vadd.f32 %v4746_v55, %v578_v40  ;;  %v2113_v2 = vand.u32 2147483647, %v4774_v51  ;;  %v2115_v18 = vand.u32 2147483648, %v4774_v51 }
 0x1e7   :  { %v2738_v36 = vpop.eup %2737  ;;  %v2106_v25 = vsub.f32 1.0, %v2105_v22  ;;  %v4868_v45 = vadd.f32 1.0, %v2736_v46  ;;  %vm2110_vm0 = vweird.f32 %v2734_v8  ;;  %v2128_v53 = vand.u32 2147483647, %v4795_v49 }
 0x1e8   :  { %v2740_v15 = vpop.eup %2739  ;;  %v2120_v20 = vmul.f32 %v2738_v36, %v4795_v49  ;;  %v2518_v44 = vmul.f32 -1.442695, %v4864_v9  ;;  %v4877_v60 = vadd.f32 %v4746_v55, %v579_v48  ;;  %v4881_v62 = vmul.f32 %v3527_v63, %v5813_v6 }
 0x1e9   :  { %v2107_v33 = vmul.f32 %v2734_v8, %v2106_v25  ;;  %v4873_v61 = vadd.f32 1.0, %v2740_v15  ;;  %2741 = vrcp.f32 %v4868_v45  ;;  %v2130_v41 = vand.u32 2147483648, %v4795_v49 }
 0x1ea   :  { %v2121_v59 = vsub.f32 1.0, %v2120_v20  ;;  %2743 = vpow2.f32 %v2518_v44  ;;  %vm2109_vm1 = vweird.f32 %v4774_v51  ;;  %vm2114_vm2 = vcmp.eq.f32.partialorder %v2113_v2, 8.507059e+37 }
 0x1eb   :  { %v2108_v27 = vadd.f32 %v2734_v8, %v2107_v33  ;;  %2745 = vrcp.f32 %v4873_v61  ;;  %vm2111_vm3 = vmor %vm2109_vm1, %vm2110_vm0  ;;  %v2116_v55 = vor.u32 1.1754944e-38, %v2115_v18  ;;  %vm2124_vm4 = vweird.f32 %v4795_v49 }
 0x1ec   :  { %v2122_v58 = vmul.f32 %v2738_v36, %v2121_v59  ;;  %vm2125_vm5 = vweird.f32 %v2738_v36  ;;  %vm4890_vm6 = vcmp.eq.f32.partialorder %v2128_v53, 8.507059e+37  ;;  %v2519_v11 = vmul.f32 -1.442695, %v4877_v60 }
 0x1ed   :  { %v2112_v40 = vsel %vm2111_vm3, %v2734_v8, %v2108_v27  ;;  %v582_v51 = vadd.f32 %v550_v1, %v4693_v13  ;;  %v2131_v25 = vor.u32 1.1754944e-38, %v2130_v41  ;;  %v583_v2 = vadd.f32 %v551_v50, %v4697_v19  ;;  %vm2126_vm7 = vmor %vm2124_vm4, %vm2125_vm5 }
 0x1ee   :  { %v2117_v48 = vsel %vm2114_vm2, %v2116_v55, %v2112_v40  ;;  %v2123_v46 = vadd.f32 %v2738_v36, %v2122_v58  ;;  %vm2139_vm8 = vweird.f32 %v4868_v45  ;;  %v2143_v49 = vand.u32 2147483647, %v4868_v45 }
 0x1ef   :  { %v2742_v15 = vpop.eup %2741  ;;  %2747 = vpow2.f32 %v2519_v11  ;;  %v4900_v8 = vadd.f32 %v4886_v43, %v582_v51  ;;  %v2360_v53 = vmul.f32 %v2117_v48, %v4702_v3  ;;  %v2145_v1 = vand.u32 2147483648, %v4868_v45  ;;  %v5818_v48 = vld [vmem:[#allocation41_spill] sm:$0xff] }
 0x1f0   :  { %v2744_v18 = vpop.eup %2743  ;;  %v2127_v20 = vsel %vm2126_vm7, %v2738_v36, %v2123_v46  ;;  %v2135_v13 = vmul.f32 %v2742_v15, %v4868_v45  ;;  %v4910_v33 = vadd.f32 %v4886_v43, %v583_v2  ;;  %vm2154_vm9 = vweird.f32 %v4873_v61 }
 0x1f1   :  { %v2746_v44 = vpop.eup %2745  ;;  %v2132_v19 = vsel %vm4890_vm6, %v2131_v25, %v2127_v20  ;;  %v4907_v50 = vadd.f32 1.0, %v2744_v18  ;;  %v2522_v59 = vmul.f32 -1.442695, %v4900_v8  ;;  %vm2140_vm10 = vweird.f32 %v2742_v15  ;;  %v5819_v18 = vld [vmem:[#allocation42_spill] sm:$0xff] }
 0x1f2   :  { %v2361_v41 = vmul.f32 %v2132_v19, %v4718_v26  ;;  %v2136_v36 = vsub.f32 1.0, %v2135_v13  ;;  %v2150_v3 = vmul.f32 %v2746_v44, %v4873_v61  ;;  %vm4916_vm11 = vcmp.eq.f32.partialorder %v2143_v49, 8.507059e+37  ;;  %vm2141_vm13 = vmor %vm2139_vm8, %vm2140_vm10 }
 0x1f3   :  { %v2158_v55 = vand.u32 2147483647, %v4873_v61  ;;  %2749 = vrcp.f32 %v4907_v50  ;;  %vm2155_vm12 = vweird.f32 %v2746_v44  ;;  %v2160_v26 = vand.u32 2147483648, %v4873_v61 }
 0x1f4   :  { %v2400_v58 = vadd.f32 %v2361_v41, %v2360_v53  ;;  %v2137_v40 = vmul.f32 %v2742_v15, %v2136_v36  ;;  %v2151_v22 = vsub.f32 1.0, %v2150_v3  ;;  %2751 = vpow2.f32 %v2522_v59  ;;  %vm2156_vm14 = vmor %vm2154_vm9, %vm2155_vm12 }
 0x1f5   :  { %v2748_v11 = vpop.eup %2747  ;;  %v2523_v51 = vmul.f32 -1.442695, %v4910_v33  ;;  %v580_v46 = vadd.f32 %v4847_v14, %v5818_v48  ;;  %v581_v20 = vadd.f32 %v4853_v24, %v5819_v18  ;;  %v2146_v53 = vor.u32 1.1754944e-38, %v2145_v1 }
 0x1f6   :  { %2401 = vadd.xlane.f32.xlu0 %v2400_v58  ;;  %v2138_v25 = vadd.f32 %v2742_v15, %v2137_v40  ;;  %v2152_v2 = vmul.f32 %v2746_v44, %v2151_v22  ;;  %v4926_v49 = vadd.f32 1.0, %v2748_v11  ;;  %v4935_v13 = vadd.f32 %v4824_v52, %v4726_v38 }
 0x1f7   :  { %2753 = vpow2.f32 %v2523_v51  ;;  %v4939_v14 = vadd.f32 %v4830_v16, %v4730_v54  ;;  %v4943_v24 = vadd.f32 %v4633_v21, %v580_v46  ;;  %vm2159_vm15 = vcmp.eq.f32.partialorder %v2158_v55, 8.507059e+37 }
 0x1f8   :  { %v2142_v19 = vsel %vm2141_vm13, %v2742_v15, %v2138_v25  ;;  %v2153_v59 = vadd.f32 %v2746_v44, %v2152_v2  ;;  %2755 = vrcp.f32 %v4926_v49  ;;  %v2161_v38 = vor.u32 1.1754944e-38, %v2160_v26 }
 0x1f9   :  { %v2750_v41 = vpop.eup %2749  ;;  %v2147_v45 = vsel %vm4916_vm11, %v2146_v53, %v2142_v19  ;;  %v4951_v54 = vadd.f32 %v4633_v21, %v581_v20  ;;  %vm1107_vm0 = vweird.f32 %v4907_v50  ;;  %v1111_v3 = vand.u32 2147483647, %v4907_v50  ;;  %v4980_v53 = vpop.permute.xlu0 %659 }
 0x1fa   :  { %v2752_v52 = vpop.eup %2751  ;;  %v2157_v16 = vsel %vm2156_vm14, %v2746_v44, %v2153_v59  ;;  %v2362_v15 = vmul.f32 %v2147_v45, %v4760_v29  ;;  %v1103_v1 = vmul.f32 %v2750_v41, %v4907_v50  ;;  %v1113_v27 = vand.u32 2147483648, %v4907_v50  ;;  %v5824_v45 = vld [vmem:[#allocation47_spill] sm:$0xff] }
 0x1fb   :  { %v2162_v36 = vsel %vm2159_vm15, %v2161_v38, %v2157_v16  ;;  %v4958_v61 = vadd.f32 1.0, %v2752_v52  ;;  %v1126_v21 = vand.u32 2147483647, %v4926_v49  ;;  %v2520_v44 = vmul.f32 -1.442695, %v4943_v24  ;;  %v5825_v16 = vld [vmem:[#allocation48_spill] sm:$0xff] }
 0x1fc   :  { %v2363_v55 = vmul.f32 %v2162_v36, %v4768_v7  ;;  %v1104_v58 = vsub.f32 1.0, %v1103_v1  ;;  %vm1108_vm1 = vweird.f32 %v2750_v41  ;;  %v1128_v29 = vand.u32 2147483648, %v4926_v49  ;;  %v5826_v1 = vld [vmem:[#allocation62_spill] sm:$0xff] }
 0x1fd   :  { %v2754_v40 = vpop.eup %2753  ;;  %2757 = vrcp.f32 %v4958_v61  ;;  %v2521_v22 = vmul.f32 -1.442695, %v4951_v54  ;;  %vm4968_vm2 = vcmp.eq.f32.partialorder %v1111_v3, 8.507059e+37  ;;  %v1114_v46 = vor.u32 1.1754944e-38, %v1113_v27  ;;  %vm1109_vm5 = vmor %vm1107_vm0, %vm1108_vm1 }
 0x1fe   :  { %v2756_v11 = vpop.eup %2755  ;;  %v2403_v26 = vadd.f32 %v2363_v55, %v2362_v15  ;;  %v1105_v51 = vmul.f32 %v2750_v41, %v1104_v58  ;;  %v4966_v48 = vadd.f32 1.0, %v2754_v40  ;;  %2759 = vpow2.f32 %v2520_v44 }
 0x1ff   :  { %v1118_v25 = vmul.f32 %v2756_v11, %v4926_v49  ;;  %vm1122_vm3 = vweird.f32 %v4926_v49  ;;  %vm4974_vm4 = vcmp.eq.f32.partialorder %v1126_v21, 8.507059e+37  ;;  %v1171_v20 = vand.u32 2147483647, %v4958_v61 }
 0x200   :  { %2404 = vadd.xlane.f32.xlu2 %v2403_v26  ;;  %v1106_v2 = vadd.f32 %v2750_v41, %v1105_v51  ;;  %2761 = vrcp.f32 %v4966_v48  ;;  %v1129_v59 = vor.u32 1.1754944e-38, %v1128_v29  ;;  %v1698_v38 = vadd.f32 %v4861_v47, %v5824_v45 }
 0x201   :  { %v1119_v19 = vsub.f32 1.0, %v1118_v25  ;;  %2763 = vpow2.f32 %v2521_v22  ;;  %vm1167_vm6 = vweird.f32 %v4958_v61  ;;  %v1699_v15 = vadd.f32 %v4881_v62, %v5825_v16  ;;  %v5829_v22 = vld [vmem:[#allocation63_spill] sm:$0xff]  ;;  %v5830_v25 = vld [vmem:[#allocation86_spill] sm:$0xff] }
 0x202   :  { %v1110_v52 = vsel %vm1109_vm5, %v2750_v41, %v1106_v2  ;;  %v1626_v36 = vadd.f32 %v4804_v35, %v5826_v1  ;;  %vm1123_vm7 = vweird.f32 %v2756_v11  ;;  %v1173_v55 = vand.u32 2147483648, %v4958_v61 }
 0x203   :  { %v2758_v3 = vpop.eup %2757  ;;  %v1115_v50 = vsel %vm4968_vm2, %v1114_v46, %v1110_v52  ;;  %v1120_v27 = vmul.f32 %v2756_v11, %v1119_v19  ;;  %vm4996_vm8 = vcmp.eq.f32.partialorder %v1171_v20, 8.507059e+37  ;;  %v1186_v62 = vand.u32 2147483647, %v4966_v48  ;;  %vm1124_vm9 = vmor %vm1122_vm3, %vm1123_vm7  ;;  %v5831_v20 = vld [vmem:[#allocation10_spill] sm:$0xff] }
 0x204   :  { %v2760_v58 = vpop.eup %2759  ;;  %v1163_v47 = vmul.f32 %v2758_v3, %v4958_v61  ;;  %v1188_v21 = vand.u32 2147483648, %v4966_v48  ;;  %v5003_v35 = vadd.f32 %v1698_v38, %v4980_v53  ;;  %v5008_v29 = vadd.f32 %v1699_v15, %v4980_v53  ;;  %v5832_v19 = vld [vmem:[#allocation22_spill] sm:$0xff] }
 0x205   :  { %v1121_v44 = vadd.f32 %v2756_v11, %v1120_v27  ;;  %v5005_v40 = vadd.f32 1.0, %v2760_v58  ;;  %v1627_v26 = vadd.f32 %v4808_v30, %v5829_v22  ;;  %v1330_v7 = vmul.f32 %v1115_v50, %v4864_v9 }
 0x206   :  { %v2762_v51 = vpop.eup %2761  ;;  %v1164_v46 = vsub.f32 1.0, %v1163_v47  ;;  %v5016_v2 = vadd.f32 %v5830_v25, %v1626_v36  ;;  %v450_v45 = vadd.f32 %v5832_v19, %v5831_v20  ;;  %vm1168_vm10 = vweird.f32 %v2758_v3 }
 0x207   :  { %v2764_v38 = vpop.eup %2763  ;;  %v1125_v52 = vsel %vm1124_vm9, %v2756_v11, %v1121_v44  ;;  %v1178_v16 = vmul.f32 %v2762_v51, %v4966_v48  ;;  %2765 = vrcp.f32 %v5005_v40  ;;  %v2559_v9 = vmul.f32 -1.442695, %v5003_v35  ;;  %vm1169_vm13 = vmor %vm1167_vm6, %vm1168_vm10 }
 0x208   :  { %v1130_v30 = vsel %vm4974_vm4, %v1129_v59, %v1125_v52  ;;  %v1165_v49 = vmul.f32 %v2758_v3, %v1164_v46  ;;  %v5024_v15 = vadd.f32 1.0, %v2764_v38  ;;  %v1174_v36 = vor.u32 1.1754944e-38, %v1173_v55  ;;  %v5836_v52 = vld [vmem:[#allocation61_spill] sm:$0xff] }
 0x209   :  { %v1331_v1 = vmul.f32 %v1130_v30, %v4877_v60  ;;  %v1179_v50 = vsub.f32 1.0, %v1178_v16  ;;  %v2560_v27 = vmul.f32 -1.442695, %v5008_v29  ;;  %vm1182_vm11 = vweird.f32 %v4966_v48  ;;  %v5837_v30 = vld [vmem:[#allocation83_spill] sm:$0xff] }
 0x20a   :  { %v1166_v11 = vadd.f32 %v2758_v3, %v1165_v49  ;;  %vm5030_vm12 = vcmp.eq.f32.partialorder %v1186_v62, 8.507059e+37  ;;  %2767 = vrcp.f32 %v5024_v15  ;;  %vm1183_vm14 = vweird.f32 %v2762_v51 }
 0x20b   :  { %v1371_v18 = vadd.f32 %v1331_v1, %v1330_v7  ;;  %v1180_v59 = vmul.f32 %v2762_v51, %v1179_v50  ;;  %v1189_v60 = vor.u32 1.1754944e-38, %v1188_v21  ;;  %vm1137_vm15 = vweird.f32 %v5005_v40  ;;  %vm1184_vm0 = vmor %vm1182_vm11, %vm1183_vm14 }
 0x20c   :  { %v1170_v55 = vsel %vm1169_vm13, %v2758_v3, %v1166_v11  ;;  %v1141_v47 = vand.u32 2147483647, %v5005_v40  ;;  %2769 = vpow2.f32 %v2559_v9  ;;  %v5044_v61 = vadd.f32 %v4935_v13, %v4886_v43  ;;  %v5835_v13 = vld [vmem:[#allocation87_spill] sm:$0xff]  ;;  %v5067_v9 = vpop.permute.xlu2 %654 }
 0x20d   :  { %v2766_v62 = vpop.eup %2765  ;;  %1372 = vadd.xlane.f32.xlu0 %v1371_v18  ;;  %v1175_v44 = vsel %vm4996_vm8, %v1174_v36, %v1170_v55  ;;  %v1181_v22 = vadd.f32 %v2762_v51, %v1180_v59  ;;  %2771 = vpow2.f32 %v2560_v27  ;;  %v1143_v7 = vand.u32 2147483648, %v5005_v40  ;;  %v5838_v36 = vld [vmem:[#allocation85_spill] sm:$0xff] }
 0x20e   :  { %v1334_v3 = vmul.f32 %v1175_v44, %v4900_v8  ;;  %v1133_v21 = vmul.f32 %v2766_v62, %v5005_v40  ;;  %v1156_v46 = vand.u32 2147483647, %v5024_v15  ;;  %v5054_v41 = vadd.f32 %v4939_v14, %v4886_v43 }
 0x20f   :  { %v1185_v25 = vsel %vm1184_vm0, %v2762_v51, %v1181_v22  ;;  %v2555_v20 = vmul.f32 -1.442695, %v5044_v61  ;;  %v1697_v19 = vadd.f32 %v5835_v13, %v1627_v26  ;;  %v451_v16 = vadd.f32 %v4799_v12, %v5836_v52 }
 0x210   :  { %v2768_v38 = vpop.eup %2767  ;;  %v1190_v48 = vsel %vm5030_vm12, %v1189_v60, %v1185_v25  ;;  %v1134_v8 = vsub.f32 1.0, %v1133_v21  ;;  %v5063_v49 = vadd.f32 %v5837_v30, %v450_v45  ;;  %vm1138_vm1 = vweird.f32 %v2766_v62 }
 0x211   :  { %v1335_v51 = vmul.f32 %v1190_v48, %v4910_v33  ;;  %v1148_v43 = vmul.f32 %v2768_v38, %v5024_v15  ;;  %2773 = vpow2.f32 %v2555_v20  ;;  %v2556_v1 = vmul.f32 -1.442695, %v5054_v41  ;;  %vm1139_vm2 = vmor %vm1137_vm15, %vm1138_vm1 }
 0x212   :  { %v2770_v14 = vpop.eup %2769  ;;  %v1135_v26 = vmul.f32 %v2766_v62, %v1134_v8  ;;  %v5071_v50 = vadd.f32 %v5838_v36, %v451_v16  ;;  %v5075_v12 = vadd.f32 %v4834_v34, %v4764_v28  ;;  %v1144_v33 = vor.u32 1.1754944e-38, %v1143_v7 }
 0x213   :  { %v2772_v45 = vpop.eup %2771  ;;  %v1377_v27 = vadd.f32 %v1335_v51, %v1334_v3  ;;  %v1149_v11 = vsub.f32 1.0, %v1148_v43  ;;  %v5077_v58 = vadd.f32 1.0, %v2770_v14  ;;  %v1158_v59 = vand.u32 2147483648, %v5024_v15 }
 0x214   :  { %v1136_v18 = vadd.f32 %v2766_v62, %v1135_v26  ;;  %v5080_v60 = vadd.f32 1.0, %v2772_v45  ;;  %2775 = vpow2.f32 %v2556_v1  ;;  %vm1153_vm3 = vweird.f32 %v2768_v38 }
 0x215   :  { %1378 = vadd.xlane.f32.xlu1 %v1377_v27  ;;  %v1150_v55 = vmul.f32 %v2768_v38, %v1149_v11  ;;  %2777 = vrcp.f32 %v5077_v58  ;;  %v5088_v28 = vadd.f32 %v5016_v2, %v5067_v9  ;;  %v5092_v34 = vmul.f32 %v5727_v10, %v5813_v6 }
 0x216   :  { %v1140_v44 = vsel %vm1139_vm2, %v2766_v62, %v1136_v18  ;;  %vm1142_vm4 = vcmp.eq.f32.partialorder %v1141_v47, 8.507059e+37  ;;  %2779 = vrcp.f32 %v5080_v60  ;;  %vm1152_vm5 = vweird.f32 %v5024_v15  ;;  %v5843_v18 = vld [vmem:[#allocation45_spill] sm:$0xff] }
 0x217   :  { %v2774_v22 = vpop.eup %2773  ;;  %v1145_v3 = vsel %vm1142_vm4, %v1144_v33, %v1140_v44  ;;  %v1151_v40 = vadd.f32 %v2768_v38, %v1150_v55  ;;  %v5097_v21 = vadd.f32 %v1697_v19, %v5067_v9  ;;  %vm1154_vm6 = vmor %vm1152_vm5, %vm1153_vm3  ;;  %vm1157_vm7 = vcmp.eq.f32.partialorder %v1156_v46, 8.507059e+37 }
 0x218   :  { %v1159_v2 = vor.u32 1.1754944e-38, %v1158_v59  ;;  %v2263_v7 = vand.u32 2147483647, %v5077_v58  ;;  %v5100_v25 = vadd.f32 1.0, %v2774_v22  ;;  %v1332_v47 = vmul.f32 %v1145_v3, %v4943_v24 }
 0x219   :  { %v1155_v6 = vsel %vm1154_vm6, %v2768_v38, %v1151_v40  ;;  %v2265_v62 = vand.u32 2147483648, %v5077_v58  ;;  %v2557_v20 = vmul.f32 -1.442695, %v5088_v28  ;;  %vm2259_vm8 = vweird.f32 %v5077_v58 }
 0x21a   :  { %v2776_v13 = vpop.eup %2775  ;;  %v1160_v48 = vsel %vm1157_vm7, %v1159_v2, %v1155_v6  ;;  %v2278_v15 = vand.u32 2147483647, %v5080_v60  ;;  %v2280_v46 = vand.u32 2147483648, %v5080_v60  ;;  %2781 = vrcp.f32 %v5100_v25 }
 0x21b   :  { %v2778_v19 = vpop.eup %2777  ;;  %v1333_v8 = vmul.f32 %v1160_v48, %v4951_v54  ;;  %vm2274_vm9 = vweird.f32 %v5080_v60  ;;  %v5111_v24 = vadd.f32 1.0, %v2776_v13  ;;  %v2558_v38 = vmul.f32 -1.442695, %v5097_v21 }
 0x21c   :  { %v2780_v52 = vpop.eup %2779  ;;  %v2255_v16 = vmul.f32 %v2778_v19, %v5077_v58  ;;  %vm5115_vm10 = vcmp.eq.f32.partialorder %v2263_v7, 8.507059e+37  ;;  %2783 = vpow2.f32 %v2557_v20  ;;  %v5121_v51 = vadd.f32 %v4838_v37, %v4772_v4 }
 0x21d   :  { %v1374_v43 = vadd.f32 %v1333_v8, %v1332_v47  ;;  %v2266_v54 = vor.u32 1.1754944e-38, %v2265_v62  ;;  %v2270_v14 = vmul.f32 %v2780_v52, %v5080_v60  ;;  %v2203_v26 = vand.u32 2147483647, %v5100_v25  ;;  %v5846_v62 = vld [vmem:[#allocation46_spill] sm:$0xff] }
 0x21e   :  { %v2256_v1 = vsub.f32 1.0, %v2255_v16  ;;  %vm5125_vm11 = vcmp.eq.f32.partialorder %v2278_v15, 8.507059e+37  ;;  %v2281_v45 = vor.u32 1.1754944e-38, %v2280_v46  ;;  %2785 = vrcp.f32 %v5111_v24 }
 0x21f   :  { %1375 = vadd.xlane.f32.xlu2 %v1374_v43  ;;  %v2271_v27 = vsub.f32 1.0, %v2270_v14  ;;  %vm2199_vm12 = vweird.f32 %v5100_v25  ;;  %v2205_v4 = vand.u32 2147483648, %v5100_v25  ;;  %2787 = vpow2.f32 %v2558_v38  ;;  %v5181_v43 = vpop.permute.xlu1 %664 }
 0x220   :  { %v2782_v37 = vpop.eup %2781  ;;  %v2257_v33 = vmul.f32 %v2778_v19, %v2256_v1  ;;  %vm2260_vm13 = vweird.f32 %v2778_v19  ;;  %v5134_v11 = vadd.f32 %v5067_v9, %v5063_v49  ;;  %v586_v59 = vadd.f32 %v4857_v32, %v5843_v18 }
 0x221   :  { %v2272_v55 = vmul.f32 %v2780_v52, %v2271_v27  ;;  %vm2275_vm14 = vweird.f32 %v2780_v52  ;;  %v2195_v44 = vmul.f32 %v2782_v37, %v5100_v25  ;;  %vm5139_vm15 = vcmp.eq.f32.partialorder %v2203_v26, 8.507059e+37  ;;  %vm2261_vm0 = vmor %vm2259_vm8, %vm2260_vm13 }
 0x222   :  { %v2784_v3 = vpop.eup %2783  ;;  %v2258_v40 = vadd.f32 %v2778_v19, %v2257_v33  ;;  %v2218_v2 = vand.u32 2147483647, %v5111_v24  ;;  %v5146_v7 = vadd.f32 %v5067_v9, %v5071_v50  ;;  %v2524_v49 = vmul.f32 -1.442695, %v5134_v11  ;;  %vm2276_vm1 = vmor %vm2274_vm9, %vm2275_vm14 }
 0x223   :  { %v2273_v32 = vadd.f32 %v2780_v52, %v2272_v55  ;;  %v2196_v6 = vsub.f32 1.0, %v2195_v44  ;;  %v5151_v47 = vadd.f32 1.0, %v2784_v3  ;;  %v587_v20 = vadd.f32 %v5092_v34, %v5846_v62 }
 0x224   :  { %v2786_v13 = vpop.eup %2785  ;;  %v2262_v48 = vsel %vm2261_vm0, %v2778_v19, %v2258_v40  ;;  %vm2200_vm2 = vweird.f32 %v2782_v37  ;;  %2789 = vpow2.f32 %v2524_v49  ;;  %v5160_v9 = vadd.f32 %v4843_v42, %v4779_v23 }
 0x225   :  { %v2788_v50 = vpop.eup %2787  ;;  %v2267_v58 = vsel %vm5115_vm10, %v2266_v54, %v2262_v48  ;;  %v2277_v15 = vsel %vm2276_vm1, %v2780_v52, %v2273_v32  ;;  %v2197_v46 = vmul.f32 %v2782_v37, %v2196_v6  ;;  %v2210_v34 = vmul.f32 %v2786_v13, %v5111_v24  ;;  %vm2201_vm3 = vmor %vm2199_vm12, %vm2200_vm2 }
 0x226   :  { %v2282_v19 = vsel %vm5125_vm11, %v2281_v45, %v2277_v15  ;;  %v2370_v60 = vmul.f32 %v2267_v58, %v5003_v35  ;;  %v5168_v8 = vadd.f32 1.0, %v2788_v50  ;;  %v2525_v38 = vmul.f32 -1.442695, %v5146_v7 }
 0x227   :  { %v2371_v23 = vmul.f32 %v2282_v19, %v5008_v29  ;;  %v2198_v42 = vadd.f32 %v2782_v37, %v2197_v46  ;;  %v2211_v16 = vsub.f32 1.0, %v2210_v34  ;;  %2791 = vrcp.f32 %v5151_v47 }
 0x228   :  { %v2206_v52 = vor.u32 1.1754944e-38, %v2205_v4  ;;  %v2220_v30 = vand.u32 2147483648, %v5111_v24  ;;  %2793 = vrcp.f32 %v5168_v8  ;;  %v5179_v35 = vadd.f32 %v4980_v53, %v586_v59 }
 0x229   :  { %v2415_v54 = vadd.f32 %v2371_v23, %v2370_v60  ;;  %v2202_v29 = vsel %vm2201_vm3, %v2782_v37, %v2198_v42  ;;  %v2212_v14 = vmul.f32 %v2786_v13, %v2211_v16  ;;  %vm2215_vm4 = vweird.f32 %v2786_v13  ;;  %v5849_v42 = vld [vmem:[#allocation71_spill] sm:$0xff] }
 0x22a   :  { %v2790_v26 = vpop.eup %2789  ;;  %v1600_v1 = vmul.f32 %v5800_v57, %v5802_v31  ;;  %v1669_v25 = vmul.f32 %v3527_v63, %v5810_v39  ;;  %v2207_v36 = vsel %vm5139_vm15, %v2206_v52, %v2202_v29  ;;  %vm2214_vm5 = vweird.f32 %v5111_v24 }
 0x22b   :  { %2416 = vadd.xlane.f32.xlu1 %v2415_v54  ;;  %v2213_v45 = vadd.f32 %v2786_v13, %v2212_v14  ;;  %vm2219_vm6 = vcmp.eq.f32.partialorder %v2218_v2, 8.507059e+37  ;;  %v2233_v27 = vand.u32 2147483647, %v5151_v47  ;;  %2795 = vpow2.f32 %v2525_v38  ;;  %vm2216_vm7 = vmor %vm2214_vm5, %vm2215_vm4 }
 0x22c   :  { %v2221_v4 = vor.u32 1.1754944e-38, %v2220_v30  ;;  %vm2229_vm8 = vweird.f32 %v5151_v47  ;;  %v5192_v37 = vadd.f32 1.0, %v2790_v26  ;;  %v5196_v63 = vadd.f32 %v5181_v43, %v5075_v12 }
 0x22d   :  { %v2792_v57 = vpop.eup %2791  ;;  %v2217_v39 = vsel %vm2216_vm7, %v2786_v13, %v2213_v45  ;;  %v2366_v24 = vmul.f32 %v2207_v36, %v5044_v61  ;;  %v2235_v33 = vand.u32 2147483648, %v5151_v47  ;;  %v2526_v18 = vmul.f32 -1.442695, %v5179_v35 }
 0x22e   :  { %v2794_v59 = vpop.eup %2793  ;;  %v2222_v55 = vsel %vm2219_vm6, %v2221_v4, %v2217_v39  ;;  %v2225_v44 = vmul.f32 %v2792_v57, %v5151_v47  ;;  %2797 = vrcp.f32 %v5192_v37  ;;  %v5205_v22 = vadd.f32 %v5181_v43, %v5121_v51 }
 0x22f   :  { %v2367_v12 = vmul.f32 %v2222_v55, %v5054_v41  ;;  %vm5208_vm9 = vcmp.eq.f32.partialorder %v2233_v27, 8.507059e+37  ;;  %v2240_v61 = vmul.f32 %v2794_v59, %v5168_v8  ;;  %vm2244_vm10 = vweird.f32 %v5168_v8 }
 0x230   :  { %v2226_v40 = vsub.f32 1.0, %v2225_v44  ;;  %v2248_v2 = vand.u32 2147483647, %v5168_v8  ;;  %v2528_v49 = vmul.f32 -1.442695, %v5196_v63  ;;  %v5217_v32 = vadd.f32 %v4980_v53, %v587_v20 }
 0x231   :  { %v2796_v51 = vpop.eup %2795  ;;  %v2409_v6 = vadd.f32 %v2367_v12, %v2366_v24  ;;  %v2241_v62 = vsub.f32 1.0, %v2240_v61  ;;  %v2250_v41 = vand.u32 2147483648, %v5168_v8  ;;  %2799 = vpow2.f32 %v2526_v18 }
 0x232   :  { %v2227_v13 = vmul.f32 %v2792_v57, %v2226_v40  ;;  %vm2230_vm11 = vweird.f32 %v2792_v57  ;;  %v5220_v48 = vadd.f32 1.0, %v2796_v51  ;;  %v2529_v50 = vmul.f32 -1.442695, %v5205_v22 }
 0x233   :  { %2410 = vadd.xlane.f32.xlu0 %v2409_v6  ;;  %v2242_v58 = vmul.f32 %v2794_v59, %v2241_v62  ;;  %vm2245_vm12 = vweird.f32 %v2794_v59  ;;  %2801 = vpow2.f32 %v2528_v49  ;;  %v1701_v15 = vadd.f32 %v1669_v25, %v4786_v0  ;;  %vm2231_vm13 = vmor %vm2229_vm8, %vm2230_vm11 }
 0x234   :  { %v2798_v53 = vpop.eup %2797  ;;  %v2228_v20 = vadd.f32 %v2792_v57, %v2227_v13  ;;  %v2236_v46 = vor.u32 1.1754944e-38, %v2235_v33  ;;  %2803 = vrcp.f32 %v5220_v48  ;;  %v2527_v34 = vmul.f32 -1.442695, %v5217_v32  ;;  %vm2246_vm15 = vmor %vm2244_vm10, %vm2245_vm12 }
 0x235   :  { %v2243_v19 = vadd.f32 %v2794_v59, %v2242_v58  ;;  %vm2249_vm14 = vcmp.eq.f32.partialorder %v2248_v2, 8.507059e+37  ;;  %v2251_v60 = vor.u32 1.1754944e-38, %v2250_v41  ;;  %v1193_v38 = vmul.f32 %v2798_v53, %v5192_v37 }
 0x236   :  { %v2232_v23 = vsel %vm2231_vm13, %v2792_v57, %v2228_v20  ;;  %v1201_v0 = vand.u32 2147483647, %v5192_v37  ;;  %2805 = vpow2.f32 %v2529_v50  ;;  %v5233_v16 = vadd.f32 %v1600_v1, %v5849_v42 }
 0x237   :  { %v2800_v52 = vpop.eup %2799  ;;  %v2237_v47 = vsel %vm5208_vm9, %v2236_v46, %v2232_v23  ;;  %v2247_v30 = vsel %vm2246_vm15, %v2794_v59, %v2243_v19  ;;  %v1194_v54 = vsub.f32 1.0, %v1193_v38  ;;  %v1203_v29 = vand.u32 2147483648, %v5192_v37  ;;  %v5868_v23 = vld [vmem:[#allocation49_spill] sm:$0xff] }
 0x238   :  { %v2252_v14 = vsel %vm2249_vm14, %v2251_v60, %v2247_v30  ;;  %v2368_v26 = vmul.f32 %v2237_v47, %v5088_v28  ;;  %2807 = vpow2.f32 %v2527_v34  ;;  %v5239_v8 = vadd.f32 1.0, %v2800_v52 }
 0x239   :  { %v2802_v25 = vpop.eup %2801  ;;  %v5243_v36 = vmul.f32 %v5801_v56, %v5802_v31  ;;  %v2369_v1 = vmul.f32 %v2252_v14, %v5097_v21  ;;  %v1195_v45 = vmul.f32 %v2798_v53, %v1194_v54  ;;  %vm1198_vm0 = vweird.f32 %v2798_v53  ;;  %v5864_v21 = vld [vmem:[#allocation69_spill] sm:$0xff] }
 0x23a   :  { %v2804_v27 = vpop.eup %2803  ;;  %v1216_v4 = vand.u32 2147483647, %v5220_v48  ;;  %v1218_v57 = vand.u32 2147483648, %v5220_v48  ;;  %v5248_v39 = vadd.f32 1.0, %v2802_v25  ;;  %2809 = vrcp.f32 %v5239_v8 }
 0x23b   :  { %v2412_v28 = vadd.f32 %v2369_v1, %v2368_v26  ;;  %v1196_v24 = vadd.f32 %v2798_v53, %v1195_v45  ;;  %vm1197_vm1 = vweird.f32 %v5192_v37  ;;  %v1208_v56 = vmul.f32 %v2804_v27, %v5220_v48  ;;  %v5321_v1 = vpop.permute.xlu2 %669 }
 0x23c   :  { %v2806_v33 = vpop.eup %2805  ;;  %vm5253_vm2 = vmor %vm1197_vm1, %vm1198_vm0  ;;  %vm5257_vm3 = vcmp.eq.f32.partialorder %v1201_v0, 8.507059e+37  ;;  %v1204_v59 = vor.u32 1.1754944e-38, %v1203_v29  ;;  %vm1212_vm4 = vweird.f32 %v5220_v48  ;;  %2811 = vrcp.f32 %v5248_v39 }
 0x23d   :  { %2413 = vadd.xlane.f32.xlu2 %v2412_v28  ;;  %v1200_v37 = vsel %vm5253_vm2, %v2798_v53, %v1196_v24  ;;  %v1209_v55 = vsub.f32 1.0, %v1208_v56  ;;  %v5265_v44 = vadd.f32 1.0, %v2806_v33  ;;  %v5269_v12 = vadd.f32 %v5160_v9, %v5181_v43  ;;  %v5862_v28 = vld [vmem:[#allocation72_spill] sm:$0xff]  ;;  %v5863_v56 = vld [vmem:[#allocation90_spill] sm:$0xff] }
 0x23e   :  { %v2808_v3 = vpop.eup %2807  ;;  %vm5271_vm5 = vcmp.eq.f32.partialorder %v1216_v4, 8.507059e+37  ;;  %v1219_v40 = vor.u32 1.1754944e-38, %v1218_v57  ;;  %v1263_v2 = vand.u32 2147483648, %v5248_v39  ;;  %v5277_v49 = vadd.f32 %v1701_v15, %v5181_v43 }
 0x23f   :  { %v1210_v51 = vmul.f32 %v2804_v27, %v1209_v55  ;;  %vm1213_vm6 = vweird.f32 %v2804_v27  ;;  %v1261_v6 = vand.u32 2147483647, %v5248_v39  ;;  %2813 = vrcp.f32 %v5265_v44 }
 0x240   :  { %v5281_v62 = vpop.eup %2809  ;;  %v1205_v9 = vsel %vm5257_vm3, %v1204_v59, %v1200_v37  ;;  %v5285_v41 = vadd.f32 1.0, %v2808_v3  ;;  %vm1227_vm7 = vweird.f32 %v5239_v8  ;;  %v1231_v13 = vand.u32 2147483647, %v5239_v8  ;;  %vm1214_vm9 = vmor %vm1212_vm4, %vm1213_vm6  ;;  %v5867_v3 = vld [vmem:[#allocation91_spill] sm:$0xff] }
 0x241   :  { %v1233_v43 = vand.u32 2147483648, %v5239_v8  ;;  %v1211_v50 = vadd.f32 %v2804_v27, %v1210_v51  ;;  %vm1257_vm8 = vweird.f32 %v5248_v39  ;;  %v1223_v58 = vmul.f32 %v5281_v62, %v5239_v8 }
 0x242   :  { %v2561_v15 = vmul.f32 -1.442695, %v5269_v12  ;;  %v2812_v53 = vpop.eup %2811  ;;  %v1264_v20 = vor.u32 1.1754944e-38, %v1263_v2  ;;  %v1276_v46 = vand.u32 2147483647, %v5265_v44  ;;  %v1278_v34 = vand.u32 2147483648, %v5265_v44 }
 0x243   :  { %2815 = vrcp.f32 %v5285_v41  ;;  %v1215_v19 = vsel %vm1214_vm9, %v2804_v27, %v1211_v50  ;;  %v1336_v60 = vmul.f32 %v1205_v9, %v5134_v11  ;;  %v1253_v38 = vmul.f32 %v2812_v53, %v5248_v39 }
 0x244   :  { %vm5301_vm10 = vcmp.eq.f32.partialorder %v1261_v6, 8.507059e+37  ;;  %v1224_v0 = vsub.f32 1.0, %v1223_v58  ;;  %v1220_v48 = vsel %vm5271_vm5, %v1219_v40, %v1215_v19  ;;  %vm1272_vm11 = vweird.f32 %v5265_v44 }
 0x245   :  { %vm1228_vm12 = vweird.f32 %v5281_v62  ;;  %v1234_v42 = vor.u32 1.1754944e-38, %v1233_v43  ;;  %2817 = vpow2.f32 %v2561_v15  ;;  %v2814_v52 = vpop.eup %2813  ;;  %v1337_v47 = vmul.f32 %v1220_v48, %v5146_v7 }
 0x246   :  { %v1254_v11 = vsub.f32 1.0, %v1253_v38  ;;  %v1225_v30 = vmul.f32 %v5281_v62, %v1224_v0  ;;  %vm5311_vm13 = vcmp.eq.f32.partialorder %v1231_v13, 8.507059e+37  ;;  %v2562_v29 = vmul.f32 -1.442695, %v5277_v49  ;;  %vm5334_vm0 = vmor %vm1227_vm7, %vm1228_vm12 }
 0x247   :  { %vm1258_vm14 = vweird.f32 %v2812_v53  ;;  %v1268_v14 = vmul.f32 %v2814_v52, %v5265_v44  ;;  %vm5317_vm15 = vcmp.eq.f32.partialorder %v1276_v46, 8.507059e+37  ;;  %v1279_v25 = vor.u32 1.1754944e-38, %v1278_v34 }
 0x248   :  { %v1380_v7 = vadd.f32 %v1337_v47, %v1336_v60  ;;  %v1255_v45 = vmul.f32 %v2812_v53, %v1254_v11  ;;  %v1226_v27 = vadd.f32 %v5281_v62, %v1225_v30  ;;  %2819 = vpow2.f32 %v2562_v29  ;;  %vm1259_vm2 = vmor %vm1257_vm8, %vm1258_vm14  ;;  %v5869_v11 = vld [vmem:[#allocation70_spill] sm:$0xff] }
 0x249   :  { %v2816_v4 = vpop.eup %2815  ;;  %v1269_v57 = vsub.f32 1.0, %v1268_v14  ;;  %v1633_v24 = vadd.f32 %v5243_v36, %v5862_v28  ;;  %v1702_v33 = vadd.f32 %v5863_v56, %v5233_v16  ;;  %v456_v18 = vadd.f32 %v4814_v17, %v5864_v21 }
 0x24a   :  { %1381 = vadd.xlane.f32.xlu0 %v1380_v7  ;;  %v1256_v59 = vadd.f32 %v2812_v53, %v1255_v45  ;;  %v1238_v55 = vmul.f32 %v2816_v4, %v5285_v41  ;;  %vm1242_vm1 = vweird.f32 %v5285_v41  ;;  %v1248_v36 = vand.u32 2147483648, %v5285_v41 }
 0x24b   :  { %v2818_v16 = vpop.eup %2817  ;;  %v1270_v17 = vmul.f32 %v2814_v52, %v1269_v57  ;;  %vm1273_vm3 = vweird.f32 %v2814_v52  ;;  %v1703_v61 = vadd.f32 %v5867_v3, %v1633_v24  ;;  %v5346_v8 = vadd.f32 %v1702_v33, %v5321_v1 }
 0x24c   :  { %v1260_v40 = vsel %vm1259_vm2, %v2812_v53, %v1256_v59  ;;  %v1230_v2 = vsel %vm5334_vm0, %v5281_v62, %v1226_v27  ;;  %v1239_v51 = vsub.f32 1.0, %v1238_v55  ;;  %v5351_v6 = vadd.f32 1.0, %v2818_v16  ;;  %vm1274_vm4 = vmor %vm1272_vm11, %vm1273_vm3 }
 0x24d   :  { %v1265_v9 = vsel %vm5301_vm10, %v1264_v20, %v1260_v40  ;;  %v1271_v39 = vadd.f32 %v2814_v52, %v1270_v17  ;;  %v5356_v13 = vadd.f32 %v1703_v61, %v5321_v1  ;;  %v2563_v43 = vmul.f32 -1.442695, %v5346_v8 }
 0x24e   :  { %v2820_v50 = vpop.eup %2819  ;;  %v1240_v58 = vmul.f32 %v2816_v4, %v1239_v51  ;;  %vm1243_vm5 = vweird.f32 %v2816_v4  ;;  %v1246_v62 = vand.u32 2147483647, %v5285_v41  ;;  %2821 = vrcp.f32 %v5351_v6  ;;  %v5870_v41 = vld [vmem:[#allocation89_spill] sm:$0xff] }
 0x24f   :  { %v1275_v15 = vsel %vm1274_vm4, %v2814_v52, %v1271_v39  ;;  %v1340_v53 = vmul.f32 %v1265_v9, %v5196_v63  ;;  %v1235_v20 = vsel %vm5311_vm13, %v1234_v42, %v1230_v2  ;;  %v5366_v46 = vadd.f32 1.0, %v2820_v50  ;;  %vm1244_vm6 = vmor %vm1242_vm1, %vm1243_vm5 }
 0x250   :  { %v1280_v34 = vsel %vm5317_vm15, %v1279_v25, %v1275_v15  ;;  %v1241_v19 = vadd.f32 %v2816_v4, %v1240_v58  ;;  %2823 = vpow2.f32 %v2563_v43  ;;  %v2564_v44 = vmul.f32 -1.442695, %v5356_v13 }
 0x251   :  { %v425_v60 = vmul.f32 %v5799_v5, %v5802_v31  ;;  %v1341_v38 = vmul.f32 %v1280_v34, %v5205_v22  ;;  %v1249_v63 = vor.u32 1.1754944e-38, %v1248_v36  ;;  %2825 = vrcp.f32 %v5366_v46 }
 0x252   :  { %v559_v0 = vmul.f32 %v5727_v10, %v5868_v23  ;;  %v1245_v48 = vsel %vm1244_vm6, %v2816_v4, %v1241_v19  ;;  %vm1247_vm7 = vcmp.eq.f32.partialorder %v1246_v62, 8.507059e+37  ;;  %v1338_v42 = vmul.f32 %v1235_v20, %v5179_v35 }
 0x253   :  { %v1386_v52 = vadd.f32 %v1341_v38, %v1340_v53  ;;  %v1250_v47 = vsel %vm1247_vm7, %v1249_v63, %v1245_v48  ;;  %2827 = vpow2.f32 %v2564_v44  ;;  %v457_v5 = vadd.f32 %v425_v60, %v5869_v11 }
 0x254   :  { %v2822_v31 = vpop.eup %2821  ;;  %v1339_v22 = vmul.f32 %v1250_v47, %v5217_v32  ;;  %v590_v30 = vadd.f32 %v5870_v41, %v456_v18  ;;  %v2295_v7 = vand.u32 2147483648, %v5351_v6  ;;  %v2293_v24 = vand.u32 2147483647, %v5351_v6 }
 0x255   :  { %1387 = vadd.xlane.f32.xlu1 %v1386_v52  ;;  %v2285_v54 = vmul.f32 %v2822_v31, %v5351_v6  ;;  %v591_v29 = vadd.f32 %v559_v0, %v457_v5  ;;  %vm2290_vm8 = vweird.f32 %v2822_v31  ;;  %vm2289_vm9 = vweird.f32 %v5351_v6 }
 0x256   :  { %v2824_v14 = vpop.eup %2823  ;;  %v1383_v10 = vadd.f32 %v1339_v22, %v1338_v42  ;;  %v5385_v26 = vadd.f32 %v5321_v1, %v590_v30  ;;  %v2310_v18 = vand.u32 2147483648, %v5366_v46  ;;  %vm2291_vm10 = vmor %vm2289_vm9, %vm2290_vm8  ;;  %v2308_v55 = vand.u32 2147483647, %v5366_v46 }
 0x257   :  { %v2826_v35 = vpop.eup %2825  ;;  %v2286_v25 = vsub.f32 1.0, %v2285_v54  ;;  %v5388_v45 = vadd.f32 1.0, %v2824_v14  ;;  %v5391_v27 = vadd.f32 %v5321_v1, %v591_v29  ;;  %v2296_v1 = vor.u32 1.1754944e-38, %v2295_v7 }
 0x258   :  { %1384 = vadd.xlane.f32.xlu2 %v1383_v10  ;;  %v2300_v32 = vmul.f32 %v2826_v35, %v5366_v46  ;;  %v2530_v4 = vmul.f32 -1.442695, %v5385_v26  ;;  %vm2305_vm11 = vweird.f32 %v2826_v35  ;;  %vm2294_vm12 = vcmp.eq.f32.partialorder %v2293_v24, 8.507059e+37 }
 0x259   :  { %v2828_v57 = vpop.eup %2827  ;;  %v2287_v28 = vmul.f32 %v2822_v31, %v2286_v25  ;;  %2829 = vrcp.f32 %v5388_v45  ;;  %v2531_v59 = vmul.f32 -1.442695, %v5391_v27  ;;  %vm2304_vm13 = vweird.f32 %v5366_v46 }
 0x25a   :  { %v2301_v56 = vsub.f32 1.0, %v2300_v32  ;;  %v1863_v33 = vadd.f32 1.0, %v2828_v57  ;;  %2831 = vpow2.f32 %v2530_v4  ;;  %vm2306_vm14 = vmor %vm2304_vm13, %vm2305_vm11  ;;  %v2311_v61 = vor.u32 1.1754944e-38, %v2310_v18 }
 0x25b   :  { %v2288_v21 = vadd.f32 %v2822_v31, %v2287_v28  ;;  %vm2309_vm15 = vcmp.eq.f32.partialorder %v2308_v55, 8.507059e+37  ;;  %v2323_v15 = vand.u32 2147483647, %v5388_v45  ;;  %v2325_v53 = vand.u32 2147483648, %v5388_v45 }
 0x25c   :  { %v2302_v37 = vmul.f32 %v2826_v35, %v2301_v56  ;;  %2833 = vrcp.f32 %v1863_v33  ;;  %vm2319_vm1 = vweird.f32 %v5388_v45  ;;  %v2340_v60 = vand.u32 2147483648, %v1863_v33 }
 0x25d   :  { %v2292_v36 = vsel %vm2291_vm10, %v2822_v31, %v2288_v21  ;;  %2835 = vpow2.f32 %v2531_v59  ;;  %v2338_v63 = vand.u32 2147483647, %v1863_v33  ;;  %vm2324_vm4 = vcmp.eq.f32.partialorder %v2323_v15, 8.507059e+37  ;;  %v2378_v59 = vpop.xlane.xlu2 %2377 }
 0x25e   :  { %v2297_v16 = vsel %vm2294_vm12, %v2296_v1, %v2292_v36  ;;  %v2303_v17 = vadd.f32 %v2826_v35, %v2302_v37  ;;  %vm2334_vm5 = vweird.f32 %v1863_v33  ;;  %v2341_v52 = vor.u32 1.1754944e-38, %v2340_v60  ;;  %v1346_v37 = vpop.xlane.xlu0 %1345  ;;  %v53_v60 = vld [vmem:[%s5515_s3] sm:$0xff] }
 0x25f   :  { %v2830_v3 = vpop.eup %2829  ;;  %v2372_v51 = vmul.f32 %v2297_v16, %v5269_v12  ;;  %vm2339_vm7 = vcmp.eq.f32.partialorder %v2338_v63, 8.507059e+37  ;;  %v1349_v16 = vpop.xlane.xlu1 %1348 }
 0x260   :  { %v2832_v40 = vpop.eup %2831  ;;  %v2307_v2 = vsel %vm2306_vm14, %v2826_v35, %v2303_v17  ;;  %v2315_v6 = vmul.f32 %v2830_v3, %v5388_v45  ;;  %vm2320_vm0 = vweird.f32 %v2830_v3 }
 0x261   :  { %v2312_v9 = vsel %vm2309_vm15, %v2311_v61, %v2307_v2  ;;  %v830_v39 = vadd.f32 1.0, %v2832_v40  ;;  %vm2321_vm2 = vmor %vm2319_vm1, %vm2320_vm0  ;;  %vm2481_vm1 = vcmask 1040384  }
 0x262   :  { %v2834_v43 = vpop.eup %2833  ;;  %v2373_v50 = vmul.f32 %v2312_v9, %v5277_v49  ;;  %v2316_v58 = vsub.f32 1.0, %v2315_v6  ;;  %v2326_v49 = vor.u32 1.1754944e-38, %v2325_v53 }
 0x263   :  { %v2836_v62 = vpop.eup %2835  ;;  %v2330_v20 = vmul.f32 %v2834_v43, %v1863_v33  ;;  %2837 = vrcp.f32 %v830_v39  ;;  %vm2335_vm3 = vweird.f32 %v2834_v43  ;;  %v1293_v54 = vand.u32 2147483648, %v830_v39 }
 0x264   :  { %v2418_v46 = vadd.f32 %v2373_v50, %v2372_v51  ;;  %v2317_v34 = vmul.f32 %v2830_v3, %v2316_v58  ;;  %v831_v19 = vadd.f32 1.0, %v2836_v62  ;;  %vm2336_vm6 = vmor %vm2334_vm5, %vm2335_vm3  ;;  %v1291_v10 = vand.u32 2147483647, %v830_v39 }
 0x265   :  { %v2331_v12 = vsub.f32 1.0, %v2330_v20  ;;  %vm1287_vm9 = vweird.f32 %v830_v39  ;;  %v1294_v32 = vor.u32 1.1754944e-38, %v1293_v54  ;;  %v2381_v55 = vpop.xlane.xlu2 %2380  ;;  %v2873_v51 = vmov 256.0  }
 0x266   :  { %2419 = vadd.xlane.f32.xlu0 %v2418_v46  ;;  %v2318_v44 = vadd.f32 %v2830_v3, %v2317_v34  ;;  %2839 = vrcp.f32 %v831_v19  ;;  %v1308_v45 = vand.u32 2147483648, %v831_v19  ;;  %vm1292_vm12 = vcmp.eq.f32.partialorder %v1291_v10, 8.507059e+37  ;;  %v2384_v36 = vpop.xlane.xlu0 %2383 }
 0x267   :  { %v2332_v38 = vmul.f32 %v2834_v43, %v2331_v12  ;;  %vm1302_vm13 = vweird.f32 %v831_v19  ;;  %v1352_v61 = vpop.xlane.xlu1 %1351  ;;  %2841 = vrcp.f32 %v2873_v51 }
 0x268   :  { %v2322_v23 = vsel %vm2321_vm2, %v2830_v3, %v2318_v44  ;;  %v1309_v24 = vor.u32 1.1754944e-38, %v1308_v45  ;;  %v54_v44 = vld [vmem:[%s5515_s3 + $0x8] sm:$0xff] }
 0x269   :  { %v2838_v0 = vpop.eup %2837  ;;  %v2327_v48 = vsel %vm2324_vm4, %v2326_v49, %v2322_v23  ;;  %v2333_v42 = vadd.f32 %v2834_v43, %v2332_v38 }
 0x26a   :  { %v1283_v47 = vmul.f32 %v2838_v0, %v830_v39  ;;  %v2374_v5 = vmul.f32 %v2327_v48, %v5346_v8  ;;  %vm1288_vm8 = vweird.f32 %v2838_v0  ;;  %v1306_v8 = vand.u32 2147483647, %v831_v19 }
 0x26b   :  { %v2337_v11 = vsel %vm2336_vm6, %v2834_v43, %v2333_v42  ;;  %vm1289_vm10 = vmor %vm1287_vm9, %vm1288_vm8  ;;  %v56_v42 = vld [vmem:[%s5515_s3 + $0x18] sm:$0xff] }
 0x26c   :  { %v2840_v31 = vpop.eup %2839  ;;  %v2342_v22 = vsel %vm2339_vm7, %v2341_v52, %v2337_v11  ;;  %v1284_v41 = vsub.f32 1.0, %v1283_v47  ;;  %vm1307_vm15 = vcmp.eq.f32.partialorder %v1306_v8, 8.507059e+37  ;;  %v55_v47 = vld [vmem:[%s5515_s3 + $0x10] sm:$0xff] }
 0x26d   :  { %v2375_v30 = vmul.f32 %v2342_v22, %v5356_v13  ;;  %v1298_v29 = vmul.f32 %v2840_v31, %v831_v19  ;;  %vm1303_vm11 = vweird.f32 %v2840_v31  ;;  %v2387_v17 = vpop.xlane.xlu2 %2386  ;;  %v2842_v9 = vpop.eup %2841 }
 0x26e   :  { %v1285_v14 = vmul.f32 %v2838_v0, %v1284_v41  ;;  %vm1304_vm14 = vmor %vm1302_vm13, %vm1303_vm11  ;;  %v1355_v3 = vpop.xlane.xlu0 %1354  ;;  %v1393_v39 = vmul.f32 256.0, %v2842_v9  ;;  %vm1397_vm0 = vweird.f32 %v2842_v9 }
 0x26f   :  { %v2421_v35 = vadd.f32 %v2375_v30, %v2374_v5  ;;  %v1299_v25 = vsub.f32 1.0, %v1298_v29  ;;  %v2390_v6 = vpop.xlane.xlu1 %2389 }
 0x270   :  { %v1286_v7 = vadd.f32 %v2838_v0, %v1285_v14  ;;  %v1394_v50 = vsub.f32 1.0, %v1393_v39  ;;  %v57_v14 = vld [vmem:[%s5515_s3 + $0x20] sm:$0xff]  ;;  %v62_v39 = vld [vmem:[%s5515_s3 + $0x48] sm:$0xff] }
 0x271   :  { %2422 = vadd.xlane.f32.xlu2 %v2421_v35  ;;  %v1300_v4 = vmul.f32 %v2840_v31, %v1299_v25 }
 0x272   :  { %v1290_v57 = vsel %vm1289_vm10, %v2838_v0, %v1286_v7  ;;  %v1395_v58 = vmul.f32 %v2842_v9, %v1394_v50 }
 0x273   :  { %v1295_v28 = vsel %vm1292_vm12, %v1294_v32, %v1290_v57  ;;  %v1301_v13 = vadd.f32 %v2840_v31, %v1300_v4  ;;  %v58_v57 = vld [vmem:[%s5515_s3 + $0x28] sm:$0xff] }
 0x274   :  { %v1342_v33 = vmul.f32 %v1295_v28, %v5385_v26  ;;  %v1396_v20 = vadd.f32 %v2842_v9, %v1395_v58  ;;  %v59_v28 = vld [vmem:[%s5515_s3 + $0x30] sm:$0xff] }
 0x275   :  { %v1305_v56 = vsel %vm1304_vm14, %v2840_v31, %v1301_v13  ;;  %v1358_v40 = vpop.xlane.xlu2 %1357 }
 0x276   :  { %v1310_v21 = vsel %vm1307_vm15, %v1309_v24, %v1305_v56  ;;  %v2393_v2 = vpop.xlane.xlu0 %2392  ;;  %v5414_v46 = vsel %vm1397_vm0, %v2842_v9, %v1396_v20 }
 0x277   :  { %v1343_v1 = vmul.f32 %v1310_v21, %v5391_v27  ;;  %v1361_v43 = vpop.xlane.xlu1 %1360  ;;  %v2425_v34 = vmul.f32 %v2381_v55, %v5414_v46  ;;  %v2424_v12 = vmul.f32 %v2378_v59, %v5414_v46  ;;  %v2426_v0 = vmul.f32 %v2384_v36, %v5414_v46 }
 0x278   :  { %v2427_v48 = vmul.f32 %v2387_v17, %v5414_v46  ;;  %v1399_v11 = vmul.f32 %v5414_v46, %v1346_v37  ;;  %v1400_v22 = vmul.f32 %v5414_v46, %v1349_v16  ;;  %v2428_v30 = vmul.f32 %v2390_v6, %v5414_v46 }
 0x279   :  { %v1389_v18 = vadd.f32 %v1343_v1, %v1342_v33  ;;  %v2441_v63 = vmul.f32 %v2425_v34, %v54_v44  ;;  %v2440_v23 = vmul.f32 %v2424_v12, %v53_v60  ;;  %v2442_v5 = vmul.f32 %v2426_v0, %v55_v47 }
 0x27a   :  { %v2443_v31 = vmul.f32 %v2427_v48, %v56_v42  ;;  %v2429_v29 = vmul.f32 %v2393_v2, %v5414_v46  ;;  %v1415_v10 = vmul.f32 %v1399_v11, %v53_v60  ;;  %v1416_v32 = vmul.f32 %v1400_v22, %v54_v44  ;;  %v63_v48 = vld [vmem:[%s5515_s3 + $0x50] sm:$0xff] }
 0x27b   :  { %1390 = vadd.xlane.f32.xlu0 %v1389_v18  ;;  %v2456_v52 = vadd.f32 %v2441_v63, %v2440_v23  ;;  %v1401_v4 = vmul.f32 %v5414_v46, %v1352_v61  ;;  %v1402_v8 = vmul.f32 %v5414_v46, %v1355_v3  ;;  %v2444_v13 = vmul.f32 %v2428_v30, %v57_v14  ;;  %v60_v3 = vld [vmem:[%s5515_s3 + $0x38] sm:$0xff] }
 0x27c   :  { %v2445_v24 = vmul.f32 %v2429_v29, %v58_v57  ;;  %v1431_v56 = vadd.f32 %v1416_v32, %v1415_v10  ;;  %v1403_v33 = vmul.f32 %v5414_v46, %v1358_v40  ;;  %v1404_v6 = vmul.f32 %v5414_v46, %v1361_v43 }
 0x27d   :  { %v2396_v26 = vpop.xlane.xlu2 %2395  ;;  %v2457_v54 = vadd.f32 %v2456_v52, %v2442_v5  ;;  %v1417_v18 = vmul.f32 %v1401_v4, %v55_v47  ;;  %v1418_v59 = vmul.f32 %v1402_v8, %v56_v42  ;;  %v64_v5 = vld [vmem:[%s5515_s3 + $0x58] sm:$0xff] }
 0x27e   :  { %v1364_v27 = vpop.xlane.xlu0 %1363  ;;  %v2430_v45 = vmul.f32 %v2396_v26, %v5414_v46  ;;  %v1419_v17 = vmul.f32 %v1403_v33, %v57_v14  ;;  %v61_v26 = vld [vmem:[%s5515_s3 + $0x40] sm:$0xff]  ;;  %v1420_v12 = vmul.f32 %v1404_v6, %v58_v57  ;;  %v66_v57 = vld [vmem:[%s5515_s3 + $0x68] sm:$0xff] }
 0x27f   :  { %v2399_v15 = vpop.xlane.xlu1 %2398  ;;  %v2458_v7 = vadd.f32 %v2457_v54, %v2443_v31  ;;  %v1432_v16 = vadd.f32 %v1431_v56, %v1417_v18  ;;  %v1405_v9 = vmul.f32 %v5414_v46, %v1364_v27  ;;  %v65_v31 = vld [vmem:[%s5515_s3 + $0x60] sm:$0xff]  ;;  %v68_v18 = vld [vmem:[%s5515_s3 + $0x78] sm:$0xff] }
 0x280   :  { %v2446_v1 = vmul.f32 %v2430_v45, %v59_v28  ;;  %v2431_v55 = vmul.f32 %v2399_v15, %v5414_v46 }
 0x281   :  { %v2459_v21 = vadd.f32 %v2458_v7, %v2444_v13  ;;  %v1433_v40 = vadd.f32 %v1432_v16, %v1418_v59  ;;  %v1421_v27 = vmul.f32 %v1405_v9, %v59_v28 }
 0x282   :  { %v2447_v15 = vmul.f32 %v2431_v55, %v60_v3 }
 0x283   :  { %v2460_v37 = vadd.f32 %v2459_v21, %v2445_v24  ;;  %v1434_v20 = vadd.f32 %v1433_v40, %v1419_v17 }
 0x285   :  { %v5412_v62 = vpop.xlane.xlu2 %1366  ;;  %v2461_v2 = vadd.f32 %v2460_v37, %v2446_v1  ;;  %v1435_v23 = vadd.f32 %v1434_v20, %v1420_v12 }
 0x286   :  { %v2402_v53 = vpop.xlane.xlu0 %2401  ;;  %v1406_v34 = vmul.f32 %v5414_v46, %v5412_v62 }
 0x287   :  { %v5424_v49 = vpop.xlane.xlu1 %1369  ;;  %v2432_v36 = vmul.f32 %v2402_v53, %v5414_v46  ;;  %v1436_v47 = vadd.f32 %v1435_v23, %v1421_v27 }
 0x288   :  { %v1422_v0 = vmul.f32 %v1406_v34, %v60_v3  ;;  %v1407_v62 = vmul.f32 %v5414_v46, %v5424_v49 }
 0x289   :  { %v2448_v53 = vmul.f32 %v2432_v36, %v61_v26 }
 0x28a   :  { %v1437_v29 = vadd.f32 %v1436_v47, %v1422_v0 }
 0x28d   :  { %v2405_v19 = vpop.xlane.xlu2 %2404 }
 0x28e   :  { %v5426_v38 = vpop.xlane.xlu0 %1372  ;;  %v2433_v51 = vmul.f32 %v2405_v19, %v5414_v46  ;;  %v2462_v19 = vadd.f32 %v2461_v2, %v2447_v15 }
 0x28f   :  { %v2408_v35 = vpop.xlane.xlu1 %2407  ;;  %v1408_v11 = vmul.f32 %v5414_v46, %v5426_v38  ;;  %v1423_v38 = vmul.f32 %v1407_v62, %v61_v26 }
 0x290   :  { %v2449_v43 = vmul.f32 %v2433_v51, %v62_v39  ;;  %v2463_v44 = vadd.f32 %v2462_v19, %v2448_v53  ;;  %v2434_v60 = vmul.f32 %v2408_v35, %v5414_v46 }
 0x291   :  { %v1424_v7 = vmul.f32 %v1408_v11, %v62_v39  ;;  %v1438_v8 = vadd.f32 %v1437_v29, %v1423_v38 }
 0x292   :  { %v2464_v42 = vadd.f32 %v2463_v44, %v2449_v43  ;;  %v2450_v30 = vmul.f32 %v2434_v60, %v63_v48 }
 0x293   :  { %v1439_v24 = vadd.f32 %v1438_v8, %v1424_v7 }
 0x294   :  { %v2465_v35 = vadd.f32 %v2464_v42, %v2450_v30 }
 0x295   :  { %v5438_v41 = vpop.xlane.xlu2 %1375 }
 0x296   :  { %v1409_v49 = vmul.f32 %v5414_v46, %v5438_v41  ;;  %v67_v41 = vld [vmem:[%s5515_s3 + $0x70] sm:$0xff] }
 0x297   :  { %v1379_v50 = vpop.xlane.xlu1 %1378 }
 0x298   :  { %v1425_v28 = vmul.f32 %v1409_v49, %v63_v48  ;;  %v1410_v56 = vmul.f32 %v5414_v46, %v1379_v50  ;;  %v69_v48 = vld [vmem:[%s5516_s4] sm:$0x1] }
 0x29a   :  { %v1440_v37 = vadd.f32 %v1439_v24, %v1425_v28  ;;  %v1426_v17 = vmul.f32 %v1410_v56, %v64_v5 }
 0x29c   :  { %v1441_v40 = vadd.f32 %v1440_v37, %v1426_v17 }
 0x29f   :  { %v2417_v14 = vpop.xlane.xlu1 %2416 }
 0x2a0   :  { %v2437_v32 = vmul.f32 %v2417_v14, %v5414_v46 }
 0x2a2   :  { %v2453_v33 = vmul.f32 %v2437_v32, %v66_v57 }
 0x2a6   :  { %v2411_v25 = vpop.xlane.xlu0 %2410 }
 0x2a7   :  { %v2435_v63 = vmul.f32 %v2411_v25, %v5414_v46 }
 0x2a9   :  { %v2451_v54 = vmul.f32 %v2435_v63, %v64_v5 }
 0x2ab   :  { %v2466_v45 = vadd.f32 %v2465_v35, %v2451_v54 }
 0x2b0   :  { %v2414_v61 = vpop.xlane.xlu2 %2413 }
 0x2b1   :  { %v2436_v52 = vmul.f32 %v2414_v61, %v5414_v46 }
 0x2b3   :  { %v2452_v25 = vmul.f32 %v2436_v52, %v65_v31 }
 0x2b5   :  { %v2467_v13 = vadd.f32 %v2466_v45, %v2452_v25 }
 0x2b7   :  { %v2468_v36 = vadd.f32 %v2467_v13, %v2453_v33 }
 0x2bd   :  { %v1382_v58 = vpop.xlane.xlu0 %1381 }
 0x2be   :  { %v1411_v21 = vmul.f32 %v5414_v46, %v1382_v58 }
 0x2c0   :  { %v1427_v3 = vmul.f32 %v1411_v21, %v65_v31 }
 0x2c2   :  { %v1442_v26 = vadd.f32 %v1441_v40, %v1427_v3 }
 0x2c8   :  { %v1388_v51 = vpop.xlane.xlu1 %1387 }
 0x2c9   :  { %v1413_v39 = vmul.f32 %v5414_v46, %v1388_v51 }
 0x2cb   :  { %v1385_v22 = vpop.xlane.xlu2 %1384  ;;  %v1429_v20 = vmul.f32 %v1413_v39, %v67_v41 }
 0x2cc   :  { %v1412_v55 = vmul.f32 %v5414_v46, %v1385_v22 }
 0x2ce   :  { %v1428_v6 = vmul.f32 %v1412_v55, %v66_v57 }
 0x2d0   :  { %v1443_v58 = vadd.f32 %v1442_v26, %v1428_v6 }
 0x2d2   :  { %v1444_v27 = vadd.f32 %v1443_v58, %v1429_v20 }
 0x2d9   :  { %v2420_v10 = vpop.xlane.xlu0 %2419 }
 0x2da   :  { %v2438_v4 = vmul.f32 %v2420_v10, %v5414_v46 }
 0x2dc   :  { %v2454_v1 = vmul.f32 %v2438_v4, %v67_v41 }
 0x2de   :  { %v2469_v61 = vadd.f32 %v2468_v36, %v2454_v1 }
 0x2e4   :  { %v2423_v59 = vpop.xlane.xlu2 %2422 }
 0x2e5   :  { %v2439_v16 = vmul.f32 %v2423_v59, %v5414_v46 }
 0x2e7   :  { %v2455_v2 = vmul.f32 %v2439_v16, %v68_v18 }
 0x2e9   :  { %v2470_v9 = vadd.f32 %v2469_v61, %v2455_v2 }
 0x2eb   :  { %v2471_v50 = vrot.slane %v2470_v9, 4 }
 0x2ed   :  { %v2472_v15 = vadd.f32 %v2471_v50, %v2470_v9 }
 0x2ee   :  { %v1391_v53 = vpop.xlane.xlu0 %1390 }
 0x2ef   :  { %v2473_v34 = vrot.slane %v2472_v15, 2  ;;  %v1414_v19 = vmul.f32 %v5414_v46, %v1391_v53 }
 0x2f1   :  { %v2474_v43 = vadd.f32 %v2473_v34, %v2472_v15  ;;  %v1430_v12 = vmul.f32 %v1414_v19, %v68_v18 }
 0x2f3   :  { %v2475_v44 = vrot.slane %v2474_v43, 1  ;;  %v1445_v60 = vadd.f32 %v1444_v27, %v1430_v12 }
 0x2f5   :  { %v1446_v63 = vrot.slane %v1445_v60, 4  ;;  %v2476_v23 = vadd.f32 %v2475_v44, %v2474_v43 }
 0x2f7   :  { %v1447_v0 = vadd.f32 %v1446_v63, %v1445_v60  ;;  %v2477_v47 = vadd.f32 %v2476_v23, %v69_v48 }
 0x2f9   :  { %v1448_v42 = vrot.slane %v1447_v0, 2  ;;  %v2479_v5 = vrot.slane %v2477_v47, 7 }
 0x2fb   :  { %v1449_v52 = vadd.f32 %v1448_v42, %v1447_v0 }
 0x2fd   :  { %v1450_v62 = vrot.slane %v1449_v52, 1 }
 0x2ff   :  { %v1451_v11 = vadd.f32 %v1450_v62, %v1449_v52 }
 0x301   :  { %v1452_v46 = vadd.f32 %v1451_v11, %v69_v48 }
 0x303   :  { %v2482_v31 = vsel %vm2481_vm1, %v1452_v46, %v2479_v5 }
 0x304   :  { %2483 = vst [vmem:[#allocation2] sm:$0x3] %v2482_v31 }
 0x305   :  { %2494 = dma.vmem_to_hbm [thread:$0]  %s2490_s12, 32, %s2492_s15, [#allocation3]  }
 0x306   :  { %2867 = dma.done.wait [#allocation3], 32  }
 0x307   :  { %2868 = vsyncadd [#allocation3], 4294967264 }
 0x308   :  { %2499 = vsyncpa [#allocation3], 1 }

</bundles_post_ra>
